<compile_context>
chip_gen: v7x
topology: tpu7x:2x2x1
jax: 0.10.0
libtpu: 0.0.40
codegen_flags: <defaults>
</compile_context>

<pallas_src>
import functools

import jax
import jax.numpy as jnp
from jax import lax
from jax.experimental import pallas as pl
from jax.experimental.pallas import tpu as pltpu

FEATURES = 64          # per-branch feature width
FUSED = 2 * FEATURES   # both branches stacked on the 128-lane axis
BN_EPS = 1e-5
PAD_L = 16             # left halo columns (bf16 (16,128) sublane tile aligned)


def _round_up(x, m):
    return (x + m - 1) // m * m


# ----------------------------------------------------------------------------
# Fused kernel: one (image, row-strip)
# ----------------------------------------------------------------------------
def _dncnn_kernel(x_ref, w_ref, sc_ref, bs_ref, wl_ref, out_ref, buf,
                  *, n_lay, sh, halo, rows, iw, w_c, n_strips):
    """Whole two-branch DnCNN for one row strip, VMEM-resident.

    x_ref  : (1, Hp, W, 128) bf16   row-padded, channel-padded fused input
    w_ref  : (n_lay, 3, 384, 128) bf16  kx-stacked weights (layer 0 + mids)
    sc_ref : (n_lay, 1, 128) f32    folded BN scale (1.0 for layer 0)
    bs_ref : (n_lay, 1, 128) f32    folded BN shift (0.0 for layer 0)
    wl_ref : (3, 384, 128) bf16     kx-stacked conv_l weights (cout -> 128)
    out_ref: (1, rows, W, 128) f32
    buf    : VMEM (sh+2, w_r, 128) bf16  zero-halo activation slab (in-place)
    """
    s = pl.program_id(1)
    w_r = buf.shape[1]
    dt = buf.dtype

    # Zero only the halo strips (never written elsewhere).  Done every grid
    # step because scratch is per-core under "parallel" grid sharding.
    buf[0, :, :] = jnp.zeros((w_r, FUSED), dt)
    buf[sh + 1, :, :] = jnp.zeros((w_r, FUSED), dt)
    buf[:, 0:PAD_L, :] = jnp.zeros((sh + 2, PAD_L, FUSED), dt)
    buf[:, PAD_L + iw:, :] = jnp.zeros((sh + 2, w_r - PAD_L - iw, FUSED), dt)

    # Stage this strip's input window.  Out-of-image rows arrive as zeros
    # from the wrapper's row padding; interior store is sublane aligned.
    row0 = s * rows
    buf[1:sh + 1, PAD_L:PAD_L + iw, :] = x_ref[0, pl.ds(row0, sh), :, :]

    def conv3x3(w_of_ky):
        # Load the three kx-shifted slabs ONCE per layer and stack them on
        # the channel axis -> 3 matmuls with K = 3*128 = 384 per layer.
        slabs = [buf[:, PAD_L - 1 + kx:PAD_L - 1 + kx + w_c, :]
                 for kx in range(3)]
        patch = jnp.concatenate(slabs, axis=-1)            # (sh+2, w_c, 384)
        patch = patch.reshape((sh + 2) * w_c, 3 * FUSED)   # layout-preserving
        acc = jnp.zeros((sh * w_c, FUSED), jnp.float32)
        for ky in range(3):
            acc = acc + jnp.dot(patch[ky * w_c:(ky + sh) * w_c, :],
                                w_of_ky(ky),
                                preferred_element_type=jnp.float32)
        return acc.reshape(sh, w_c, FUSED)

    # ---- layer 0 + mid layers: conv + folded BN + ReLU ----------------------
    def layer_step(l, carry):
        y = conv3x3(lambda ky: w_ref[l, ky, :, :])
        y = jnp.maximum(y * sc_ref[l, :, :] + bs_ref[l, :, :], 0.0)
        buf[1:sh + 1, PAD_L:PAD_L + iw, :] = y[:, :iw, :].astype(dt)
        if halo > 0:
            # Rows outside the image must be zero at every layer's input
            # (this is exactly Conv2d's padding=1 at the image border).
            @pl.when(s == 0)
            def _():
                buf[1:1 + halo, :, :] = jnp.zeros((halo, w_r, FUSED), dt)

            @pl.when(s == n_strips - 1)
            def _():
                buf[sh + 1 - halo:sh + 1, :, :] = jnp.zeros(
                    (halo, w_r, FUSED), dt)
        return carry

    lax.fori_loop(0, n_lay, layer_step, 0)

    # ---- final conv_l: no BN / ReLU; store only this strip's valid rows ----
    y = conv3x3(lambda ky: wl_ref[ky, :, :])
    out_ref[0, :, :, :] = y[halo:halo + rows, :iw, :].astype(out_ref.dtype)


# ----------------------------------------------------------------------------
# Host-side packing and wrapper
# ----------------------------------------------------------------------------
def _pack_operands(params, channels):
    """Stack both branches block-diagonally on the 128-lane axis and stack
    the three kx taps on the contraction axis (K = 3*128) per layer."""
    b1, b2 = params["branch1"], params["branch2"]
    f = FEATURES
    n_mid = len(b1["mid"])
    n_lay = 1 + n_mid

    w_list, sc_list, bs_list = [], [], []

    w0 = jnp.zeros((3, 3, FUSED, FUSED), jnp.float32)
    w0 = w0.at[:, :, :channels, :f].set(b1["conv0"])
    w0 = w0.at[:, :, channels:3 * channels, f:].set(b2["conv0"])
    w_list.append(w0)
    sc_list.append(jnp.ones((FUSED,), jnp.float32))     # layer 0: no BN
    bs_list.append(jnp.zeros((FUSED,), jnp.float32))

    for l in range(n_mid):
        m1, m2 = b1["mid"][l], b2["mid"][l]
        blk = jnp.zeros((3, 3, FUSED, FUSED), jnp.float32)
        blk = blk.at[:, :, :f, :f].set(m1["w"])
        blk = blk.at[:, :, f:, f:].set(m2["w"])
        w_list.append(blk)
        sc_list.append(jnp.concatenate([m1["scale"], m2["scale"]]))
        bs_list.append(jnp.concatenate([m1["bias"], m2["bias"]]))

    # (n_lay, 3, 3, 128, 128) -> (n_lay, 3, 3*128, 128): kx stacked on K.
    w_all = jnp.stack(w_list).reshape(n_lay, 3, 3 * FUSED, FUSED)
    w_all = w_all.astype(jnp.bfloat16)
    sc = jnp.stack(sc_list).reshape(n_lay, 1, FUSED).astype(jnp.float32)
    bs = jnp.stack(bs_list).reshape(n_lay, 1, FUSED).astype(jnp.float32)

    wl = jnp.zeros((3, 3, FUSED, FUSED), jnp.float32)   # cout padded to 128
    wl = wl.at[:, :, :, :channels].set(params["conv_l"])
    wl = wl.reshape(3, 3 * FUSED, FUSED).astype(jnp.bfloat16)
    return w_all, sc, bs, wl


def dncnn_forward(params, input1_nchw, input2_nchw, rows_per_strip=64):
    """Two-branch DnCNN forward. Inputs/outputs are NCHW like PyTorch."""
    channels = input1_nchw.shape[1]
    x1 = jnp.transpose(input1_nchw, (0, 2, 3, 1))
    x2 = jnp.transpose(input2_nchw, (0, 2, 3, 1))
    x = jnp.concatenate([x1, x2], axis=-1)               # (N, H, W, 3*channels)
    n, h, iw, cin = x.shape
    assert cin <= FUSED
    # Zero-pad fused input channels to the full 128-lane width (padded
    # channels have zero weights, so this is exact) -> one uniform layer path.
    x = jnp.pad(x, ((0, 0), (0, 0), (0, 0), (0, FUSED - cin)))

    w_all, sc, bs, wl = _pack_operands(params, channels)
    n_lay = w_all.shape[0]
    n_conv = n_lay + 1                                    # + conv_l

    # Row-strip tiling: halo = receptive-field radius of the fused stack.
    rows = rows_per_strip
    halo = n_conv
    if rows >= h or (h % rows) != 0 or rows < halo:
        rows, halo, n_strips = h, 0, 1                    # whole image fits
    else:
        n_strips = h // rows
    sh = rows + 2 * halo
    if halo > 0:
        x = jnp.pad(x, ((0, 0), (halo, halo), (0, 0), (0, 0)))
    x = x.astype(jnp.bfloat16)
    hp = h + 2 * halo

    w_c = _round_up(iw, 16)                               # aligned compute width
    w_r = PAD_L + w_c + 16                                # zero cols right of interior

    try:
        vmem_cap = int(pltpu.get_tpu_info().vmem_capacity_bytes)
    except Exception:  # conservative fallback
        vmem_cap = 64 * 1024 * 1024
    vmem_limit = min(vmem_cap * 3 // 4, 100 * 1024 * 1024)

    kernel = functools.partial(
        _dncnn_kernel, n_lay=n_lay, sh=sh, halo=halo, rows=rows, iw=iw,
        w_c=w_c, n_strips=n_strips)

    out = pl.pallas_call(
        kernel,
        out_shape=jax.ShapeDtypeStruct((n, h, iw, FUSED), jnp.float32),
        grid=(n, n_strips),
        in_specs=[
            # Full (row-padded) image per block; constant in s, so the input
            # DMA is only re-issued when the image index changes.
            pl.BlockSpec((1, hp, iw, FUSED), lambda i, s: (i, 0, 0, 0)),
            # Weights: constant index maps -> fetched once.
            # TODO(synk): pl.Buffered(1) on v7x at 17 layers to drop their
            # double buffers.
            pl.BlockSpec(w_all.shape, lambda i, s: (0, 0, 0, 0)),
            pl.BlockSpec(sc.shape, lambda i, s: (0, 0, 0)),
            pl.BlockSpec(bs.shape, lambda i, s: (0, 0, 0)),
            pl.BlockSpec(wl.shape, lambda i, s: (0, 0, 0)),
        ],
        out_specs=pl.BlockSpec((1, rows, iw, FUSED), lambda i, s: (i, s, 0, 0)),
        scratch_shapes=[
            pltpu.VMEM((sh + 2, w_r, FUSED), jnp.bfloat16),  # activation slab
        ],
        compiler_params=pltpu.CompilerParams(
            dimension_semantics=("parallel", "parallel"),
            vmem_limit_bytes=vmem_limit,
        ),
    )(x, w_all, sc, bs, wl)

    out = out[..., :channels]                             # drop lane padding
    return jnp.transpose(out, (0, 3, 1, 2))


# ----------------------------------------------------------------------------
# Deterministic parameters (matching the nn.Module __init__ shapes)
# ----------------------------------------------------------------------------
def _make_branch_params(key, in_channels, num_of_layers):
    n_mid = num_of_layers - 2
    keys = jax.random.split(key, 1 + 5 * n_mid)
    params = {"conv0": 0.05 * jax.random.normal(
        keys[0], (3, 3, in_channels, FEATURES), jnp.float32)}
    mids = []
    for i in range(n_mid):
        kw, kg, kb, km, kv = keys[1 + 5 * i: 6 + 5 * i]
        wgt = 0.05 * jax.random.normal(kw, (3, 3, FEATURES, FEATURES), jnp.float32)
        gamma = 1.0 + 0.1 * jax.random.normal(kg, (FEATURES,), jnp.float32)
        beta = 0.1 * jax.random.normal(kb, (FEATURES,), jnp.float32)
        mean = 0.1 * jax.random.normal(km, (FEATURES,), jnp.float32)
        var = jnp.abs(1.0 + 0.1 * jax.random.normal(kv, (FEATURES,), jnp.float32))
        # TODO(synk): BatchNorm2d is folded as inference-mode scale/shift;
        # training-mode batch statistics are not modeled.
        scale = gamma / jnp.sqrt(var + BN_EPS)
        bias = beta - mean * scale
        mids.append({"w": wgt, "scale": scale, "bias": bias})
    params["mid"] = mids
    return params


def make_dncnn_params(key, channels, num_of_layers):
    assert num_of_layers >= 3
    k1, k2, k3 = jax.random.split(key, 3)
    return {
        "branch1": _make_branch_params(k1, channels, num_of_layers),
        "branch2": _make_branch_params(k2, 2 * channels, num_of_layers),
        "conv_l": 0.05 * jax.random.normal(
            k3, (3, 3, 2 * FEATURES, channels), jnp.float32),
    }


# ----------------------------------------------------------------------------
# Pure-JAX reference (same bf16 rounding points as the kernel)
# ----------------------------------------------------------------------------
def _conv3x3_ref(x, w):
    return lax.conv_general_dilated(
        x.astype(jnp.bfloat16), w.astype(jnp.bfloat16),
        window_strides=(1, 1), padding=((1, 1), (1, 1)),
        dimension_numbers=("NHWC", "HWIO", "NHWC"),
        preferred_element_type=jnp.float32)


def dncnn_reference(params, input1_nchw, input2_nchw):
    def branch(x, bp):
        y = jnp.maximum(_conv3x3_ref(x, bp["conv0"]), 0.0)
        for layer in bp["mid"]:
            z = _conv3x3_ref(y, layer["w"]) * layer["scale"] + layer["bias"]
            y = jnp.maximum(z, 0.0)
        return y

    x1 = jnp.transpose(input1_nchw, (0, 2, 3, 1)).astype(jnp.bfloat16)
    x2 = jnp.transpose(input2_nchw, (0, 2, 3, 1)).astype(jnp.bfloat16)
    o1 = branch(x1, params["branch1"])
    o2 = branch(x2, params["branch2"])
    out = _conv3x3_ref(jnp.concatenate([o1, o2], axis=-1), params["conv_l"])
    return jnp.transpose(out, (0, 3, 1, 2))


# ----------------------------------------------------------------------------
if __name__ == "__main__":
    CHANNELS = 4
    NUM_LAYERS = 5          # module default is 17; shallow for the demo
    N, H, W = 2, 16, 16
    ROWS_PER_STRIP = 8      # 2 row strips -> exercises the halo/strip path

    key = jax.random.PRNGKey(0)
    kp, k1, k2 = jax.random.split(key, 3)
    params = make_dncnn_params(kp, CHANNELS, NUM_LAYERS)

    # PyTorch-style NCHW inputs: branch 1 takes `channels`, branch 2 `2*channels`.
    input1 = jax.random.normal(k1, (N, CHANNELS, H, W), jnp.float32)
    input2 = jax.random.normal(k2, (N, 2 * CHANNELS, H, W), jnp.float32)

    fwd = jax.jit(functools.partial(dncnn_forward,
                                    rows_per_strip=ROWS_PER_STRIP))
    out = jax.block_until_ready(fwd(params, input1, input2))

    assert out.shape == (N, CHANNELS, H, W), out.shape
    assert bool(jnp.all(jnp.isfinite(out)))

    # Validate against a pure-JAX reference with matching bf16 rounding points.
    ref = jax.block_until_ready(jax.jit(dncnn_reference)(params, input1, input2))
    max_err = float(jnp.max(jnp.abs(out - ref)))
    assert max_err < 3e-2, f"kernel vs reference max abs err = {max_err}"

    print("KERNEL_OK")
</pallas_src>

<mosaic_0001>
module attributes {stable_mosaic.version = 11 : i64} {
  func.func @_dncnn_kernel(%arg0: i32, %arg1: i32, %arg2: memref<1x26x16x128xbf16, #tpu.memory_space<vmem>>, %arg3: memref<4x3x384x128xbf16, #tpu.memory_space<vmem>>, %arg4: memref<4x1x128xf32, #tpu.memory_space<vmem>>, %arg5: memref<4x1x128xf32, #tpu.memory_space<vmem>>, %arg6: memref<3x384x128xbf16, #tpu.memory_space<vmem>>, %arg7: memref<1x8x16x128xf32, #tpu.memory_space<vmem>>, %arg8: memref<20x48x128xbf16, #tpu.memory_space<vmem>>) attributes {dimension_semantics = [#tpu.dimension_semantics<parallel>, #tpu.dimension_semantics<parallel>], iteration_bounds = array<i64: 2, 2>, scalar_prefetch = 0 : i64, scratch_operands = 1 : i64, tpu.core_type = #tpu.core_type<tc>, window_params = [{transform_indices = @transform_0, window_bounds = array<i64: 1, 26, 16, 128>}, {pipeline_mode = #tpu.pipeline_mode<synchronous>, transform_indices = @transform_1, window_bounds = array<i64: 4, 3, 384, 128>}, {pipeline_mode = #tpu.pipeline_mode<synchronous>, transform_indices = @transform_2, window_bounds = array<i64: 4, 1, 128>}, {pipeline_mode = #tpu.pipeline_mode<synchronous>, transform_indices = @transform_3, window_bounds = array<i64: 4, 1, 128>}, {pipeline_mode = #tpu.pipeline_mode<synchronous>, transform_indices = @transform_4, window_bounds = array<i64: 3, 384, 128>}, {transform_indices = @transform_5, window_bounds = array<i64: 1, 8, 16, 128>}]} {
    %cst = arith.constant 0.000000e+00 : bf16
    %0 = vector.broadcast %cst : bf16 to vector<48x128xbf16>
    %c0 = arith.constant 0 : index
    %c0_0 = arith.constant 0 : index
    %c0_1 = arith.constant 0 : index
    %1 = vector.load %arg8[%c0, %c0_0, %c0_1] : memref<20x48x128xbf16, #tpu.memory_space<vmem>>, vector<1x48x128xbf16>
    %2 = vector.shape_cast %1 : vector<1x48x128xbf16> to vector<48x128xbf16>
    %3 = vector.shape_cast %0 : vector<48x128xbf16> to vector<1x48x128xbf16>
    tpu.vector_store %arg8[%c0, %c0_0, %c0_1], %3 {strides = array<i32>} : memref<20x48x128xbf16, #tpu.memory_space<vmem>>, vector<1x48x128xbf16>,
    %cst_2 = arith.constant 0.000000e+00 : bf16
    %4 = vector.broadcast %cst_2 : bf16 to vector<48x128xbf16>
    %c19 = arith.constant 19 : index
    %c0_3 = arith.constant 0 : index
    %c0_4 = arith.constant 0 : index
    %5 = vector.load %arg8[%c19, %c0_3, %c0_4] : memref<20x48x128xbf16, #tpu.memory_space<vmem>>, vector<1x48x128xbf16>
    %6 = vector.shape_cast %5 : vector<1x48x128xbf16> to vector<48x128xbf16>
    %7 = vector.shape_cast %4 : vector<48x128xbf16> to vector<1x48x128xbf16>
    tpu.vector_store %arg8[%c19, %c0_3, %c0_4], %7 {strides = array<i32>} : memref<20x48x128xbf16, #tpu.memory_space<vmem>>, vector<1x48x128xbf16>,
    %cst_5 = arith.constant 0.000000e+00 : bf16
    %8 = vector.broadcast %cst_5 : bf16 to vector<20x16x128xbf16>
    %c0_6 = arith.constant 0 : index
    %c0_7 = arith.constant 0 : index
    %c0_8 = arith.constant 0 : index
    %9 = vector.load %arg8[%c0_6, %c0_7, %c0_8] : memref<20x48x128xbf16, #tpu.memory_space<vmem>>, vector<20x16x128xbf16>
    tpu.vector_store %arg8[%c0_6, %c0_7, %c0_8], %8 {strides = array<i32>} : memref<20x48x128xbf16, #tpu.memory_space<vmem>>, vector<20x16x128xbf16>,
    %cst_9 = arith.constant 0.000000e+00 : bf16
    %10 = vector.broadcast %cst_9 : bf16 to vector<20x16x128xbf16>
    %c0_10 = arith.constant 0 : index
    %c32 = arith.constant 32 : index
    %c0_11 = arith.constant 0 : index
    %11 = vector.load %arg8[%c0_10, %c32, %c0_11] : memref<20x48x128xbf16, #tpu.memory_space<vmem>>, vector<20x16x128xbf16>
    tpu.vector_store %arg8[%c0_10, %c32, %c0_11], %10 {strides = array<i32>} : memref<20x48x128xbf16, #tpu.memory_space<vmem>>, vector<20x16x128xbf16>,
    %c8_i32 = arith.constant 8 : i32
    %12 = arith.muli %arg1, %c8_i32 : i32
    %c0_12 = arith.constant 0 : index
    %13 = arith.index_cast %12 : i32 to index
    %c0_13 = arith.constant 0 : index
    %c0_14 = arith.constant 0 : index
    %14 = vector.load %arg2[%c0_12, %13, %c0_13, %c0_14] : memref<1x26x16x128xbf16, #tpu.memory_space<vmem>>, vector<1x18x16x128xbf16>
    %15 = vector.shape_cast %14 : vector<1x18x16x128xbf16> to vector<18x16x128xbf16>
    %c1 = arith.constant 1 : index
    %c16 = arith.constant 16 : index
    %c0_15 = arith.constant 0 : index
    %16 = vector.load %arg8[%c1, %c16, %c0_15] : memref<20x48x128xbf16, #tpu.memory_space<vmem>>, vector<18x16x128xbf16>
    tpu.vector_store %arg8[%c1, %c16, %c0_15], %15 {strides = array<i32>} : memref<20x48x128xbf16, #tpu.memory_space<vmem>>, vector<18x16x128xbf16>,
    %c0_i32 = arith.constant 0 : i32
    %c4_i32 = arith.constant 4 : i32
    %17 = arith.addi %c0_i32, %c4_i32 : i32
    %c1_i32 = arith.constant 1 : i32
    scf.for %arg9 = %c0_i32 to %17 step %c1_i32  : i32 {
      %c0_40 = arith.constant 0 : index
      %c15_41 = arith.constant 15 : index
      %c0_42 = arith.constant 0 : index
      %44 = vector.load %arg8[%c0_40, %c15_41, %c0_42] : memref<20x48x128xbf16, #tpu.memory_space<vmem>>, vector<20x16x128xbf16>
      %c0_43 = arith.constant 0 : index
      %c16_44 = arith.constant 16 : index
      %c0_45 = arith.constant 0 : index
      %45 = vector.load %arg8[%c0_43, %c16_44, %c0_45] : memref<20x48x128xbf16, #tpu.memory_space<vmem>>, vector<20x16x128xbf16>
      %c0_46 = arith.constant 0 : index
      %c17_47 = arith.constant 17 : index
      %c0_48 = arith.constant 0 : index
      %46 = vector.load %arg8[%c0_46, %c17_47, %c0_48] : memref<20x48x128xbf16, #tpu.memory_space<vmem>>, vector<20x16x128xbf16>
      %47 = tpu.concatenate %44, %45, %46 in 2 : vector<20x16x128xbf16>, vector<20x16x128xbf16>, vector<20x16x128xbf16> -> vector<20x16x384xbf16>
      %48 = vector.shape_cast %47 : vector<20x16x384xbf16> to vector<320x384xbf16>
      %cst_49 = arith.constant 0.000000e+00 : f32
      %49 = vector.broadcast %cst_49 : f32 to vector<288x128xf32>
      %50 = vector.extract_strided_slice %48 {offsets = [0, 0], sizes = [288, 384], strides = [1, 1]} : vector<320x384xbf16> to vector<288x384xbf16>
      %51 = arith.index_cast %arg9 : i32 to index
      %c0_50 = arith.constant 0 : index
      %c0_51 = arith.constant 0 : index
      %c0_52 = arith.constant 0 : index
      %52 = vector.load %arg3[%51, %c0_50, %c0_51, %c0_52] : memref<4x3x384x128xbf16, #tpu.memory_space<vmem>>, vector<1x1x384x128xbf16>
      %53 = vector.shape_cast %52 : vector<1x1x384x128xbf16> to vector<384x128xbf16>
      %cst_53 = arith.constant dense<0.000000e+00> : vector<288x128xf32>
      %54 = tpu.matmul %50, %53, %cst_53 {dimension_numbers = #tpu.dot_dimension_numbers<[1], [0], [0], [1], [0, 0, 1, 1], [], []>} : vector<288x384xbf16>, vector<384x128xbf16>, vector<288x128xf32> -> vector<288x128xf32>
      %55 = arith.addf %49, %54 : vector<288x128xf32>
      %56 = vector.extract_strided_slice %48 {offsets = [16, 0], sizes = [288, 384], strides = [1, 1]} : vector<320x384xbf16> to vector<288x384xbf16>
      %57 = arith.index_cast %arg9 : i32 to index
      %c1_54 = arith.constant 1 : index
      %c0_55 = arith.constant 0 : index
      %c0_56 = arith.constant 0 : index
      %58 = vector.load %arg3[%57, %c1_54, %c0_55, %c0_56] : memref<4x3x384x128xbf16, #tpu.memory_space<vmem>>, vector<1x1x384x128xbf16>
      %59 = vector.shape_cast %58 : vector<1x1x384x128xbf16> to vector<384x128xbf16>
      %cst_57 = arith.constant dense<0.000000e+00> : vector<288x128xf32>
      %60 = tpu.matmul %56, %59, %cst_57 {dimension_numbers = #tpu.dot_dimension_numbers<[1], [0], [0], [1], [0, 0, 1, 1], [], []>} : vector<288x384xbf16>, vector<384x128xbf16>, vector<288x128xf32> -> vector<288x128xf32>
      %61 = arith.addf %55, %60 : vector<288x128xf32>
      %62 = vector.extract_strided_slice %48 {offsets = [32, 0], sizes = [288, 384], strides = [1, 1]} : vector<320x384xbf16> to vector<288x384xbf16>
      %63 = arith.index_cast %arg9 : i32 to index
      %c2_58 = arith.constant 2 : index
      %c0_59 = arith.constant 0 : index
      %c0_60 = arith.constant 0 : index
      %64 = vector.load %arg3[%63, %c2_58, %c0_59, %c0_60] : memref<4x3x384x128xbf16, #tpu.memory_space<vmem>>, vector<1x1x384x128xbf16>
      %65 = vector.shape_cast %64 : vector<1x1x384x128xbf16> to vector<384x128xbf16>
      %cst_61 = arith.constant dense<0.000000e+00> : vector<288x128xf32>
      %66 = tpu.matmul %62, %65, %cst_61 {dimension_numbers = #tpu.dot_dimension_numbers<[1], [0], [0], [1], [0, 0, 1, 1], [], []>} : vector<288x384xbf16>, vector<384x128xbf16>, vector<288x128xf32> -> vector<288x128xf32>
      %67 = arith.addf %61, %66 : vector<288x128xf32>
      %68 = vector.shape_cast %67 : vector<288x128xf32> to vector<18x16x128xf32>
      %69 = arith.index_cast %arg9 : i32 to index
      %c0_62 = arith.constant 0 : index
      %c0_63 = arith.constant 0 : index
      %70 = vector.load %arg4[%69, %c0_62, %c0_63] : memref<4x1x128xf32, #tpu.memory_space<vmem>>, vector<1x1x128xf32>
      %71 = vector.shape_cast %70 : vector<1x1x128xf32> to vector<1x128xf32>
      %72 = vector.shape_cast %71 : vector<1x128xf32> to vector<1x1x128xf32>
      %73 = vector.broadcast %72 : vector<1x1x128xf32> to vector<18x16x128xf32>
      %74 = arith.mulf %68, %73 : vector<18x16x128xf32>
      %75 = arith.index_cast %arg9 : i32 to index
      %c0_64 = arith.constant 0 : index
      %c0_65 = arith.constant 0 : index
      %76 = vector.load %arg5[%75, %c0_64, %c0_65] : memref<4x1x128xf32, #tpu.memory_space<vmem>>, vector<1x1x128xf32>
      %77 = vector.shape_cast %76 : vector<1x1x128xf32> to vector<1x128xf32>
      %78 = vector.shape_cast %77 : vector<1x128xf32> to vector<1x1x128xf32>
      %79 = vector.broadcast %78 : vector<1x1x128xf32> to vector<18x16x128xf32>
      %80 = arith.addf %74, %79 : vector<18x16x128xf32>
      %cst_66 = arith.constant 0.000000e+00 : f32
      %81 = vector.broadcast %cst_66 : f32 to vector<18x16x128xf32>
      %82 = arith.maximumf %80, %81 : vector<18x16x128xf32>
      %83 = arith.truncf %82 : vector<18x16x128xf32> to vector<18x16x128xbf16>
      %c1_67 = arith.constant 1 : index
      %c16_68 = arith.constant 16 : index
      %c0_69 = arith.constant 0 : index
      %84 = vector.load %arg8[%c1_67, %c16_68, %c0_69] : memref<20x48x128xbf16, #tpu.memory_space<vmem>>, vector<18x16x128xbf16>
      tpu.vector_store %arg8[%c1_67, %c16_68, %c0_69], %83 {strides = array<i32>} : memref<20x48x128xbf16, #tpu.memory_space<vmem>>, vector<18x16x128xbf16>,
      %c0_i32_70 = arith.constant 0 : i32
      %85 = arith.cmpi eq, %arg1, %c0_i32_70 : i32
      %86 = arith.extui %85 : i1 to i32
      %c0_i32_71 = arith.constant 0 : i32
      %87 = arith.cmpi ne, %86, %c0_i32_71 : i32
      scf.if %87 {
        %cst_74 = arith.constant 0.000000e+00 : bf16
        %91 = vector.broadcast %cst_74 : bf16 to vector<5x48x128xbf16>
        %c1_75 = arith.constant 1 : index
        %c0_76 = arith.constant 0 : index
        %c0_77 = arith.constant 0 : index
        %92 = vector.load %arg8[%c1_75, %c0_76, %c0_77] : memref<20x48x128xbf16, #tpu.memory_space<vmem>>, vector<5x48x128xbf16>
        tpu.vector_store %arg8[%c1_75, %c0_76, %c0_77], %91 {strides = array<i32>} : memref<20x48x128xbf16, #tpu.memory_space<vmem>>, vector<5x48x128xbf16>,
      } else {
      }
      %c1_i32_72 = arith.constant 1 : i32
      %88 = arith.cmpi eq, %arg1, %c1_i32_72 : i32
      %89 = arith.extui %88 : i1 to i32
      %c0_i32_73 = arith.constant 0 : i32
      %90 = arith.cmpi ne, %89, %c0_i32_73 : i32
      scf.if %90 {
        %cst_74 = arith.constant 0.000000e+00 : bf16
        %91 = vector.broadcast %cst_74 : bf16 to vector<5x48x128xbf16>
        %c14 = arith.constant 14 : index
        %c0_75 = arith.constant 0 : index
        %c0_76 = arith.constant 0 : index
        %92 = vector.load %arg8[%c14, %c0_75, %c0_76] : memref<20x48x128xbf16, #tpu.memory_space<vmem>>, vector<5x48x128xbf16>
        tpu.vector_store %arg8[%c14, %c0_75, %c0_76], %91 {strides = array<i32>} : memref<20x48x128xbf16, #tpu.memory_space<vmem>>, vector<5x48x128xbf16>,
      } else {
      }
    }
    %c4_i32_16 = arith.constant 4 : i32
    %c0_17 = arith.constant 0 : index
    %c15 = arith.constant 15 : index
    %c0_18 = arith.constant 0 : index
    %18 = vector.load %arg8[%c0_17, %c15, %c0_18] : memref<20x48x128xbf16, #tpu.memory_space<vmem>>, vector<20x16x128xbf16>
    %c0_19 = arith.constant 0 : index
    %c16_20 = arith.constant 16 : index
    %c0_21 = arith.constant 0 : index
    %19 = vector.load %arg8[%c0_19, %c16_20, %c0_21] : memref<20x48x128xbf16, #tpu.memory_space<vmem>>, vector<20x16x128xbf16>
    %c0_22 = arith.constant 0 : index
    %c17 = arith.constant 17 : index
    %c0_23 = arith.constant 0 : index
    %20 = vector.load %arg8[%c0_22, %c17, %c0_23] : memref<20x48x128xbf16, #tpu.memory_space<vmem>>, vector<20x16x128xbf16>
    %21 = tpu.concatenate %18, %19, %20 in 2 : vector<20x16x128xbf16>, vector<20x16x128xbf16>, vector<20x16x128xbf16> -> vector<20x16x384xbf16>
    %22 = vector.shape_cast %21 : vector<20x16x384xbf16> to vector<320x384xbf16>
    %cst_24 = arith.constant 0.000000e+00 : f32
    %23 = vector.broadcast %cst_24 : f32 to vector<288x128xf32>
    %24 = vector.extract_strided_slice %22 {offsets = [0, 0], sizes = [288, 384], strides = [1, 1]} : vector<320x384xbf16> to vector<288x384xbf16>
    %c0_25 = arith.constant 0 : index
    %c0_26 = arith.constant 0 : index
    %c0_27 = arith.constant 0 : index
    %25 = vector.load %arg6[%c0_25, %c0_26, %c0_27] : memref<3x384x128xbf16, #tpu.memory_space<vmem>>, vector<1x384x128xbf16>
    %26 = vector.shape_cast %25 : vector<1x384x128xbf16> to vector<384x128xbf16>
    %cst_28 = arith.constant dense<0.000000e+00> : vector<288x128xf32>
    %27 = tpu.matmul %24, %26, %cst_28 {dimension_numbers = #tpu.dot_dimension_numbers<[1], [0], [0], [1], [0, 0, 1, 1], [], []>} : vector<288x384xbf16>, vector<384x128xbf16>, vector<288x128xf32> -> vector<288x128xf32>
    %28 = arith.addf %23, %27 : vector<288x128xf32>
    %29 = vector.extract_strided_slice %22 {offsets = [16, 0], sizes = [288, 384], strides = [1, 1]} : vector<320x384xbf16> to vector<288x384xbf16>
    %c1_29 = arith.constant 1 : index
    %c0_30 = arith.constant 0 : index
    %c0_31 = arith.constant 0 : index
    %30 = vector.load %arg6[%c1_29, %c0_30, %c0_31] : memref<3x384x128xbf16, #tpu.memory_space<vmem>>, vector<1x384x128xbf16>
    %31 = vector.shape_cast %30 : vector<1x384x128xbf16> to vector<384x128xbf16>
    %cst_32 = arith.constant dense<0.000000e+00> : vector<288x128xf32>
    %32 = tpu.matmul %29, %31, %cst_32 {dimension_numbers = #tpu.dot_dimension_numbers<[1], [0], [0], [1], [0, 0, 1, 1], [], []>} : vector<288x384xbf16>, vector<384x128xbf16>, vector<288x128xf32> -> vector<288x128xf32>
    %33 = arith.addf %28, %32 : vector<288x128xf32>
    %34 = vector.extract_strided_slice %22 {offsets = [32, 0], sizes = [288, 384], strides = [1, 1]} : vector<320x384xbf16> to vector<288x384xbf16>
    %c2 = arith.constant 2 : index
    %c0_33 = arith.constant 0 : index
    %c0_34 = arith.constant 0 : index
    %35 = vector.load %arg6[%c2, %c0_33, %c0_34] : memref<3x384x128xbf16, #tpu.memory_space<vmem>>, vector<1x384x128xbf16>
    %36 = vector.shape_cast %35 : vector<1x384x128xbf16> to vector<384x128xbf16>
    %cst_35 = arith.constant dense<0.000000e+00> : vector<288x128xf32>
    %37 = tpu.matmul %34, %36, %cst_35 {dimension_numbers = #tpu.dot_dimension_numbers<[1], [0], [0], [1], [0, 0, 1, 1], [], []>} : vector<288x384xbf16>, vector<384x128xbf16>, vector<288x128xf32> -> vector<288x128xf32>
    %38 = arith.addf %33, %37 : vector<288x128xf32>
    %39 = vector.shape_cast %38 : vector<288x128xf32> to vector<18x16x128xf32>
    %40 = vector.extract_strided_slice %39 {offsets = [5, 0, 0], sizes = [8, 16, 128], strides = [1, 1, 1]} : vector<18x16x128xf32> to vector<8x16x128xf32>
    %c0_36 = arith.constant 0 : index
    %c0_37 = arith.constant 0 : index
    %c0_38 = arith.constant 0 : index
    %c0_39 = arith.constant 0 : index
    %41 = vector.load %arg7[%c0_36, %c0_37, %c0_38, %c0_39] : memref<1x8x16x128xf32, #tpu.memory_space<vmem>>, vector<1x8x16x128xf32>
    %42 = vector.shape_cast %41 : vector<1x8x16x128xf32> to vector<8x16x128xf32>
    %43 = vector.shape_cast %40 : vector<8x16x128xf32> to vector<1x8x16x128xf32>
    tpu.vector_store %arg7[%c0_36, %c0_37, %c0_38, %c0_39], %43 {strides = array<i32>} : memref<1x8x16x128xf32, #tpu.memory_space<vmem>>, vector<1x8x16x128xf32>,
    return
  }
  func.func @transform_0(%arg0: i32, %arg1: i32) -> (i32, i32, i32, i32) {
    %c0_i32 = arith.constant 0 : i32
    %c0_i32_0 = arith.constant 0 : i32
    %c0_i32_1 = arith.constant 0 : i32
    %c0_i32_2 = arith.constant 0 : i32
    return %arg0, %c0_i32, %c0_i32_0, %c0_i32_1 : i32, i32, i32, i32
  }
  func.func @transform_1(%arg0: i32, %arg1: i32) -> (i32, i32, i32, i32) {
    %c0_i32 = arith.constant 0 : i32
    %c0_i32_0 = arith.constant 0 : i32
    %c0_i32_1 = arith.constant 0 : i32
    %c0_i32_2 = arith.constant 0 : i32
    %c0_i32_3 = arith.constant 0 : i32
    return %c0_i32, %c0_i32_0, %c0_i32_1, %c0_i32_2 : i32, i32, i32, i32
  }
  func.func @transform_2(%arg0: i32, %arg1: i32) -> (i32, i32, i32) {
    %c0_i32 = arith.constant 0 : i32
    %c0_i32_0 = arith.constant 0 : i32
    %c0_i32_1 = arith.constant 0 : i32
    %c0_i32_2 = arith.constant 0 : i32
    return %c0_i32, %c0_i32_0, %c0_i32_1 : i32, i32, i32
  }
  func.func @transform_3(%arg0: i32, %arg1: i32) -> (i32, i32, i32) {
    %c0_i32 = arith.constant 0 : i32
    %c0_i32_0 = arith.constant 0 : i32
    %c0_i32_1 = arith.constant 0 : i32
    %c0_i32_2 = arith.constant 0 : i32
    return %c0_i32, %c0_i32_0, %c0_i32_1 : i32, i32, i32
  }
  func.func @transform_4(%arg0: i32, %arg1: i32) -> (i32, i32, i32) {
    %c0_i32 = arith.constant 0 : i32
    %c0_i32_0 = arith.constant 0 : i32
    %c0_i32_1 = arith.constant 0 : i32
    %c0_i32_2 = arith.constant 0 : i32
    return %c0_i32, %c0_i32_0, %c0_i32_1 : i32, i32, i32
  }
  func.func @transform_5(%arg0: i32, %arg1: i32) -> (i32, i32, i32, i32) {
    %c0_i32 = arith.constant 0 : i32
    %c0_i32_0 = arith.constant 0 : i32
    %c0_i32_1 = arith.constant 0 : i32
    return %arg0, %arg1, %c0_i32, %c0_i32_0 : i32, i32, i32, i32
  }
}

</mosaic_0001>

<bundles_post_ra>
// kernel: dncnn_forward.1
= control target key start
LH: loop header
LB: loop body
LE: loop exit
PB: predicated region body
PF: predicated region fallthrough
CT: control target
= control target key end

     0   :  { %s7224_s18 = smov 0   ;;  %s7226_s19 = smov 0   ;;  %s9859_s0 = inlined_call_operand.vmem [shape: bf16[2,26,16,128], index: 0, kind: input, shape index: {}]   ;;  %s9860_s1 = inlined_call_operand.vmem [shape: bf16[4,3,384,128], index: 1, kind: input, shape index: {}]   ;;  %s9861_s2 = inlined_call_operand.vmem [shape: f32[4,1,128], index: 2, kind: input, shape index: {}]   ;;  %s9862_s3 = inlined_call_operand.vmem [shape: f32[4,1,128], index: 3, kind: input, shape index: {}]   ;;  %s9863_s4 = inlined_call_operand.vmem [shape: bf16[3,384,128], index: 4, kind: input, shape index: {}]   ;;  %s9864_s5 = inlined_call_operand.vmem [shape: f32[2,16,16,128], index: 5, kind: output, shape index: {}]  }
   0x1   :  { %s7228_s20 = smov 0   ;;  %s7230_s21 = smov 0  }
   0x2   :  { %s7232_s22 = smov 0  }
   0x3 LB: > { %s24_s23 = sadd.s32 1, %s7176_s20  ;;  %s27_s24 = sadd.s32 1, %s7180_s21  ;;  %s7184_s22 = sphi %s7232_s22, %s15_s22   ;;  %s7180_s21 = sphi %s7230_s21, %s10112_s21   ;;  %s7176_s20 = sphi %s7228_s20, %s10111_s20   ;;  %s7172_s19 = sphi %s7226_s19, %s10110_s19   ;;  %s7168_s18 = sphi %s7224_s18, %s10109_s18  }
   0x4   : > { %p25_p0 = scmp.ge.s32.totalorder %s24_s23, 2  ;;  %p6022_p1 = scmp.ge.s32.totalorder %s7184_s22, 1 }
   0x5   : > { %p201_p2 = scmp.lt.s32.totalorder %s7184_s22, 5 }
   0x6   : > { %s10114_s23 = smov (%p25_p0, %s24_s23), 0  ;;  %s10116_s24 = smov (!%p25_p0, %s27_s24), %s7180_s21 }
   0x7   : > { %p202_p3 = pnand %p6022_p1, %p201_p2  ;;  %p29_p4 = scmp.ge.s32.totalorder %s10116_s24, 2 }
   0x9   : > { %s10118_s24 = smov (%p29_p4, %s10116_s24), 0  ;;  %205 = sbr.rel (%p202_p3) target bundleno = 1253 (0x4e5), region = 40 }
  0x10   : > { %p234_p5 = scmp.lt.s32.totalorder %s7172_s19, 1  ;;  %s6024_s25 = sshll.u32 %s7168_s18, 3  ;;  %v9865_v0 = vmov 0  }
  0x11   : > { %252 = vst [vmem:[#allocation2 + $0x8] sm:$0xff] %v9865_v0  ;;  %256 = vst [vmem:[#allocation2 + $0x1d0] sm:$0xff] %v9865_v0  ;;  %p242_p6 = scmp.lt.s32.totalorder %s6024_s25, 15  ;;  %s6395_s26 = sshll.u32 %s7168_s18, 6 }
  0x12   : > { %258 = vst [vmem:[#allocation2] sm:$0xff] %v9865_v0  ;;  %259 = vst [vmem:[#allocation2 + $0x18] sm:$0xff] %v9865_v0  ;;  %s10120_s19 = smov (!%p234_p5, %s7172_s19), 1  ;;  %s7338_s14 = smov 0  }
  0x13   : > { %260 = vst [vmem:[#allocation2 + $0x30] sm:$0xff] %v9865_v0  ;;  %261 = vst [vmem:[#allocation2 + $0x48] sm:$0xff] %v9865_v0  ;;  %s10122_s25 = smov (!%p242_p6, %s6024_s25), 15  ;;  %s6927_s27 = smul.u32 208, %s10120_s19 }
  0x14   : > { %262 = vst [vmem:[#allocation2 + $0x60] sm:$0xff] %v9865_v0  ;;  %263 = vst [vmem:[#allocation2 + $0x78] sm:$0xff] %v9865_v0  ;;  %s6026_s28 = sshll.u32 %s10120_s19, 5  ;;  %s6025_s29 = sshll.u32 %s10122_s25, 1 }
  0x15   : > { %264 = vst [vmem:[#allocation2 + $0x90] sm:$0xff] %v9865_v0  ;;  %265 = vst [vmem:[#allocation2 + $0xa8] sm:$0xff] %v9865_v0  ;;  %s238_s7 = scalar_lea.vmem %s9859_s0, %s6927_s27  ;;  %s246_s8 = sadd.s32 %s6026_s28, %s6025_s29 }
  0x16   : > { %266 = vst [vmem:[#allocation2 + $0xc0] sm:$0xff] %v9865_v0  ;;  %267 = vst [vmem:[#allocation2 + $0xd8] sm:$0xff] %v9865_v0  ;;  %s6027_s9 = sshll.u32 %s246_s8, 3  ;;  %s7313_s10 = scalar_lea.vmem %s238_s7, %s6395_s26 }
  0x17   : > { %268 = vst [vmem:[#allocation2 + $0xf0] sm:$0xff] %v9865_v0  ;;  %269 = vst [vmem:[#allocation2 + $0x108] sm:$0xff] %v9865_v0  ;;  %s7318_s13 = scalar_lea.vmem %s9864_s5, %s6027_s9  ;;  %v6980_v1 = vld [vmem:[%s7313_s10] sm:$0xff]   ;;  %v6981_v2 = vld [vmem:[%s7313_s10 + $0x8] sm:$0xff]  }
  0x18   : > { %270 = vst [vmem:[#allocation2 + $0x120] sm:$0xff] %v9865_v0  ;;  %271 = vst [vmem:[#allocation2 + $0x138] sm:$0xff] %v9865_v0  ;;  %v6982_v3 = vld [vmem:[%s7313_s10 + $0x10] sm:$0xff]   ;;  %v6983_v4 = vld [vmem:[%s7313_s10 + $0x18] sm:$0xff]  }
  0x19   : > { %272 = vst [vmem:[#allocation2 + $0x150] sm:$0xff] %v9865_v0  ;;  %273 = vst [vmem:[#allocation2 + $0x168] sm:$0xff] %v9865_v0  ;;  %v6984_v5 = vld [vmem:[%s7313_s10 + $0x20] sm:$0xff]   ;;  %v6985_v6 = vld [vmem:[%s7313_s10 + $0x28] sm:$0xff]  }
  0x1a   : > { %274 = vst [vmem:[#allocation2 + $0x180] sm:$0xff] %v9865_v0  ;;  %275 = vst [vmem:[#allocation2 + $0x198] sm:$0xff] %v9865_v0  ;;  %v6986_v7 = vld [vmem:[%s7313_s10 + $0x30] sm:$0xff]   ;;  %v6987_v8 = vld [vmem:[%s7313_s10 + $0x38] sm:$0xff]  }
  0x1b   : > { %276 = vst [vmem:[#allocation2 + $0x1b0] sm:$0xff] %v9865_v0  ;;  %279 = vst [vmem:[#allocation2 + $0x28] sm:$0xff] %v9865_v0  ;;  %v6988_v9 = vld [vmem:[%s7313_s10 + $0x40] sm:$0xff]   ;;  %v6989_v10 = vld [vmem:[%s7313_s10 + $0x48] sm:$0xff]  }
  0x1c   : > { %280 = vst [vmem:[#allocation2 + $0x40] sm:$0xff] %v9865_v0  ;;  %281 = vst [vmem:[#allocation2 + $0x58] sm:$0xff] %v9865_v0  ;;  %v6990_v11 = vld [vmem:[%s7313_s10 + $0x50] sm:$0xff]   ;;  %v6991_v12 = vld [vmem:[%s7313_s10 + $0x58] sm:$0xff]  }
  0x1d   : > { %282 = vst [vmem:[#allocation2 + $0x70] sm:$0xff] %v9865_v0  ;;  %283 = vst [vmem:[#allocation2 + $0x88] sm:$0xff] %v9865_v0  ;;  %v6992_v13 = vld [vmem:[%s7313_s10 + $0x60] sm:$0xff]   ;;  %v6993_v14 = vld [vmem:[%s7313_s10 + $0x68] sm:$0xff]  }
  0x1e   : > { %284 = vst [vmem:[#allocation2 + $0xa0] sm:$0xff] %v9865_v0  ;;  %285 = vst [vmem:[#allocation2 + $0xb8] sm:$0xff] %v9865_v0  ;;  %v6994_v15 = vld [vmem:[%s7313_s10 + $0x70] sm:$0xff]   ;;  %v6995_v16 = vld [vmem:[%s7313_s10 + $0x78] sm:$0xff]  }
  0x1f   : > { %286 = vst [vmem:[#allocation2 + $0xd0] sm:$0xff] %v9865_v0  ;;  %287 = vst [vmem:[#allocation2 + $0xe8] sm:$0xff] %v9865_v0  ;;  %v6996_v17 = vld [vmem:[%s7313_s10 + $0x80] sm:$0xff]   ;;  %v6997_v18 = vld [vmem:[%s7313_s10 + $0x88] sm:$0xff]  }
  0x20   : > { %288 = vst [vmem:[#allocation2 + $0x100] sm:$0xff] %v9865_v0  ;;  %289 = vst [vmem:[#allocation2 + $0x118] sm:$0xff] %v9865_v0 }
  0x21   : > { %290 = vst [vmem:[#allocation2 + $0x130] sm:$0xff] %v9865_v0  ;;  %291 = vst [vmem:[#allocation2 + $0x148] sm:$0xff] %v9865_v0 }
  0x22   : > { %292 = vst [vmem:[#allocation2 + $0x160] sm:$0xff] %v9865_v0  ;;  %293 = vst [vmem:[#allocation2 + $0x178] sm:$0xff] %v9865_v0 }
  0x23   : > { %294 = vst [vmem:[#allocation2 + $0x190] sm:$0xff] %v9865_v0  ;;  %295 = vst [vmem:[#allocation2 + $0x1a8] sm:$0xff] %v9865_v0 }
  0x24   : > { %296 = vst [vmem:[#allocation2 + $0x1c0] sm:$0xff] %v9865_v0  ;;  %277 = vst [vmem:[#allocation2 + $0x1c8] sm:$0xff] %v9865_v0 }
  0x25   : > { %278 = vst [vmem:[#allocation2 + $0x10] sm:$0xff] %v9865_v0  ;;  %297 = vst [vmem:[#allocation2 + $0x1d8] sm:$0xff] %v9865_v0 }
  0x26   : > { %447 = vst [vmem:[#allocation2 + $0x20] sm:$0xff] %v6980_v1  ;;  %448 = vst [vmem:[#allocation2 + $0x38] sm:$0xff] %v6981_v2 }
  0x27   : > { %449 = vst [vmem:[#allocation2 + $0x50] sm:$0xff] %v6982_v3  ;;  %450 = vst [vmem:[#allocation2 + $0x68] sm:$0xff] %v6983_v4 }
  0x28   : > { %451 = vst [vmem:[#allocation2 + $0x80] sm:$0xff] %v6984_v5  ;;  %452 = vst [vmem:[#allocation2 + $0x98] sm:$0xff] %v6985_v6 }
  0x29   : > { %453 = vst [vmem:[#allocation2 + $0xb0] sm:$0xff] %v6986_v7  ;;  %454 = vst [vmem:[#allocation2 + $0xc8] sm:$0xff] %v6987_v8 }
  0x2a   : > { %455 = vst [vmem:[#allocation2 + $0xe0] sm:$0xff] %v6988_v9  ;;  %456 = vst [vmem:[#allocation2 + $0xf8] sm:$0xff] %v6989_v10 }
  0x2b   : > { %457 = vst [vmem:[#allocation2 + $0x110] sm:$0xff] %v6990_v11  ;;  %458 = vst [vmem:[#allocation2 + $0x128] sm:$0xff] %v6991_v12 }
  0x2c   : > { %459 = vst [vmem:[#allocation2 + $0x140] sm:$0xff] %v6992_v13  ;;  %460 = vst [vmem:[#allocation2 + $0x158] sm:$0xff] %v6993_v14 }
  0x2d   : > { %461 = vst [vmem:[#allocation2 + $0x170] sm:$0xff] %v6994_v15  ;;  %462 = vst [vmem:[#allocation2 + $0x188] sm:$0xff] %v6995_v16 }
  0x2e   : > { %463 = vst [vmem:[#allocation2 + $0x1a0] sm:$0xff] %v6996_v17  ;;  %464 = vst [vmem:[#allocation2 + $0x1b8] sm:$0xff] %v6997_v18 }
  0x2f LB: >> { %v7343_v19 = vld [vmem:[#allocation2 + $0x50] sm:$0xff]  ;;  %v518_v20 = vld [vmem:[#allocation2 + $0x58] sm:$0x1]  ;;  %vm731_vm0 = vcmask 1046528   ;;  %v9869_v21 = vmov 0   ;;  %s6396_s15 = smul.u32 576, %s7188_s14  ;;  %s3156_s27 = scalar_lea.vmem %s9861_s2, %s7188_s14  ;;  %s7188_s14 = sphi %s7338_s14, %s470_s14  }
  0x30   : >> { %1719 = vmatprep.subr.bf16.mxu0 %v9869_v21  ;;  %v741_v22 = vrot.slane %v7343_v19, 1  ;;  %v742_v23 = vrot.slane %v518_v20, 1  ;;  %vm792_vm1 = vsmask.f32 256  ;;  %v7364_v35 = vld [vmem:[#allocation2 + $0x68] sm:$0xff]  ;;  %v7367_v37 = vld [vmem:[#allocation2 + $0x80] sm:$0xff]  ;;  %s3200_s30 = scalar_lea.vmem %s9862_s3, %s7188_s14 }
  0x31   : >> { %s7352_s19 = scalar_lea.vmem %s9860_s1, %s6396_s15  ;;  %v520_v36 = vld [vmem:[#allocation2 + $0x70] sm:$0x1]  ;;  %v522_v41 = vld [vmem:[#allocation2 + $0x88] sm:$0x1]  ;;  %v744_v42 = vrot.slane %v7364_v35, 1  ;;  %v747_v45 = vrot.slane %v7367_v37, 1 }
  0x32   : >> { %v743_v24 = vsel %vm731_vm0, %v741_v22, %v742_v23  ;;  %v906_v25 = vshrl.u32 %v741_v22, 16  ;;  %v6998_v28 = vld [vmem:[%s7352_s19 + $0xc0] sm:$0xff]   ;;  %v7000_v32 = vld [vmem:[%s7352_s19 + $0xc8] sm:$0xff]   ;;  %v7371_v38 = vld [vmem:[%s7352_s19 + $0x150] sm:$0xff]   ;;  %v745_v43 = vrot.slane %v520_v36, 1  ;;  %v748_v47 = vrot.slane %v522_v41, 1 }
  0x33   : >> { %v910_v26 = vshrl.u32 %v743_v24, 16  ;;  %v913_v27 = vshll.u32 %v743_v24, 16  ;;  %v7356_v30 = vld [vmem:[%s7352_s19 + $0x140] sm:$0xff]   ;;  %1720 = vmatpush1.bf16.msra.mxu0 %v6998_v28  ;;  %v7362_v33 = vld [vmem:[%s7352_s19 + $0x148] sm:$0xff]   ;;  %v7002_v40 = vld [vmem:[%s7352_s19 + $0xd0] sm:$0xff]   ;;  %v937_v1 = vshrl.u32 %v744_v42, 16 }
  0x34   : >> { %v908_v29 = vrot.slane %v906_v25, 7  ;;  %6865 = vmatprep.subr.bf16.mxu1 %v7356_v30  ;;  %1721 = vmatprep.subr.bf16.mxu0 %v9869_v21  ;;  %v7383_v44 = vld [vmem:[%s7352_s19 + $0x158] sm:$0xff]   ;;  %v7391_v48 = vld [vmem:[%s7352_s19 + $0x160] sm:$0xff]   ;;  %v746_v49 = vsel %vm731_vm0, %v744_v42, %v745_v43  ;;  %v749_v53 = vsel %vm731_vm0, %v747_v45, %v748_v47  ;;  %v7398_v54 = vld [vmem:[#allocation2 + $0xb0] sm:$0xff]  ;;  %v968_v7 = vshrl.u32 %v747_v45, 16  ;;  %p6222_p7 = scmp.ne.s32.totalorder %s7168_s18, 0 }
  0x35   : >> { %v912_v31 = vrot.slane %v910_v26, 7  ;;  %6873 = vmatpush3.bf16.msra.mxu1 %v7356_v30  ;;  %v7004_v46 = vld [vmem:[%s7352_s19 + $0xd8] sm:$0xff]   ;;  %v524_v51 = vld [vmem:[#allocation2 + $0xa0] sm:$0x1]  ;;  %v7008_v56 = vld [vmem:[%s7352_s19 + $0xe8] sm:$0xff]   ;;  %v941_v57 = vshrl.u32 %v746_v49, 16 }
  0x36   : >> { %6866 = vmatprep.subr.bf16.mxu1 %v7362_v33  ;;  %v7394_v50 = vld [vmem:[#allocation2 + $0x98] sm:$0xff]  ;;  %v7006_v52 = vld [vmem:[%s7352_s19 + $0xe0] sm:$0xff]   ;;  %v7405_v58 = vld [vmem:[%s7352_s19 + $0x168] sm:$0xff]   ;;  %v972_v59 = vshrl.u32 %v749_v53, 16  ;;  %v751_v61 = vrot.slane %v524_v51, 1  ;;  %v753_v62 = vrot.slane %v7398_v54, 1 }
  0x37   : >> { %v915_v34 = vor.u32 %v913_v27, %v912_v31  ;;  %1722 = vmatpush1.bf16.msra.mxu0 %v7000_v32  ;;  %v526_v55 = vld [vmem:[#allocation2 + $0xb8] sm:$0x1]  ;;  %v750_v60 = vrot.slane %v7394_v50, 1  ;;  %v7413_v2 = vld [vmem:[%s7352_s19 + $0x170] sm:$0xff]   ;;  %v944_v3 = vshll.u32 %v746_v49, 16  ;;  %v943_v5 = vrot.slane %v941_v57, 7 }
  0x38   : >> { %1723 = vmatprep.subr.bf16.mxu0 %v9869_v21  ;;  %v754_v63 = vrot.slane %v526_v55, 1  ;;  %v7010_v4 = vld [vmem:[%s7352_s19 + $0xf0] sm:$0xff]   ;;  %v974_v8 = vrot.slane %v972_v59, 7  ;;  %v7421_v10 = vld [vmem:[%s7352_s19 + $0x178] sm:$0xff]   ;;  %v975_v11 = vshll.u32 %v749_v53, 16  ;;  %v7424_v13 = vld [vmem:[#allocation2 + $0xc8] sm:$0xff] }
  0x39   : >> { %v7374_v39 = vsel %vm792_vm1, %v908_v29, %v915_v34  ;;  %6874 = vmatpush3.bf16.msra.mxu1 %v7362_v33  ;;  %v752_v6 = vsel %vm731_vm0, %v750_v60, %v751_v61  ;;  %v528_v14 = vld [vmem:[#allocation2 + $0xd0] sm:$0x1]  ;;  %v7012_v15 = vld [vmem:[%s7352_s19 + $0xf8] sm:$0xff]   ;;  %v756_v17 = vrot.slane %v7424_v13, 1  ;;  %v939_v20 = vrot.slane %v937_v1, 7  ;;  %v7432_v25 = vld [vmem:[#allocation2 + $0xe0] sm:$0xff] }
  0x3a   : >> { %6573 = vmatprep.mubr.bf16.mxu1 %v7374_v39  ;;  %6867 = vmatprep.subr.bf16.mxu1 %v7371_v38  ;;  %v755_v9 = vsel %vm731_vm0, %v753_v62, %v754_v63  ;;  %v1003_v12 = vshrl.u32 %v752_v6, 16  ;;  %v757_v18 = vrot.slane %v528_v14, 1  ;;  %v946_v22 = vor.u32 %v944_v3, %v943_v5  ;;  %v7014_v26 = vld [vmem:[%s7352_s19 + $0x100] sm:$0xff]   ;;  %v530_v31 = vld [vmem:[#allocation2 + $0xe8] sm:$0x1]  ;;  %v7440_v45 = vld [vmem:[#allocation2 + $0xf8] sm:$0xff] }
  0x3b   : >> { %1724 = vmatpush1.bf16.msra.mxu0 %v7002_v40  ;;  %v1034_v16 = vshrl.u32 %v755_v9, 16  ;;  %v970_v23 = vrot.slane %v968_v7, 7  ;;  %v7430_v24 = vshrl.u32 %v750_v60, 16  ;;  %v977_v27 = vor.u32 %v975_v11, %v974_v8  ;;  %v7015_v34 = vld [vmem:[%s7352_s19] sm:$0xff]   ;;  %v7016_v59 = vld [vmem:[%s7352_s19 + $0x108] sm:$0xff]   ;;  %v7469_v11 = vld [vmem:[#allocation2 + $0x110] sm:$0xff] }
  0x3c   : >> { %1725 = vmatprep.subr.bf16.mxu0 %v9869_v21  ;;  %v1005_v28 = vrot.slane %v1003_v12, 7  ;;  %v1006_v29 = vshll.u32 %v752_v6, 16  ;;  %v759_v32 = vrot.slane %v7432_v25, 1  ;;  %v1030_v36 = vshrl.u32 %v753_v62, 16  ;;  %v7017_v62 = vld [vmem:[%s7352_s19 + $0x8] sm:$0xff]   ;;  %v7463_v5 = vld [vmem:[#allocation2 + $0x20] sm:$0xff] }
  0x3d   : >> { %6875 = vmatpush3.bf16.msra.mxu1 %v7371_v38  ;;  %v758_v40 = vsel %vm731_vm0, %v756_v17, %v757_v18  ;;  %v760_v41 = vrot.slane %v530_v31, 1  ;;  %v1036_v42 = vrot.slane %v1034_v16, 7  ;;  %v1037_v43 = vshll.u32 %v755_v9, 16  ;;  %v7018_v6 = vld [vmem:[%s7352_s19 + $0x110] sm:$0xff]   ;;  %v540_v0 = vld [vmem:[#allocation2 + $0x160] sm:$0x1] }
  0x3e   : >> { %6868 = vmatprep.subr.bf16.mxu1 %v7383_v44  ;;  %v9867_v47 = vshll.u32 %v7343_v19, 16  ;;  %v7445_v49 = vsel %vm792_vm1, %v939_v20, %v946_v22  ;;  %v7451_v55 = vsel %vm792_vm1, %v970_v23, %v977_v27  ;;  %v1065_v57 = vshrl.u32 %v758_v40, 16  ;;  %v7019_v20 = vld [vmem:[%s7352_s19 + $0x10] sm:$0xff]   ;;  %v7483_v27 = vld [vmem:[#allocation2 + $0x128] sm:$0xff] }
  0x3f   : >> { %1726 = vmatpush1.bf16.msra.mxu0 %v7004_v46  ;;  %v532_v46 = vld [vmem:[#allocation2 + $0x100] sm:$0x1]  ;;  %v761_v51 = vsel %vm731_vm0, %v759_v32, %v760_v41  ;;  %9955 = vst [vmem:[#allocation3_spill] sm:$0xff] %v7451_v55  ;;  %v1008_v60 = vor.u32 %v1006_v29, %v1005_v28  ;;  %v1032_v63 = vrot.slane %v1030_v36, 7  ;;  %v1039_v1 = vor.u32 %v1037_v43, %v1036_v42  ;;  %v536_v31 = vld [vmem:[#allocation2 + $0x130] sm:$0x1] }
  0x40   : >> { %1727 = vmatprep.subr.bf16.mxu0 %v9869_v21  ;;  %v763_v53 = vrot.slane %v532_v46, 1  ;;  %v1096_v61 = vshrl.u32 %v761_v51, 16  ;;  %v7458_v3 = vshrl.u32 %v756_v17, 16  ;;  %v1068_v7 = vshll.u32 %v758_v40, 16  ;;  %v534_v17 = vld [vmem:[#allocation2 + $0x118] sm:$0x1] }
  0x41   : >> { %6876 = vmatpush3.bf16.msra.mxu1 %v7383_v44  ;;  %v559_v8 = vshll.u32 %v7463_v5, 16  ;;  %v562_v9 = vshrl.u32 %v7463_v5, 16  ;;  %v7473_v12 = vrot.slane %v9867_v47, 1  ;;  %v1067_v14 = vrot.slane %v1065_v57, 7  ;;  %v7026_v5 = vld [vmem:[%s7352_s19 + $0x130] sm:$0xff]  }
  0x42   : >> { %6869 = vmatprep.subr.bf16.mxu1 %v7391_v48  ;;  %v1099_v16 = vshll.u32 %v761_v51, 16  ;;  %v765_v18 = vrot.slane %v7469_v11, 1  ;;  %v1098_v22 = vrot.slane %v1096_v61, 7  ;;  %v7490_v29 = vsel %vm792_vm1, %v1032_v63, %v1039_v1  ;;  %v473_v51 = vld [vmem:[#allocation2 + $0x18] sm:$0x80]  ;;  %v7027_v47 = vld [vmem:[%s7352_s19 + $0x30] sm:$0xff]  }
  0x43   : >> { %1728 = vmatpush1.bf16.msra.mxu0 %v7006_v52  ;;  %v762_v52 = vrot.slane %v7440_v45, 1  ;;  %9957 = vst [vmem:[#allocation5_spill] sm:$0xff] %v7490_v29  ;;  %v1070_v41 = vor.u32 %v1068_v7, %v1067_v14  ;;  %v768_v61 = vrot.slane %v7483_v27, 1  ;;  %v769_v1 = vrot.slane %v536_v31, 1 }
  0x44   : >> { %1729 = vmatprep.subr.bf16.mxu0 %v9869_v21  ;;  %v1101_v57 = vor.u32 %v1099_v16, %v1098_v22 }
  0x45   : >> { %6877 = vmatpush3.bf16.msra.mxu1 %v7391_v48  ;;  %v7498_v43 = vshrl.u32 %v762_v52, 16  ;;  %v7526_v31 = vsel %vm731_vm0, %v768_v61, %v769_v1 }
  0x46   : >> { %6870 = vmatprep.subr.bf16.mxu1 %v7405_v58 }
  0x47   : >> { %1730 = vmatpush1.bf16.msra.mxu0 %v7008_v56  ;;  %v1001_v56 = vrot.slane %v7430_v24, 7  ;;  %v561_v24 = vrot.slane %v559_v8, 1 }
  0x48   : >> { %1731 = vmatprep.subr.bf16.mxu0 %v9869_v21 }
  0x49   : >> { %6878 = vmatpush3.bf16.msra.mxu1 %v7405_v58  ;;  %v7487_v28 = vsel %vm792_vm1, %v1001_v56, %v1008_v60  ;;  %v832_v36 = vshrl.u32 %v561_v24, 16  ;;  %v7020_v56 = vld [vmem:[%s7352_s19 + $0x118] sm:$0xff]  }
  0x4a   : >> { %6871 = vmatprep.subr.bf16.mxu1 %v7413_v2  ;;  %9956 = vst [vmem:[#allocation4_spill] sm:$0xff] %v7487_v28 }
  0x4b   : >> { %1732 = vmatpush1.bf16.msra.mxu0 %v7010_v4  ;;  %v7461_v4 = vsel %vm731_vm0, %v762_v52, %v763_v53  ;;  %v7501_v53 = vld [vmem:[#allocation2 + $0x38] sm:$0xff]  ;;  %v834_v7 = vrot.slane %v832_v36, 7 }
  0x4c   : >> { %1733 = vmatprep.subr.bf16.mxu0 %v9869_v21  ;;  %v1127_v23 = vshrl.u32 %v7461_v4, 16  ;;  %v1130_v46 = vshll.u32 %v7461_v4, 16  ;;  %v7510_v4 = vld [vmem:[#allocation2 + $0x140] sm:$0xff]  ;;  %v569_v16 = vshrl.u32 %v7501_v53, 16 }
  0x4d   : >> { %6879 = vmatpush3.bf16.msra.mxu1 %v7413_v2  ;;  %v771_v36 = vrot.slane %v7510_v4, 1 }
  0x4e   : >> { %6872 = vmatprep.subr.bf16.mxu1 %v7421_v10  ;;  %v1129_v52 = vrot.slane %v1127_v23, 7  ;;  %v828_v23 = vrot.slane %v562_v9, 7 }
  0x4f   : >> { %1734 = vmatpush1.bf16.msra.mxu0 %v7012_v15  ;;  %v7476_v15 = vshrl.u32 %v759_v32, 16  ;;  %v1063_v32 = vrot.slane %v7458_v3, 7  ;;  %v9868_v3 = vshll.u32 %v7501_v53, 16 }
  0x50   : >> { %1735 = vmatprep.subr.bf16.mxu0 %v9869_v21 }
  0x51   : >> { %6880 = vmatpush3.bf16.msra.mxu1 %v7421_v10  ;;  %v1094_v42 = vrot.slane %v7476_v15, 7  ;;  %v825_v15 = vshrl.u32 %v473_v51, 16  ;;  %v7517_v22 = vsel %vm792_vm1, %v1063_v32, %v1070_v41 }
  0x52   : >> { %2217 = vmatprep.subr.bf16.mxu1 %v9869_v21  ;;  %9958 = vst [vmem:[#allocation6_spill] sm:$0xff] %v7517_v22 }
  0x53   : >> { %1736 = vmatpush1.bf16.msra.mxu0 %v7014_v26  ;;  %v766_v26 = vrot.slane %v534_v17, 1  ;;  %v538_v17 = vld [vmem:[#allocation2 + $0x148] sm:$0x1] }
  0x54   : >> { %6574 = vmatmul.mubr.bf16.vlgmr.msra.gmra.mrb[0].mxu1 %v7445_v49  ;;  %1737 = vmatprep.subr.bf16.mxu0 %v9869_v21 }
  0x55   : >> { %2218 = vmatpush1.bf16.msra.mxu1 %v7015_v34  ;;  %6577 = vmatprep.mubr.bf16.mxu1 %v7451_v55  ;;  %v564_v34 = vor.u32 %v562_v9, %v561_v24  ;;  %v7494_v40 = vsel %vm731_vm0, %v765_v18, %v766_v26  ;;  %v7521_v24 = vrot.slane %v9868_v3, 1  ;;  %v7523_v26 = vshrl.u32 %v765_v18, 16  ;;  %v7023_v18 = vld [vmem:[%s7352_s19 + $0x20] sm:$0xff]  }
  0x56   : >> { %2219 = vmatprep.subr.bf16.mxu1 %v9869_v21  ;;  %v1158_v63 = vshrl.u32 %v7494_v40, 16  ;;  %v1161_v41 = vshll.u32 %v7494_v40, 16  ;;  %v7531_v9 = vshrl.u32 %v768_v61, 16  ;;  %v1132_v40 = vor.u32 %v1130_v46, %v1129_v52  ;;  %v7025_v46 = vld [vmem:[%s7352_s19 + $0x28] sm:$0xff]  }
  0x57   : >> { %1738 = vmatpush1.bf16.msra.mxu0 %v7016_v59  ;;  %v836_v59 = vshrl.u32 %v564_v34, 16  ;;  %v839_v60 = vshll.u32 %v564_v34, 16  ;;  %v475_v34 = vld [vmem:[#allocation2 + $0x30] sm:$0x80]  ;;  %v7534_v51 = vor.u32 %v569_v16, %v7521_v24  ;;  %v827_v61 = vrot.slane %v825_v15, 7 }
  0x58   : >> { %1739 = vmatprep.subr.bf16.mxu0 %v9869_v21  ;;  %v1160_v32 = vrot.slane %v1158_v63, 7  ;;  %v772_v63 = vrot.slane %v538_v17, 1  ;;  %v1187_v15 = vrot.slane %v7531_v9, 7  ;;  %v1216_v9 = vshrl.u32 %v771_v36, 16 }
  0x59   : >> { %2220 = vmatpush1.bf16.msra.mxu1 %v7017_v62  ;;  %v7021_v62 = vld [vmem:[%s7352_s19 + $0x18] sm:$0xff]   ;;  %v838_v14 = vrot.slane %v836_v59, 7  ;;  %v7540_v59 = vsel %vm792_vm1, %v1094_v42, %v1101_v57  ;;  %v7024_v42 = vld [vmem:[%s7352_s19 + $0x128] sm:$0xff]   ;;  %v1156_v57 = vrot.slane %v7523_v26, 7  ;;  %v775_v26 = vrot.slane %v540_v0, 1 }
  0x5a   : >> { %2221 = vmatprep.subr.bf16.mxu1 %v9869_v21  ;;  %9959 = vst [vmem:[#allocation7_spill] sm:$0xff] %v7540_v59  ;;  %v1163_v52 = vor.u32 %v1161_v41, %v1160_v32  ;;  %v859_v3 = vrot.slane %v569_v16, 7  ;;  %v1218_v55 = vrot.slane %v1216_v9, 7 }
  0x5b   : >> { %1740 = vmatpush1.bf16.msra.mxu0 %v7018_v6  ;;  %v7022_v6 = vld [vmem:[%s7352_s19 + $0x120] sm:$0xff]  }
  0x5c   : >> { %6578 = vmatmul.mubr.bf16.gmra.mrb[4].mxu1 %v7487_v28  ;;  %1741 = vmatprep.subr.bf16.mxu0 %v9869_v21  ;;  %v7028_v28 = vld [vmem:[%s7352_s19 + $0x138] sm:$0xff]  }
  0x5d   : >> { %2222 = vmatpush1.bf16.msra.mxu1 %v7019_v20  ;;  %6581 = vmatprep.mubr.bf16.mxu1 %v7490_v29  ;;  %v841_v20 = vor.u32 %v839_v60, %v838_v14  ;;  %v1125_v60 = vrot.slane %v7498_v43, 7  ;;  %v1189_v14 = vshrl.u32 %v7526_v31, 16  ;;  %v829_v43 = vor.u32 %v828_v23, %v559_v8  ;;  %v7588_v29 = vld [vmem:[#allocation2 + $0x48] sm:$0x80] }
  0x5e   : >> { %2223 = vmatprep.subr.bf16.mxu1 %v9869_v21  ;;  %v1192_v8 = vshll.u32 %v7526_v31, 16  ;;  %v863_v23 = vshrl.u32 %v7521_v24, 16  ;;  %v542_v24 = vld [vmem:[#allocation2 + $0x178] sm:$0x1]  ;;  %v887_v9 = vshrl.u32 %v7588_v29, 16 }
  0x5f   : >> { %1742 = vmatpush1.bf16.msra.mxu0 %v7020_v56  ;;  %v7536_v56 = vld [vmem:[#allocation2 + $0x158] sm:$0xff]  ;;  %v7544_v1 = vsel %vm792_vm1, %v834_v7, %v841_v20  ;;  %v773_v7 = vsel %vm731_vm0, %v771_v36, %v772_v63  ;;  %v1191_v32 = vrot.slane %v1189_v14, 7  ;;  %v7568_v63 = vld [vmem:[#allocation2 + $0x170] sm:$0xff]  ;;  %v7583_v16 = vsel %vm792_vm1, %v827_v61, %v829_v43 }
  0x60   : >> { %1743 = vmatprep.subr.bf16.mxu0 %v9869_v21  ;;  %1751 = vmatprep.mubr.bf16.mxu0 %v7544_v1  ;;  %v774_v17 = vrot.slane %v7536_v56, 1  ;;  %v1220_v20 = vshrl.u32 %v773_v7, 16  ;;  %v544_v14 = vld [vmem:[#allocation2 + $0x190] sm:$0x1]  ;;  %v778_v43 = vrot.slane %v542_v24, 1 }
  0x61   : >> { %2224 = vmatpush1.bf16.msra.mxu1 %v7021_v62  ;;  %v856_v62 = vshrl.u32 %v475_v34, 16  ;;  %v576_v34 = vshrl.u32 %v7343_v19, 16 }
  0x62   : >> { %2225 = vmatprep.subr.bf16.mxu1 %v9869_v21  ;;  %v776_v31 = vsel %vm731_vm0, %v774_v17, %v775_v26  ;;  %v865_v26 = vrot.slane %v863_v23, 7 }
  0x63   : >> { %1744 = vmatpush1.bf16.msra.mxu0 %v7022_v6  ;;  %v867_v6 = vshrl.u32 %v7534_v51, 16  ;;  %v7566_v41 = vrot.slane %v856_v62, 7  ;;  %v7576_v0 = vor.u32 %v576_v34, %v7473_v12  ;;  %v9960_v62 = vmov 0  }
  0x64   : >> { %6582 = vmatmul.mubr.bf16.gmra.mrb[8].mxu1 %v7517_v22  ;;  %1745 = vmatprep.subr.bf16.mxu0 %v9869_v21  ;;  %v1251_v22 = vshrl.u32 %v776_v31, 16 }
  0x65   : >> { %2226 = vmatpush1.bf16.msra.mxu1 %v7023_v18  ;;  %6585 = vmatprep.mubr.bf16.mxu1 %v7540_v59  ;;  %v7571_v18 = vsel %vm792_vm1, %v1125_v60, %v1132_v40  ;;  %v869_v36 = vrot.slane %v867_v6, 7  ;;  %v1222_v59 = vrot.slane %v1220_v20, 7  ;;  %v1223_v60 = vshll.u32 %v773_v7, 16 }
  0x66   : >> { %2227 = vmatprep.subr.bf16.mxu1 %v9869_v21  ;;  %v7578_v21 = vld [vmem:[#allocation2 + $0x188] sm:$0xff]  ;;  %v7586_v40 = vsel %vm792_vm1, %v1156_v57, %v1163_v52  ;;  %v1194_v6 = vor.u32 %v1192_v8, %v1191_v32  ;;  %v777_v7 = vrot.slane %v7568_v63, 1  ;;  %v898_v61 = vshrl.u32 %v7576_v0, 16  ;;  %v7029_v52 = vld [vmem:[%s7352_s19 + $0x38] sm:$0xff]  }
  0x67   : >> { %1746 = vmatpush1.bf16.msra.mxu0 %v7024_v42  ;;  %v870_v42 = vshll.u32 %v7534_v51, 16  ;;  %v7592_v51 = vshrl.u32 %v774_v17, 16  ;;  %v780_v57 = vrot.slane %v7578_v21, 1  ;;  %v1225_v23 = vor.u32 %v1223_v60, %v1222_v59 }
  0x68   : >> { %1747 = vmatprep.subr.bf16.mxu0 %v9960_v62  ;;  %v894_v8 = vshrl.u32 %v7473_v12, 16  ;;  %v9881_v17 = vshll.u32 %v7364_v35, 16  ;;  %v1254_v32 = vshll.u32 %v776_v31, 16  ;;  %v779_v24 = vsel %vm731_vm0, %v777_v7, %v778_v43 }
  0x69   : >> { %2228 = vmatpush1.bf16.msra.mxu1 %v7025_v46  ;;  %v781_v46 = vrot.slane %v544_v14, 1  ;;  %v872_v20 = vor.u32 %v870_v42, %v869_v36  ;;  %v7605_v14 = vld [vmem:[#allocation2 + $0x1a0] sm:$0xff]  ;;  %v7609_v36 = vsel %vm792_vm1, %v1187_v15, %v1194_v6  ;;  %v9961_v12 = vshll.u32 %v7501_v53, 16 }
  0x6a   : >> { %2229 = vmatprep.subr.bf16.mxu1 %v9960_v62  ;;  %v1282_v42 = vshrl.u32 %v779_v24, 16  ;;  %v900_v31 = vrot.slane %v898_v61, 7  ;;  %v901_v29 = vshll.u32 %v7576_v0, 16  ;;  %v890_v60 = vrot.slane %v576_v34, 7  ;;  %v7030_v0 = vld [vmem:[%s7352_s19 + $0x40] sm:$0xff]  }
  0x6b   : >> { %1748 = vmatpush1.bf16.msra.mxu0 %v7026_v5  ;;  %v1253_v5 = vrot.slane %v1251_v22, 7  ;;  %v860_v59 = vor.u32 %v859_v3, %v9961_v12  ;;  %v546_v22 = vld [vmem:[#allocation2 + $0x1a8] sm:$0x1]  ;;  %v7616_v43 = vsel %vm731_vm0, %v780_v57, %v781_v46  ;;  %v7620_v15 = vsel %vm792_vm1, %v865_v26, %v872_v20 }
  0x6c   : >> { %6586 = vmatmul.mubr.bf16.gmra.mrb[12].mxu1 %v7571_v18  ;;  %1749 = vmatprep.subr.bf16.mxu0 %v9960_v62  ;;  %v7623_v53 = vsel %vm792_vm1, %v1218_v55, %v1225_v23  ;;  %v7627_v3 = vrot.slane %v9881_v17, 1  ;;  %v1278_v6 = vshrl.u32 %v777_v7, 16  ;;  %v784_v61 = vrot.slane %v546_v22, 1  ;;  %v7638_v23 = vld [vmem:[#allocation2 + $0x1b8] sm:$0xff] }
  0x6d   : >> { %2230 = vmatpush1.bf16.msra.mxu1 %v7027_v47  ;;  %6589 = vmatprep.mubr.bf16.mxu1 %v7586_v40  ;;  %v1249_v47 = vrot.slane %v7592_v51, 7  ;;  %v1256_v34 = vor.u32 %v1254_v32, %v1253_v5  ;;  %v783_v51 = vrot.slane %v7605_v14, 1  ;;  %v1284_v26 = vrot.slane %v1282_v42, 7 }
  0x6e   : >> { %2231 = vmatprep.subr.bf16.mxu1 %v9960_v62  ;;  %v1285_v55 = vshll.u32 %v779_v24, 16  ;;  %v1313_v46 = vshrl.u32 %v7616_v43, 16  ;;  %v896_v7 = vrot.slane %v894_v8, 7  ;;  %v7642_v5 = vshrl.u32 %v780_v57, 16  ;;  %v548_v24 = vld [vmem:[#allocation2 + $0x1c0] sm:$0x1] }
  0x6f   : >> { %1750 = vmatpush1.bf16.msra.mxu0 %v7028_v28  ;;  %v9882_v28 = vshrl.u32 %v7364_v35, 16  ;;  %v785_v32 = vsel %vm731_vm0, %v783_v51, %v784_v61  ;;  %v7648_v12 = vsel %vm792_vm1, %v7566_v41, %v860_v59  ;;  %v889_v42 = vrot.slane %v887_v9, 7  ;;  %v479_v8 = vld [vmem:[#allocation2 + $0x60] sm:$0x80]  ;;  %v7031_v57 = vld [vmem:[%s7352_s19 + $0x48] sm:$0xff]  }
  0x70   : >> { %6553 = vmatprep.subr.bf16.mxu0 %v7356_v30  ;;  %v9962_v22 = vshll.u32 %v7343_v19, 16  ;;  %v1316_v41 = vshll.u32 %v7616_v43, 16  ;;  %v1344_v59 = vshrl.u32 %v785_v32, 16  ;;  %v1287_v19 = vor.u32 %v1285_v55, %v1284_v26 }
  0x71   : >> { %2232 = vmatpush1.bf16.msra.mxu1 %v7029_v52  ;;  %v585_v20 = vor.u32 %v9882_v28, %v7627_v3  ;;  %v903_v52 = vor.u32 %v901_v29, %v900_v31  ;;  %v7656_v31 = vsel %vm792_vm1, %v1249_v47, %v1256_v34  ;;  %v1280_v29 = vrot.slane %v1278_v6, 7  ;;  %v7669_v34 = vld [vmem:[#allocation2 + $0x8] sm:$0xff] }
  0x72   : >> { %1752 = vmatmul.mubr.bf16.vlgmr.msra.gmra.mrb[0].mxu0 %v7583_v16  ;;  %2233 = vmatprep.subr.bf16.mxu1 %v9960_v62  ;;  %v891_v17 = vor.u32 %v890_v60, %v9962_v22  ;;  %v1315_v9 = vrot.slane %v1313_v46, 7  ;;  %v786_v60 = vrot.slane %v7638_v23, 1  ;;  %v787_v61 = vrot.slane %v548_v24, 1  ;;  %v7032_v22 = vld [vmem:[%s7352_s19 + $0x50] sm:$0xff]  }
  0x73   : >> { %6554 = vmatpush3.bf16.msra.mxu0 %v7356_v30  ;;  %1759 = vmatprep.mubr.bf16.mxu0 %v7620_v15  ;;  %v929_v30 = vshrl.u32 %v585_v20, 16  ;;  %v1311_v28 = vrot.slane %v7642_v5, 7  ;;  %v9884_v47 = vshll.u32 %v7367_v37, 16  ;;  %v590_v43 = vshrl.u32 %v7367_v37, 16 }
  0x74   : >> { %6590 = vmatmul.mubr.bf16.gmra.mrb[16].mxu1 %v7609_v36  ;;  %6555 = vmatprep.subr.bf16.mxu0 %v7362_v33  ;;  %v925_v6 = vshrl.u32 %v7627_v3, 16  ;;  %v932_v55 = vshll.u32 %v585_v20, 16  ;;  %v918_v46 = vshrl.u32 %v479_v8, 16  ;;  %v1347_v24 = vshll.u32 %v785_v32, 16 }
  0x75   : >> { %2234 = vmatpush1.bf16.msra.mxu1 %v7030_v0  ;;  %6593 = vmatprep.mubr.bf16.mxu1 %v7623_v53  ;;  %v7663_v0 = vsel %vm792_vm1, %v896_v7, %v903_v52  ;;  %v931_v26 = vrot.slane %v929_v30, 7  ;;  %v1340_v7 = vshrl.u32 %v783_v51, 16  ;;  %v1346_v52 = vrot.slane %v1344_v59, 7  ;;  %v7033_v59 = vld [vmem:[%s7352_s19 + $0x58] sm:$0xff]  }
  0x76   : >> { %2235 = vmatprep.subr.bf16.mxu1 %v9960_v62  ;;  %v7678_v5 = vsel %vm792_vm1, %v1280_v29, %v1287_v19  ;;  %v1318_v3 = vor.u32 %v1316_v41, %v1315_v9  ;;  %v788_v20 = vsel %vm731_vm0, %v786_v60, %v787_v61  ;;  %v9883_v30 = vshll.u32 %v7669_v34, 16 }
  0x77   : >> { %6556 = vmatpush3.bf16.msra.mxu0 %v7362_v33  ;;  %v589_v33 = vrot.slane %v9884_v47, 1  ;;  %v7684_v51 = vsel %vm792_vm1, %v889_v42, %v891_v17  ;;  %v927_v8 = vrot.slane %v925_v6, 7  ;;  %v9885_v41 = vshrl.u32 %v7669_v34, 16 }
  0x78   : >> { %6557 = vmatprep.subr.bf16.mxu0 %v7371_v38  ;;  %v554_v29 = vrot.slane %v9883_v30, 1  ;;  %v1342_v17 = vrot.slane %v1340_v7, 7  ;;  %v1349_v42 = vor.u32 %v1347_v24, %v1346_v52  ;;  %v1375_v19 = vshrl.u32 %v788_v20, 16  ;;  %v481_v24 = vld [vmem:[#allocation2 + $0x78] sm:$0x80] }
  0x79   : >> { %2236 = vmatpush1.bf16.msra.mxu1 %v7031_v57  ;;  %v592_v32 = vor.u32 %v590_v43, %v589_v33  ;;  %v934_v57 = vor.u32 %v932_v55, %v931_v26  ;;  %v920_v61 = vrot.slane %v918_v46, 7  ;;  %v9964_v6 = vshrl.u32 %v7364_v35, 16 }
  0x7a   : >> { %1760 = vmatmul.mubr.bf16.gmra.mrb[4].mxu0 %v7648_v12  ;;  %2237 = vmatprep.subr.bf16.mxu1 %v9960_v62  ;;  %v956_v55 = vshrl.u32 %v589_v33, 16  ;;  %v9887_v7 = vshll.u32 %v7394_v50, 16  ;;  %v9888_v46 = vshrl.u32 %v7394_v50, 16  ;;  %v7713_v33 = vsel %vm792_vm1, %v1342_v17, %v1349_v42 }
  0x7b   : >> { %1767 = vmatprep.mubr.bf16.mxu0 %v7663_v0  ;;  %6558 = vmatpush3.bf16.msra.mxu0 %v7371_v38  ;;  %v960_v9 = vshrl.u32 %v592_v32, 16  ;;  %v7698_v38 = vsel %vm792_vm1, %v1311_v28, %v1318_v3  ;;  %v921_v26 = vrot.slane %v9964_v6, 7  ;;  %v963_v47 = vshll.u32 %v592_v32, 16  ;;  %v7034_v6 = vld [vmem:[%s7352_s19 + $0x60] sm:$0xff]   ;;  %9965 = vst [vmem:[#allocation9_spill] sm:$0xff] %v7713_v33 }
  0x7c   : >> { %6594 = vmatmul.mubr.bf16.gmra.mrb[20].mxu1 %v7656_v31  ;;  %6559 = vmatprep.subr.bf16.mxu0 %v7383_v44  ;;  %9963 = vst [vmem:[#allocation8_spill] sm:$0xff] %v7698_v38  ;;  %v7707_v52 = vsel %vm792_vm1, %v927_v8, %v934_v57  ;;  %v1371_v28 = vshrl.u32 %v786_v60, 16  ;;  %v1377_v32 = vrot.slane %v1375_v19, 7  ;;  %v801_v60 = vshrl.u32 %v554_v29, 16 }
  0x7d   : >> { %2238 = vmatpush1.bf16.msra.mxu1 %v7032_v22  ;;  %6597 = vmatprep.mubr.bf16.mxu1 %v7678_v5  ;;  %v557_v22 = vor.u32 %v9885_v41, %v554_v29  ;;  %v962_v30 = vrot.slane %v960_v9, 7  ;;  %v1378_v9 = vshll.u32 %v788_v20, 16  ;;  %v9886_v41 = vshll.u32 %v7398_v54, 16 }
  0x7e   : >> { %2239 = vmatprep.subr.bf16.mxu1 %v9960_v62  ;;  %v958_v42 = vrot.slane %v956_v55, 7  ;;  %v471_v55 = vld [vmem:[#allocation2] sm:$0x80] }
  0x7f   : >> { %6560 = vmatpush3.bf16.msra.mxu0 %v7383_v44  ;;  %v805_v3 = vshrl.u32 %v557_v22, 16  ;;  %v596_v44 = vrot.slane %v9887_v7, 1  ;;  %v808_v57 = vshll.u32 %v557_v22, 16  ;;  %v965_v20 = vor.u32 %v963_v47, %v962_v30 }
  0x80   : >> { %6561 = vmatprep.subr.bf16.mxu0 %v7391_v48  ;;  %v7729_v29 = vrot.slane %v9886_v41, 1  ;;  %v604_v22 = vshrl.u32 %v7398_v54, 16  ;;  %v1373_v47 = vrot.slane %v1371_v28, 7  ;;  %v1380_v30 = vor.u32 %v1378_v9, %v1377_v32 }
  0x81   : >> { %2240 = vmatpush1.bf16.msra.mxu1 %v7033_v59  ;;  %v807_v8 = vrot.slane %v805_v3, 7  ;;  %v9966_v59 = vshll.u32 %v7364_v35, 16  ;;  %v599_v19 = vor.u32 %v9888_v46, %v596_v44  ;;  %v7035_v35 = vld [vmem:[%s7352_s19 + $0x68] sm:$0xff]   ;;  %v987_v46 = vshrl.u32 %v596_v44, 16 }
  0x82   : >> { %1768 = vmatmul.mubr.bf16.gmra.mrb[8].mxu0 %v7684_v51  ;;  %2241 = vmatprep.subr.bf16.mxu1 %v9960_v62  ;;  %v606_v32 = vor.u32 %v604_v22, %v7729_v29  ;;  %v608_v9 = vshll.u32 %v7424_v13, 16  ;;  %v9968_v44 = vshrl.u32 %v7669_v34, 16 }
  0x83   : >> { %1775 = vmatprep.mubr.bf16.mxu0 %v7707_v52  ;;  %v922_v17 = vor.u32 %v921_v26, %v9966_v59  ;;  %6562 = vmatpush3.bf16.msra.mxu0 %v7391_v48  ;;  %v949_v26 = vshrl.u32 %v481_v24, 16  ;;  %v991_v3 = vshrl.u32 %v599_v19, 16  ;;  %v952_v48 = vrot.slane %v590_v43, 7 }
  0x84   : >> { %6598 = vmatmul.mubr.bf16.gmra.mrb[24].mxu1 %v7698_v38  ;;  %6563 = vmatprep.subr.bf16.mxu0 %v7405_v58  ;;  %v803_v59 = vrot.slane %v801_v60, 7  ;;  %v810_v41 = vor.u32 %v808_v57, %v807_v8  ;;  %v994_v24 = vshll.u32 %v599_v19, 16  ;;  %v7751_v43 = vsel %vm792_vm1, %v1373_v47, %v1380_v30 }
  0x85   : >> { %2242 = vmatpush1.bf16.msra.mxu1 %v7034_v6  ;;  %6601 = vmatprep.mubr.bf16.mxu1 %v7713_v33  ;;  %v7739_v7 = vsel %vm792_vm1, %v920_v61, %v922_v17  ;;  %v7742_v6 = vsel %vm792_vm1, %v958_v42, %v965_v20  ;;  %v993_v28 = vrot.slane %v991_v3, 7  ;;  %9967 = vst [vmem:[#allocation10_spill] sm:$0xff] %v7751_v43  ;;  %v7036_v61 = vld [vmem:[%s7352_s19 + $0x70] sm:$0xff]   ;;  %v794_v60 = vshrl.u32 %v471_v55, 16 }
  0x86   : >> { %2243 = vmatprep.subr.bf16.mxu1 %v9960_v62  ;;  %v797_v8 = vrot.slane %v9968_v44, 7  ;;  %v9969_v57 = vshll.u32 %v7367_v37, 16  ;;  %v811_v42 = vsel %vm792_vm1, %v803_v59, %v810_v41  ;;  %v483_v20 = vld [vmem:[#allocation2 + $0x90] sm:$0x80]  ;;  %v989_v19 = vrot.slane %v987_v46, 7  ;;  %v7769_v37 = vld [vmem:[%s7352_s19 + $0x80] sm:$0xff]  }
  0x87   : >> { %6564 = vmatpush3.bf16.msra.mxu0 %v7405_v58  ;;  %v951_v58 = vrot.slane %v949_v26, 7  ;;  %v1022_v47 = vshrl.u32 %v606_v32, 16  ;;  %v610_v30 = vrot.slane %v608_v9, 1  ;;  %v611_v26 = vshrl.u32 %v7424_v13, 16  ;;  %v7037_v41 = vld [vmem:[%s7352_s19 + $0x78] sm:$0xff]  }
  0x88   : >> { %6565 = vmatprep.subr.bf16.mxu0 %v7413_v2  ;;  %v953_v17 = vor.u32 %v952_v48, %v9969_v57  ;;  %v796_v55 = vrot.slane %v794_v60, 7  ;;  %v9970_v46 = vshll.u32 %v7669_v34, 16  ;;  %v980_v48 = vshrl.u32 %v483_v20, 16 }
  0x89   : >> { %2244 = vmatpush1.bf16.msra.mxu1 %v7035_v35  ;;  %v996_v35 = vor.u32 %v994_v24, %v993_v28  ;;  %v9971_v59 = vshrl.u32 %v7394_v50, 16  ;;  %v1018_v24 = vshrl.u32 %v7729_v29, 16  ;;  %v1025_v44 = vshll.u32 %v606_v32, 16 }
  0x8a   : >> { %1776 = vmatmul.mubr.bf16.gmra.mrb[12].mxu0 %v7739_v7  ;;  %2245 = vmatprep.subr.bf16.mxu1 %v9960_v62  ;;  %v7776_v3 = vsel %vm792_vm1, %v951_v58, %v953_v17  ;;  %v1024_v60 = vrot.slane %v1022_v47, 7  ;;  %v615_v57 = vshll.u32 %v7432_v25, 16  ;;  %v7038_v17 = vld [vmem:[%s7352_s19 + $0x180] sm:$0xff]   ;;  %v982_v29 = vrot.slane %v980_v48, 7 }
  0x8b   : >> { %1783 = vmatprep.mubr.bf16.mxu0 %v7742_v6  ;;  %6566 = vmatpush3.bf16.msra.mxu0 %v7413_v2  ;;  %v798_v2 = vor.u32 %v797_v8, %v9970_v46  ;;  %v983_v28 = vrot.slane %v9971_v59, 7  ;;  %v613_v8 = vor.u32 %v611_v26, %v610_v30  ;;  %v9972_v32 = vshll.u32 %v7394_v50, 16 }
  0x8c   : >> { %6602 = vmatmul.mubr.bf16.gmra.mrb[28].mxu1 %v7751_v43  ;;  %6567 = vmatprep.subr.bf16.mxu0 %v7421_v10  ;;  %v1020_v20 = vrot.slane %v1018_v24, 7  ;;  %v617_v47 = vrot.slane %v615_v57, 1  ;;  %v1049_v48 = vshrl.u32 %v610_v30, 16  ;;  %v9973_v30 = vshll.u32 %v7398_v54, 16 }
  0x8d   : >> { %2246 = vmatpush1.bf16.msra.mxu1 %v7036_v61  ;;  %2249 = vmatprep.mubr.bf16.mxu1 %v811_v42  ;;  %v7783_v61 = vsel %vm792_vm1, %v989_v19, %v996_v35  ;;  %v799_v58 = vsel %vm792_vm1, %v796_v55, %v798_v2  ;;  %v984_v42 = vor.u32 %v983_v28, %v9972_v32  ;;  %v1053_v35 = vshrl.u32 %v613_v8, 16  ;;  %v7039_v55 = vld [vmem:[%s7352_s19 + $0x188] sm:$0xff]  }
  0x8e   : >> { %2247 = vmatprep.subr.bf16.mxu1 %v9960_v62  ;;  %v1027_v19 = vor.u32 %v1025_v44, %v1024_v60  ;;  %v1014_v2 = vrot.slane %v604_v22, 7  ;;  %v1056_v59 = vshll.u32 %v613_v8, 16  ;;  %v622_v60 = vshll.u32 %v7440_v45, 16 }
  0x8f   : >> { %6568 = vmatpush3.bf16.msra.mxu0 %v7421_v10  ;;  %v485_v10 = vld [vmem:[#allocation2 + $0xa8] sm:$0x80]  ;;  %v7803_v50 = vsel %vm792_vm1, %v982_v29, %v984_v42  ;;  %v1055_v24 = vrot.slane %v1053_v35, 7  ;;  %v625_v42 = vshrl.u32 %v7440_v45, 16  ;;  %v1080_v35 = vshrl.u32 %v617_v47, 16 }
  0x90   : >> { %6605 = vmatprep.subr.bf16.mxu0 %v7769_v37  ;;  %v1011_v46 = vshrl.u32 %v485_v10, 16  ;;  %v7808_v28 = vsel %vm792_vm1, %v1020_v20, %v1027_v19  ;;  %v1015_v8 = vor.u32 %v1014_v2, %v9973_v30  ;;  %v624_v32 = vrot.slane %v622_v60, 1  ;;  %v7041_v20 = vld [vmem:[%s7352_s19 + $0x198] sm:$0xff]  }
  0x91   : >> { %2248 = vmatpush1.bf16.msra.mxu1 %v7037_v41  ;;  %v618_v41 = vshrl.u32 %v7432_v25, 16  ;;  %v1058_v10 = vor.u32 %v1056_v59, %v1055_v24  ;;  %v629_v59 = vshll.u32 %v7469_v11, 16  ;;  %v7042_v24 = vld [vmem:[%s7352_s19 + $0x1a0] sm:$0xff]  }
  0x92   : >> { %1784 = vmatmul.mubr.bf16.gmra.mrb[16].mxu0 %v7776_v3  ;;  %2766 = vmatprep.subr.bf16.mxu1 %v9960_v62  ;;  %v1013_v22 = vrot.slane %v1011_v46, 7 }
  0x93   : >> { %1791 = vmatprep.mubr.bf16.mxu0 %v7783_v61  ;;  %v620_v44 = vor.u32 %v618_v41, %v617_v47  ;;  %v1082_v47 = vrot.slane %v1080_v35, 7 }
  0x94   : >> { %2250 = vmatmul.mubr.bf16.vlgmr.msra.gmra.mrb[32].mxu1 %v799_v58  ;;  %v487_v58 = vld [vmem:[#allocation2 + $0xc0] sm:$0x80]  ;;  %v7825_v54 = vsel %vm792_vm1, %v1013_v22, %v1015_v8  ;;  %v631_v8 = vrot.slane %v629_v59, 1 }
  0x95   : >> { %2767 = vmatpush1.bf16.msra.mxu1 %v7038_v17  ;;  %2257 = vmatprep.mubr.bf16.mxu1 %v7544_v1  ;;  %v7040_v1 = vld [vmem:[%s7352_s19 + $0x190] sm:$0xff]   ;;  %v1051_v17 = vrot.slane %v1049_v48, 7  ;;  %v1084_v29 = vshrl.u32 %v620_v44, 16  ;;  %v1042_v19 = vshrl.u32 %v487_v58, 16  ;;  %v627_v48 = vor.u32 %v625_v42, %v624_v32  ;;  %v489_v58 = vld [vmem:[#allocation2 + $0xd8] sm:$0x80] }
  0x96   : >> { %2768 = vmatprep.subr.bf16.mxu1 %v9960_v62 }
  0x97   : >> { %v7830_v46 = vsel %vm792_vm1, %v1051_v17, %v1058_v10  ;;  %v1086_v2 = vrot.slane %v1084_v29, 7  ;;  %v1115_v30 = vshrl.u32 %v627_v48, 16  ;;  %v7043_v17 = vld [vmem:[%s7352_s19 + $0x1a8] sm:$0xff]   ;;  %v1073_v10 = vshrl.u32 %v489_v58, 16 }
  0x98   : >> { %v1111_v29 = vshrl.u32 %v624_v32, 16 }
  0x99   : >> { %2769 = vmatpush1.bf16.msra.mxu1 %v7039_v55  ;;  %v1087_v55 = vshll.u32 %v620_v44, 16  ;;  %v632_v44 = vshrl.u32 %v7469_v11, 16 }
  0x9a   : >> { %1792 = vmatmul.mubr.bf16.gmra.mrb[20].mxu0 %v7803_v50  ;;  %2770 = vmatprep.subr.bf16.mxu1 %v9960_v62 }
  0x9b   : >> { %1799 = vmatprep.mubr.bf16.mxu0 %v7808_v28  ;;  %v1089_v22 = vor.u32 %v1087_v55, %v1086_v2  ;;  %v634_v35 = vor.u32 %v632_v44, %v631_v8  ;;  %v636_v55 = vshll.u32 %v7483_v27, 16  ;;  %v7044_v2 = vld [vmem:[%s7352_s19 + $0x1b0] sm:$0xff]  }
  0x9c   : >> { %2258 = vmatmul.mubr.bf16.gmra.mrb[36].mxu1 %v7583_v16  ;;  %v1045_v16 = vrot.slane %v611_v26, 7 }
  0x9d   : >> { %2265 = vmatprep.mubr.bf16.mxu1 %v7620_v15  ;;  %2771 = vmatpush1.bf16.msra.mxu1 %v7040_v1  ;;  %v1044_v1 = vrot.slane %v1042_v19, 7  ;;  %v7850_v19 = vsel %vm792_vm1, %v1082_v47, %v1089_v22  ;;  %v1146_v58 = vshrl.u32 %v634_v35, 16  ;;  %v639_v47 = vshrl.u32 %v7483_v27, 16  ;;  %v7045_v22 = vld [vmem:[%s7352_s19 + $0x1b8] sm:$0xff]  }
  0x9e   : >> { %2772 = vmatprep.subr.bf16.mxu1 %v9960_v62  ;;  %v1046_v26 = vor.u32 %v1045_v16, %v608_v9  ;;  %v1076_v9 = vrot.slane %v618_v41, 7  ;;  %v1117_v16 = vrot.slane %v1115_v30, 7  ;;  %v1075_v41 = vrot.slane %v1073_v10, 7 }
  0x9f   : >> { %v1149_v10 = vshll.u32 %v634_v35, 16  ;;  %v493_v35 = vld [vmem:[#allocation2 + $0x108] sm:$0x80] }
  0xa0   : >> { %v7847_v13 = vsel %vm792_vm1, %v1044_v1, %v1046_v26  ;;  %v1077_v32 = vor.u32 %v1076_v9, %v615_v57  ;;  %v638_v26 = vrot.slane %v636_v55, 1  ;;  %v1107_v57 = vrot.slane %v625_v42, 7 }
  0xa1   : >> { %2773 = vmatpush1.bf16.msra.mxu1 %v7041_v20  ;;  %v1118_v20 = vshll.u32 %v627_v48, 16  ;;  %v1113_v48 = vrot.slane %v1111_v29, 7  ;;  %v1148_v29 = vrot.slane %v1146_v58, 7  ;;  %v7047_v58 = vld [vmem:[%s7352_s19 + $0x1c8] sm:$0xff]  }
  0xa2   : >> { %1800 = vmatmul.mubr.bf16.gmra.mrb[24].mxu0 %v7825_v54  ;;  %2774 = vmatprep.subr.bf16.mxu1 %v9960_v62  ;;  %v7869_v25 = vsel %vm792_vm1, %v1075_v41, %v1077_v32  ;;  %v1108_v42 = vor.u32 %v1107_v57, %v622_v60  ;;  %v1138_v60 = vrot.slane %v632_v44, 7 }
  0xa3   : >> { %1807 = vmatprep.mubr.bf16.mxu0 %v7830_v46  ;;  %v1120_v1 = vor.u32 %v1118_v20, %v1117_v16  ;;  %9974 = vst [vmem:[#allocation11_spill] sm:$0xff] %v7869_v25  ;;  %v641_v20 = vor.u32 %v639_v47, %v638_v26  ;;  %v9889_v16 = vshll.u32 %v7510_v4, 16  ;;  %v1151_v32 = vor.u32 %v1149_v10, %v1148_v29 }
  0xa4   : >> { %2266 = vmatmul.mubr.bf16.gmra.mrb[40].mxu1 %v7648_v12  ;;  %v1139_v44 = vor.u32 %v1138_v60, %v629_v59  ;;  %v1169_v59 = vrot.slane %v639_v47, 7 }
  0xa5   : >> { %2273 = vmatprep.mubr.bf16.mxu1 %v7663_v0  ;;  %2775 = vmatpush1.bf16.msra.mxu1 %v7042_v24  ;;  %v491_v24 = vld [vmem:[#allocation2 + $0xf0] sm:$0x80]  ;;  %v7872_v9 = vsel %vm792_vm1, %v1113_v48, %v1120_v1  ;;  %v1177_v48 = vshrl.u32 %v641_v20, 16  ;;  %v646_v1 = vshrl.u32 %v7510_v4, 16  ;;  %v1180_v57 = vshll.u32 %v641_v20, 16 }
  0xa6   : >> { %2776 = vmatprep.subr.bf16.mxu1 %v9960_v62  ;;  %v1104_v30 = vshrl.u32 %v491_v24, 16  ;;  %9975 = vst [vmem:[#allocation12_spill] sm:$0xff] %v7872_v9  ;;  %v645_v24 = vrot.slane %v9889_v16, 1  ;;  %v9890_v16 = vshll.u32 %v7536_v56, 16  ;;  %v495_v20 = vld [vmem:[#allocation2 + $0x120] sm:$0x80]  ;;  %v1170_v47 = vor.u32 %v1169_v59, %v636_v55 }
  0xa7   : >> { %v1179_v10 = vrot.slane %v1177_v48, 7  ;;  %v7049_v48 = vld [vmem:[%s7352_s19 + $0x1d8] sm:$0xff]   ;;  %v1200_v55 = vrot.slane %v646_v1, 7 }
  0xa8   : >> { %v1106_v41 = vrot.slane %v1104_v30, 7  ;;  %v1173_v30 = vshrl.u32 %v638_v26, 16  ;;  %v648_v29 = vor.u32 %v646_v1, %v645_v24  ;;  %v9977_v1 = vshll.u32 %v7510_v4, 16 }
  0xa9   : >> { %2777 = vmatpush1.bf16.msra.mxu1 %v7043_v17  ;;  %v1142_v17 = vshrl.u32 %v631_v8, 16 }
  0xaa   : >> { %1808 = vmatmul.mubr.bf16.gmra.mrb[28].mxu0 %v7847_v13  ;;  %2778 = vmatprep.subr.bf16.mxu1 %v9960_v62  ;;  %v7889_v45 = vsel %vm792_vm1, %v1106_v41, %v1108_v42  ;;  %v1175_v26 = vrot.slane %v1173_v30, 7  ;;  %v1182_v42 = vor.u32 %v1180_v57, %v1179_v10  ;;  %v1211_v60 = vshll.u32 %v648_v29, 16 }
  0xab   : >> { %1815 = vmatprep.mubr.bf16.mxu0 %v7850_v19  ;;  %v1144_v8 = vrot.slane %v1142_v17, 7 }
  0xac   : >> { %2274 = vmatmul.mubr.bf16.gmra.mrb[44].mxu1 %v7684_v51  ;;  %v7914_v30 = vsel %vm792_vm1, %v1175_v26, %v1182_v42  ;;  %v660_v42 = vshrl.u32 %v7568_v63, 16 }
  0xad   : >> { %2281 = vmatprep.mubr.bf16.mxu1 %v7707_v52  ;;  %2779 = vmatpush1.bf16.msra.mxu1 %v7044_v2  ;;  %v7046_v2 = vld [vmem:[%s7352_s19 + $0x1c0] sm:$0xff]   ;;  %v7894_v17 = vsel %vm792_vm1, %v1144_v8, %v1151_v32  ;;  %v1208_v8 = vshrl.u32 %v648_v29, 16  ;;  %v653_v32 = vshrl.u32 %v7536_v56, 16  ;;  %v497_v29 = vld [vmem:[#allocation2 + $0x138] sm:$0x80] }
  0xae   : >> { %2780 = vmatprep.subr.bf16.mxu1 %v9960_v62  ;;  %9976 = vst [vmem:[#allocation13_spill] sm:$0xff] %v7894_v17 }
  0xaf   : >> { %v1210_v57 = vrot.slane %v1208_v8, 7  ;;  %v7054_v8 = vld [vmem:[%s7352_s19 + $0x1e8] sm:$0xff]  }
  0xb1   : >> { %2781 = vmatpush1.bf16.msra.mxu1 %v7045_v22  ;;  %v1135_v22 = vshrl.u32 %v493_v35, 16  ;;  %v652_v35 = vrot.slane %v9890_v16, 1  ;;  %v9891_v16 = vshll.u32 %v7568_v63, 16 }
  0xb2   : >> { %1816 = vmatmul.mubr.bf16.gmra.mrb[32].mxu0 %v7869_v25  ;;  %2782 = vmatprep.subr.bf16.mxu1 %v9960_v62 }
  0xb3   : >> { %1823 = vmatprep.mubr.bf16.mxu0 %v7872_v9  ;;  %v1137_v41 = vrot.slane %v1135_v22, 7  ;;  %v1204_v22 = vshrl.u32 %v645_v24, 16  ;;  %v655_v10 = vor.u32 %v653_v32, %v652_v35 }
  0xb4   : >> { %2282 = vmatmul.mubr.bf16.gmra.mrb[48].mxu1 %v7739_v7 }
  0xb5   : >> { %2289 = vmatprep.mubr.bf16.mxu1 %v7742_v6  ;;  %2783 = vmatpush1.bf16.msra.mxu1 %v7046_v2  ;;  %v7048_v2 = vld [vmem:[%s7352_s19 + $0x1d0] sm:$0xff]   ;;  %v7911_v11 = vsel %vm792_vm1, %v1137_v41, %v1139_v44  ;;  %v1206_v24 = vrot.slane %v1204_v22, 7  ;;  %v1213_v44 = vor.u32 %v1211_v60, %v1210_v57  ;;  %v1239_v26 = vshrl.u32 %v655_v10, 16 }
  0xb6   : >> { %2784 = vmatprep.subr.bf16.mxu1 %v9960_v62  ;;  %v1242_v59 = vshll.u32 %v655_v10, 16 }
  0xb7   : >> { %v7934_v22 = vsel %vm792_vm1, %v1206_v24, %v1213_v44  ;;  %v1241_v60 = vrot.slane %v1239_v26, 7  ;;  %v667_v26 = vshrl.u32 %v7578_v21, 16 }
  0xb9   : >> { %2785 = vmatpush1.bf16.msra.mxu1 %v7047_v58  ;;  %v1166_v58 = vshrl.u32 %v495_v20, 16  ;;  %v659_v20 = vrot.slane %v9891_v16, 1  ;;  %v9893_v16 = vshll.u32 %v7578_v21, 16  ;;  %v1244_v24 = vor.u32 %v1242_v59, %v1241_v60 }
  0xba   : >> { %1824 = vmatmul.mubr.bf16.gmra.mrb[36].mxu0 %v7889_v45  ;;  %2786 = vmatprep.subr.bf16.mxu1 %v9960_v62 }
  0xbb   : >> { %1831 = vmatprep.mubr.bf16.mxu0 %v7894_v17  ;;  %v1168_v41 = vrot.slane %v1166_v58, 7  ;;  %v1235_v58 = vshrl.u32 %v652_v35, 16  ;;  %v662_v57 = vor.u32 %v660_v42, %v659_v20  ;;  %v1201_v35 = vor.u32 %v1200_v55, %v9977_v1 }
  0xbc   : >> { %2290 = vmatmul.mubr.bf16.gmra.mrb[52].mxu1 %v7776_v3  ;;  %v666_v44 = vrot.slane %v9893_v16, 1  ;;  %v1266_v55 = vshrl.u32 %v659_v20, 16  ;;  %v9894_v16 = vshll.u32 %v7605_v14, 16 }
  0xbd   : >> { %2297 = vmatprep.mubr.bf16.mxu1 %v7783_v61  ;;  %2787 = vmatpush1.bf16.msra.mxu1 %v7048_v2  ;;  %v7050_v2 = vld [vmem:[%s7352_s19 + $0x1e0] sm:$0xff]   ;;  %v7931_v27 = vsel %vm792_vm1, %v1168_v41, %v1170_v47  ;;  %v1237_v10 = vrot.slane %v1235_v58, 7  ;;  %v499_v47 = vld [vmem:[#allocation2 + $0x150] sm:$0x80]  ;;  %v1273_v58 = vshll.u32 %v662_v57, 16 }
  0xbe   : >> { %2788 = vmatprep.subr.bf16.mxu1 %v9960_v62  ;;  %v1228_v43 = vshrl.u32 %v499_v47, 16  ;;  %v669_v1 = vor.u32 %v667_v26, %v666_v44  ;;  %v674_v47 = vshrl.u32 %v7605_v14, 16 }
  0xbf   : >> { %v7954_v59 = vsel %vm792_vm1, %v1237_v10, %v1244_v24  ;;  %v673_v10 = vrot.slane %v9894_v16, 1 }
  0xc1   : >> { %2789 = vmatpush1.bf16.msra.mxu1 %v7049_v48  ;;  %v1197_v48 = vshrl.u32 %v497_v29, 16  ;;  %v1270_v29 = vshrl.u32 %v662_v57, 16  ;;  %v1301_v57 = vshrl.u32 %v669_v1, 16 }
  0xc2   : >> { %1832 = vmatmul.mubr.bf16.gmra.mrb[40].mxu0 %v7911_v11  ;;  %2790 = vmatprep.subr.bf16.mxu1 %v9960_v62 }
  0xc3   : >> { %1839 = vmatprep.mubr.bf16.mxu0 %v7914_v30  ;;  %v1199_v41 = vrot.slane %v1197_v48, 7  ;;  %v1231_v48 = vrot.slane %v653_v32, 7  ;;  %v1272_v60 = vrot.slane %v1270_v29, 7  ;;  %v501_v32 = vld [vmem:[#allocation2 + $0x168] sm:$0x80] }
  0xc4   : >> { %2298 = vmatmul.mubr.bf16.gmra.mrb[56].mxu1 %v7803_v50  ;;  %v1259_v24 = vshrl.u32 %v501_v32, 16  ;;  %v9979_v32 = vshll.u32 %v7568_v63, 16  ;;  %v1328_v63 = vshrl.u32 %v673_v10, 16 }
  0xc5   : >> { %2305 = vmatprep.mubr.bf16.mxu1 %v7808_v28  ;;  %2791 = vmatpush1.bf16.msra.mxu1 %v7050_v2  ;;  %v7057_v2 = vld [vmem:[%s7352_s19 + $0x1f0] sm:$0xff]   ;;  %v7951_v4 = vsel %vm792_vm1, %v1199_v41, %v1201_v35  ;;  %v1268_v35 = vrot.slane %v1266_v55, 7  ;;  %v1275_v20 = vor.u32 %v1273_v58, %v1272_v60  ;;  %v1303_v55 = vrot.slane %v1301_v57, 7 }
  0xc6   : >> { %2792 = vmatprep.subr.bf16.mxu1 %v9960_v62  ;;  %v676_v58 = vor.u32 %v674_v47, %v673_v10  ;;  %v9895_v60 = vshll.u32 %v7638_v23, 16 }
  0xc9   : >> { %2793 = vmatpush1.bf16.msra.mxu1 %v7054_v8  ;;  %v7060_v8 = vld [vmem:[%s7352_s19 + $0x1f8] sm:$0xff]  }
  0xca   : >> { %1840 = vmatmul.mubr.bf16.gmra.mrb[44].mxu0 %v7931_v27  ;;  %2794 = vmatprep.subr.bf16.mxu1 %v9960_v62 }
  0xcb   : >> { %1847 = vmatprep.mubr.bf16.mxu0 %v7934_v22 }
  0xcc   : >> { %2306 = vmatmul.mubr.bf16.gmra.mrb[60].mxu1 %v7825_v54 }
  0xcd   : >> { %2313 = vmatprep.mubr.bf16.mxu1 %v7830_v46  ;;  %2795 = vmatpush1.bf16.msra.mxu1 %v7057_v2  ;;  %v1230_v2 = vrot.slane %v1228_v43, 7  ;;  %v1262_v43 = vrot.slane %v660_v42, 7 }
  0xce   : >> { %2796 = vmatprep.subr.bf16.mxu1 %v9960_v62  ;;  %v9978_v62 = vshll.u32 %v7536_v56, 16  ;;  %v1297_v56 = vshrl.u32 %v666_v44, 16  ;;  %v503_v44 = vld [vmem:[#allocation2 + $0x180] sm:$0x80] }
  0xcf   : >> { %v1263_v16 = vor.u32 %v1262_v43, %v9979_v32  ;;  %v1290_v57 = vshrl.u32 %v503_v44, 16  ;;  %v513_v32 = vld [vmem:[#allocation2 + $0x20] sm:$0xff] }
  0xd0   : >> { %v1232_v41 = vor.u32 %v1231_v48, %v9978_v62  ;;  %v7970_v48 = vsel %vm792_vm1, %v1268_v35, %v1275_v20  ;;  %v1261_v62 = vrot.slane %v1259_v24, 7  ;;  %v681_v35 = vshrl.u32 %v7638_v23, 16 }
  0xd1   : >> { %2797 = vmatpush1.bf16.msra.mxu1 %v7060_v8  ;;  %v1304_v8 = vshll.u32 %v669_v1, 16  ;;  %v1332_v1 = vshrl.u32 %v676_v58, 16  ;;  %v1293_v24 = vrot.slane %v667_v26, 7  ;;  %v1292_v33 = vrot.slane %v1290_v57, 7 }
  0xd2   : >> { %1848 = vmatmul.mubr.bf16.gmra.mrb[48].mxu0 %v7951_v4  ;;  %v7967_v29 = vsel %vm792_vm1, %v1230_v2, %v1232_v41  ;;  %v1299_v2 = vrot.slane %v1297_v56, 7  ;;  %v680_v41 = vrot.slane %v9895_v60, 1  ;;  %v7983_v20 = vsel %vm792_vm1, %v1261_v62, %v1263_v16  ;;  %v514_v60 = vld [vmem:[#allocation2 + $0x28] sm:$0x1]  ;;  %v505_v62 = vld [vmem:[#allocation2 + $0x198] sm:$0x80] }
  0xd3   : >> { %1855 = vmatprep.mubr.bf16.mxu0 %v7954_v59  ;;  %v1306_v42 = vor.u32 %v1304_v8, %v1303_v55  ;;  %v1334_v56 = vrot.slane %v1332_v1, 7  ;;  %v1335_v8 = vshll.u32 %v676_v58, 16  ;;  %v1330_v26 = vrot.slane %v1328_v63, 7  ;;  %v515_v63 = vld [vmem:[#allocation2 + $0x38] sm:$0xff] }
  0xd4   : >> { %2314 = vmatmul.mubr.bf16.gmra.mrb[64].mxu1 %v7847_v13  ;;  %v683_v55 = vor.u32 %v681_v35, %v680_v41  ;;  %v735_v58 = vrot.slane %v513_v32, 1  ;;  %v1321_v1 = vshrl.u32 %v505_v62, 16  ;;  %v1359_v38 = vshrl.u32 %v680_v41, 16 }
  0xd5   : >> { %2321 = vmatprep.mubr.bf16.mxu1 %v7850_v19  ;;  %v7986_v43 = vsel %vm792_vm1, %v1299_v2, %v1306_v42  ;;  %v1337_v10 = vor.u32 %v1335_v8, %v1334_v56  ;;  %v736_v42 = vrot.slane %v514_v60, 1  ;;  %v516_v56 = vld [vmem:[#allocation2 + $0x40] sm:$0x1]  ;;  %v512_v8 = vld [vmem:[#allocation2 + $0x10] sm:$0x1]  ;;  %v732_v62 = vrot.slane %v7669_v34, 1 }
  0xd6   : >> { %v1363_v2 = vshrl.u32 %v683_v55, 16  ;;  %v1323_v60 = vrot.slane %v1321_v1, 7 }
  0xd7   : >> { %v7998_v57 = vsel %vm792_vm1, %v1330_v26, %v1337_v10  ;;  %v739_v10 = vrot.slane %v516_v56, 1  ;;  %v9982_v56 = vshll.u32 %v7638_v23, 16 }
  0xda   : >> { %1856 = vmatmul.mubr.bf16.gmra.mrb[52].mxu0 %v7967_v29 }
  0xdb   : >> { %1863 = vmatprep.mubr.bf16.mxu0 %v7970_v48 }
  0xdc   : >> { %2322 = vmatmul.mubr.bf16.gmra.mrb[68].mxu1 %v7869_v25  ;;  %v1324_v25 = vrot.slane %v674_v47, 7  ;;  %v1361_v47 = vrot.slane %v1359_v38, 7 }
  0xdd   : >> { %2329 = vmatprep.mubr.bf16.mxu1 %v7872_v9  ;;  %v9980_v9 = vshll.u32 %v7578_v21, 16  ;;  %v1365_v21 = vrot.slane %v1363_v2, 7  ;;  %v733_v2 = vrot.slane %v512_v8, 1 }
  0xdf   : >> { %v1294_v16 = vor.u32 %v1293_v24, %v9980_v9  ;;  %v1366_v9 = vshll.u32 %v683_v55, 16  ;;  %v737_v24 = vsel %vm731_vm0, %v735_v58, %v736_v42  ;;  %v738_v55 = vrot.slane %v515_v63, 1 }
  0xe0   : >> { %v848_v26 = vshrl.u32 %v737_v24, 16  ;;  %v734_v63 = vsel %vm731_vm0, %v732_v62, %v733_v2 }
  0xe1   : >> { %v7995_v44 = vsel %vm792_vm1, %v1292_v33, %v1294_v16  ;;  %v9981_v33 = vshll.u32 %v7605_v14, 16  ;;  %v1368_v41 = vor.u32 %v1366_v9, %v1365_v21  ;;  %v507_v16 = vld [vmem:[#allocation2 + $0x1b0] sm:$0x80]  ;;  %v844_v14 = vshrl.u32 %v735_v58, 16 }
  0xe2   : >> { %1864 = vmatmul.mubr.bf16.gmra.mrb[56].mxu0 %v7983_v20  ;;  %v1352_v1 = vshrl.u32 %v507_v16, 16  ;;  %v851_v21 = vshll.u32 %v737_v24, 16  ;;  %v740_v9 = vsel %vm731_vm0, %v738_v55, %v739_v10 }
  0xe3   : >> { %1871 = vmatprep.mubr.bf16.mxu0 %v7986_v43  ;;  %v1325_v32 = vor.u32 %v1324_v25, %v9981_v33  ;;  %v8012_v38 = vsel %vm792_vm1, %v1361_v47, %v1368_v41  ;;  %v850_v25 = vrot.slane %v848_v26, 7  ;;  %v817_v33 = vshrl.u32 %v734_v63, 16 }
  0xe4   : >> { %2330 = vmatmul.mubr.bf16.gmra.mrb[72].mxu1 %v7889_v45  ;;  %v1354_v34 = vrot.slane %v1352_v1, 7  ;;  %v882_v41 = vshll.u32 %v740_v9, 16  ;;  %v813_v26 = vshrl.u32 %v732_v62, 16  ;;  %v7052_v62 = vld [vmem:[%s7352_s19 + $0x88] sm:$0xff]  }
  0xe5   : >> { %2337 = vmatprep.mubr.bf16.mxu1 %v7894_v17  ;;  %v8009_v42 = vsel %vm792_vm1, %v1323_v60, %v1325_v32  ;;  %v1355_v17 = vrot.slane %v681_v35, 7  ;;  %v879_v60 = vshrl.u32 %v740_v9, 16  ;;  %v846_v35 = vrot.slane %v844_v14, 7  ;;  %v7055_v9 = vld [vmem:[%s7352_s19 + $0x98] sm:$0xff]  }
  0xe6   : >> { %v853_v58 = vor.u32 %v851_v21, %v850_v25  ;;  %v875_v32 = vshrl.u32 %v738_v55, 16  ;;  %v819_v23 = vrot.slane %v817_v33, 7  ;;  %v815_v1 = vrot.slane %v813_v26, 7  ;;  %v7053_v21 = vld [vmem:[%s7352_s19 + $0x90] sm:$0xff]  }
  0xe7   : >> { %v1356_v8 = vor.u32 %v1355_v17, %v9982_v56  ;;  %v881_v47 = vrot.slane %v879_v60, 7  ;;  %v820_v17 = vshll.u32 %v734_v63, 16  ;;  %v7056_v63 = vld [vmem:[%s7352_s19 + $0xa0] sm:$0xff]   ;;  %v7061_v56 = vld [vmem:[%s7352_s19 + $0xb8] sm:$0xff]   ;;  %v7063_v60 = vld [vmem:[%s7352_s19 + $0x208] sm:$0xff]  }
  0xe8   : >> { %v854_v16 = vsel %vm792_vm1, %v846_v35, %v853_v58  ;;  %v877_v10 = vrot.slane %v875_v32, 7  ;;  %v7064_v35 = vld [vmem:[%s7352_s19 + $0x210] sm:$0xff]  }
  0xe9   : >> { %v8023_v24 = vsel %vm792_vm1, %v1354_v34, %v1356_v8  ;;  %v884_v2 = vor.u32 %v882_v41, %v881_v47  ;;  %v822_v14 = vor.u32 %v820_v17, %v819_v23  ;;  %v7059_v34 = vld [vmem:[%s7352_s19 + $0xb0] sm:$0xff]   ;;  %v7062_v8 = vld [vmem:[%s7352_s19 + $0x200] sm:$0xff]   ;;  %v9983_v17 = vld [vmem:[#allocation3_spill] sm:$0xff] }
  0xea   : >> { %1872 = vmatmul.mubr.bf16.gmra.mrb[60].mxu0 %v7995_v44 }
  0xeb   : >> { %1879 = vmatprep.mubr.bf16.mxu0 %v7998_v57  ;;  %v8030_v55 = vsel %vm792_vm1, %v877_v10, %v884_v2  ;;  %v823_v25 = vsel %vm792_vm1, %v815_v1, %v822_v14  ;;  %v7069_v1 = vld [vmem:[%s7352_s19 + $0x238] sm:$0xff]  }
  0xec   : >> { %2338 = vmatmul.mubr.bf16.gmra.mrb[76].mxu1 %v7911_v11 }
  0xed   : >> { %2345 = vmatprep.mubr.bf16.mxu1 %v7914_v30 }
  0xf2   : >> { %1880 = vmatmul.mubr.bf16.gmra.mrb[64].mxu0 %v8009_v42 }
  0xf3   : >> { %1887 = vmatprep.mubr.bf16.mxu0 %v8012_v38 }
  0xf4   : >> { %2346 = vmatmul.mubr.bf16.gmra.mrb[80].mxu1 %v7931_v27 }
  0xf5   : >> { %2353 = vmatprep.mubr.bf16.mxu1 %v7934_v22 }
  0xfa   : >> { %1888 = vmatmul.mubr.bf16.gmra.mrb[68].mxu0 %v8023_v24 }
  0xfb   : >> { %6569 = vmatprep.mubr.bf16.mxu0 %v854_v16 }
  0xfc   : >> { %2354 = vmatmul.mubr.bf16.gmra.mrb[84].mxu1 %v7951_v4 }
  0xfd   : >> { %2361 = vmatprep.mubr.bf16.mxu1 %v7954_v59 }
 0x102   : >> { %6570 = vmatmul.mubr.bf16.vlgmr.msra.gmra.mrb[72].mxu0 %v8030_v55 }
 0x103   : >> { %6606 = vmatpush3.bf16.msra.mxu0 %v7769_v37  ;;  %6621 = vmatprep.mubr.bf16.mxu0 %v823_v25  ;;  %v7058_v37 = vld [vmem:[%s7352_s19 + $0xa8] sm:$0xff]  }
 0x104   : >> { %2362 = vmatmul.mubr.bf16.gmra.mrb[88].mxu1 %v7967_v29  ;;  %6607 = vmatprep.subr.bf16.mxu0 %v7052_v62  ;;  %v9985_v25 = vld [vmem:[#allocation5_spill] sm:$0xff] }
 0x105   : >> { %2369 = vmatprep.mubr.bf16.mxu1 %v7970_v48 }
 0x107   : >> { %6608 = vmatpush3.bf16.msra.mxu0 %v7052_v62 }
 0x108   : >> { %6609 = vmatprep.subr.bf16.mxu0 %v7053_v21 }
 0x10b   : >> { %6610 = vmatpush3.bf16.msra.mxu0 %v7053_v21  ;;  %v9986_v21 = vld [vmem:[#allocation6_spill] sm:$0xff] }
 0x10c   : >> { %2370 = vmatmul.mubr.bf16.gmra.mrb[92].mxu1 %v7983_v20  ;;  %6611 = vmatprep.subr.bf16.mxu0 %v7055_v9 }
 0x10d   : >> { %2377 = vmatprep.mubr.bf16.mxu1 %v7986_v43 }
 0x10f   : >> { %6612 = vmatpush3.bf16.msra.mxu0 %v7055_v9 }
 0x110   : >> { %6613 = vmatprep.subr.bf16.mxu0 %v7056_v63 }
 0x113   : >> { %6614 = vmatpush3.bf16.msra.mxu0 %v7056_v63 }
 0x114   : >> { %2378 = vmatmul.mubr.bf16.gmra.mrb[96].mxu1 %v7995_v44  ;;  %6615 = vmatprep.subr.bf16.mxu0 %v7058_v37 }
 0x115   : >> { %2385 = vmatprep.mubr.bf16.mxu1 %v7998_v57 }
 0x117   : >> { %6616 = vmatpush3.bf16.msra.mxu0 %v7058_v37  ;;  %v9987_v37 = vld [vmem:[#allocation7_spill] sm:$0xff] }
 0x118   : >> { %6617 = vmatprep.subr.bf16.mxu0 %v7059_v34 }
 0x11b   : >> { %6618 = vmatpush3.bf16.msra.mxu0 %v7059_v34 }
 0x11c   : >> { %2386 = vmatmul.mubr.bf16.gmra.mrb[100].mxu1 %v8009_v42  ;;  %6619 = vmatprep.subr.bf16.mxu0 %v7061_v56 }
 0x11d   : >> { %2798 = vmatprep.mubr.bf16.mxu1 %v7620_v15  ;;  %v7065_v15 = vld [vmem:[%s7352_s19 + $0x218] sm:$0xff]  }
 0x11f   : >> { %6620 = vmatpush3.bf16.msra.mxu0 %v7061_v56 }
 0x120   : >> { %6657 = vmatprep.subr.bf16.mxu0 %v7062_v8 }
 0x122   : >> { %6622 = vmatmul.mubr.bf16.vlgmr.msra.gmra.mrb[76].mxu0 %v854_v16  ;;  %v7067_v16 = vld [vmem:[%s7352_s19 + $0x228] sm:$0xff]  }
 0x123   : >> { %6658 = vmatpush3.bf16.msra.mxu0 %v7062_v8  ;;  %6625 = vmatprep.mubr.bf16.mxu0 %v8030_v55 }
 0x124   : >> { %2799 = vmatmul.mubr.bf16.vlgmr.msra.gmra.mrb[104].mxu1 %v7648_v12  ;;  %6659 = vmatprep.subr.bf16.mxu0 %v7063_v60  ;;  %v7066_v12 = vld [vmem:[%s7352_s19 + $0x220] sm:$0xff]  }
 0x125   : >> { %2806 = vmatprep.mubr.bf16.mxu1 %v7663_v0 }
 0x127   : >> { %v8056_v58 = vpop.f32.mrb[0].mxu1  ;;  %6660 = vmatpush3.bf16.msra.mxu0 %v7063_v60 }
 0x128   : >> { %v8058_v33 = vpop.f32.mrb[1].mxu1  ;;  %6661 = vmatprep.subr.bf16.mxu0 %v7064_v35 }
 0x129   : >> { %v8061_v32 = vpop.f32.mrb[2].mxu1 }
 0x12a   : >> { %v8063_v47 = vpop.f32.mrb[3].mxu1  ;;  %6626 = vmatmul.mubr.bf16.gmra.mrb[80].mxu0 %v7374_v39 }
 0x12b   : >> { %6629 = vmatprep.mubr.bf16.mxu0 %v7445_v49  ;;  %6662 = vmatpush3.bf16.msra.mxu0 %v7064_v35 }
 0x12c   : >> { %2807 = vmatmul.mubr.bf16.gmra.mrb[108].mxu1 %v7684_v51  ;;  %6663 = vmatprep.subr.bf16.mxu0 %v7065_v15  ;;  %v9984_v51 = vld [vmem:[#allocation4_spill] sm:$0xff] }
 0x12d   : >> { %2814 = vmatprep.mubr.bf16.mxu1 %v7707_v52  ;;  %v7068_v52 = vld [vmem:[%s7352_s19 + $0x230] sm:$0xff]  }
 0x12f   : >> { %v8070_v0 = vpop.f32.mrb[4].mxu1  ;;  %6664 = vmatpush3.bf16.msra.mxu0 %v7065_v15 }
 0x130   : >> { %v8072_v41 = vpop.f32.mrb[5].mxu1  ;;  %6665 = vmatprep.subr.bf16.mxu0 %v7066_v12 }
 0x131   : >> { %v8075_v26 = vpop.f32.mrb[6].mxu1 }
 0x132   : >> { %v8077_v23 = vpop.f32.mrb[7].mxu1  ;;  %6630 = vmatmul.mubr.bf16.gmra.mrb[84].mxu0 %v9983_v17 }
 0x133   : >> { %6633 = vmatprep.mubr.bf16.mxu0 %v9984_v51  ;;  %6666 = vmatpush3.bf16.msra.mxu0 %v7066_v12 }
 0x134   : >> { %2815 = vmatmul.mubr.bf16.gmra.mrb[112].mxu1 %v7739_v7  ;;  %6667 = vmatprep.subr.bf16.mxu0 %v7067_v16 }
 0x135   : >> { %2822 = vmatprep.mubr.bf16.mxu1 %v7742_v6 }
 0x137   : >> { %v8084_v10 = vpop.f32.mrb[8].mxu1  ;;  %6668 = vmatpush3.bf16.msra.mxu0 %v7067_v16 }
 0x138   : >> { %v8086_v2 = vpop.f32.mrb[9].mxu1  ;;  %6669 = vmatprep.subr.bf16.mxu0 %v7068_v52 }
 0x139   : >> { %v8089_v14 = vpop.f32.mrb[10].mxu1 }
 0x13a   : >> { %v8091_v62 = vpop.f32.mrb[11].mxu1  ;;  %6634 = vmatmul.mubr.bf16.gmra.mrb[88].mxu0 %v9985_v25 }
 0x13b   : >> { %6637 = vmatprep.mubr.bf16.mxu0 %v9986_v21  ;;  %6670 = vmatpush3.bf16.msra.mxu0 %v7068_v52 }
 0x13c   : >> { %2823 = vmatmul.mubr.bf16.gmra.mrb[116].mxu1 %v7776_v3  ;;  %6671 = vmatprep.subr.bf16.mxu0 %v7069_v1 }
 0x13d   : >> { %2830 = vmatprep.mubr.bf16.mxu1 %v7783_v61 }
 0x13f   : >> { %v8097_v7 = vpop.f32.mrb[12].mxu1  ;;  %6672 = vmatpush3.bf16.msra.mxu0 %v7069_v1 }
 0x140   : >> { %v8099_v6 = vpop.f32.mrb[13].mxu1 }
 0x141   : >> { %v8101_v9 = vpop.f32.mrb[14].mxu1 }
 0x142   : >> { %v8103_v63 = vpop.f32.mrb[15].mxu1  ;;  %6638 = vmatmul.mubr.bf16.gmra.mrb[92].mxu0 %v9987_v37 }
 0x143   : >> { %6641 = vmatprep.mubr.bf16.mxu0 %v7571_v18 }
 0x144   : >> { %2831 = vmatmul.mubr.bf16.gmra.mrb[120].mxu1 %v7803_v50 }
 0x145   : >> { %v8108_v34 = vpop.f32.mrb[0].mxu0  ;;  %2838 = vmatprep.mubr.bf16.mxu1 %v7808_v28 }
 0x146   : >> { %9988 = vst [vmem:[#allocation3_spill] sm:$0xff] %v8108_v34  ;;  %v1755_v3 = vpop.f32.mrb[1].mxu0 }
 0x147   : >> { %v8111_v61 = vpop.f32.mrb[16].mxu1  ;;  %v8113_v56 = vpop.f32.mrb[2].mxu0 }
 0x148   : >> { %9989 = vst [vmem:[#allocation4_spill] sm:$0xff] %v8113_v56  ;;  %v8115_v8 = vpop.f32.mrb[17].mxu1  ;;  %v1758_v60 = vpop.f32.mrb[3].mxu0 }
 0x149   : >> { %v8117_v35 = vpop.f32.mrb[18].mxu1 }
 0x14a   : >> { %v8119_v15 = vpop.f32.mrb[19].mxu1  ;;  %6642 = vmatmul.mubr.bf16.gmra.mrb[96].mxu0 %v7586_v40 }
 0x14b   : >> { %6645 = vmatprep.mubr.bf16.mxu0 %v7609_v36 }
 0x14c   : >> { %2839 = vmatmul.mubr.bf16.gmra.mrb[124].mxu1 %v7825_v54 }
 0x14d   : >> { %v8124_v50 = vpop.f32.mrb[4].mxu0  ;;  %2846 = vmatprep.mubr.bf16.mxu1 %v7830_v46 }
 0x14e   : >> { %9990 = vst [vmem:[#allocation5_spill] sm:$0xff] %v8124_v50  ;;  %v1763_v28 = vpop.f32.mrb[5].mxu0 }
 0x14f   : >> { %v8127_v12 = vpop.f32.mrb[20].mxu1  ;;  %v8129_v16 = vpop.f32.mrb[6].mxu0 }
 0x150   : >> { %9991 = vst [vmem:[#allocation6_spill] sm:$0xff] %v8127_v12  ;;  %9992 = vst [vmem:[#allocation7_spill] sm:$0xff] %v8129_v16  ;;  %v8131_v52 = vpop.f32.mrb[21].mxu1  ;;  %v1766_v1 = vpop.f32.mrb[7].mxu0 }
 0x151   : >> { %v8133_v3 = vpop.f32.mrb[22].mxu1 }
 0x152   : >> { %9993 = vst [vmem:[#allocation14_spill] sm:$0xff] %v8133_v3  ;;  %v8135_v60 = vpop.f32.mrb[23].mxu1  ;;  %6646 = vmatmul.mubr.bf16.gmra.mrb[100].mxu0 %v7623_v53 }
 0x153   : >> { %9994 = vst [vmem:[#allocation15_spill] sm:$0xff] %v8135_v60  ;;  %6649 = vmatprep.mubr.bf16.mxu0 %v7656_v31 }
 0x154   : >> { %2847 = vmatmul.mubr.bf16.gmra.mrb[128].mxu1 %v7847_v13  ;;  %v9999_v13 = vld [vmem:[#allocation8_spill] sm:$0xff] }
 0x155   : >> { %v1769_v54 = vpop.f32.mrb[8].mxu0  ;;  %2854 = vmatprep.mubr.bf16.mxu1 %v7850_v19  ;;  %v10000_v19 = vld [vmem:[#allocation11_spill] sm:$0xff] }
 0x156   : >> { %v1947_v46 = vadd.f32 %v8058_v33, %v1769_v54  ;;  %v1771_v28 = vpop.f32.mrb[9].mxu0  ;;  %v10001_v54 = vld [vmem:[#allocation12_spill] sm:$0xff] }
 0x157   : >> { %v8142_v56 = vpop.f32.mrb[24].mxu1  ;;  %v1772_v16 = vpop.f32.mrb[10].mxu0 }
 0x158   : >> { %9995 = vst [vmem:[#allocation16_spill] sm:$0xff] %v8142_v56  ;;  %v1950_v1 = vadd.f32 %v8063_v47, %v1772_v16  ;;  %v8145_v34 = vpop.f32.mrb[25].mxu1  ;;  %v1774_v50 = vpop.f32.mrb[11].mxu0 }
 0x159   : >> { %9996 = vst [vmem:[#allocation17_spill] sm:$0xff] %v8145_v34  ;;  %v8147_v3 = vpop.f32.mrb[26].mxu1 }
 0x15a   : >> { %9997 = vst [vmem:[#allocation18_spill] sm:$0xff] %v8147_v3  ;;  %v8149_v12 = vpop.f32.mrb[27].mxu1  ;;  %6650 = vmatmul.mubr.bf16.gmra.mrb[104].mxu0 %v7678_v5 }
 0x15b   : >> { %9998 = vst [vmem:[#allocation19_spill] sm:$0xff] %v8149_v12  ;;  %6653 = vmatprep.mubr.bf16.mxu0 %v9999_v13 }
 0x15c   : >> { %2855 = vmatmul.mubr.bf16.gmra.mrb[132].mxu1 %v10000_v19  ;;  %v10005_v19 = vld [vmem:[#allocation9_spill] sm:$0xff] }
 0x15d   : >> { %v1777_v33 = vpop.f32.mrb[12].mxu0  ;;  %2862 = vmatprep.mubr.bf16.mxu1 %v10001_v54 }
 0x15e   : >> { %v1955_v28 = vadd.f32 %v8056_v58, %v1777_v33  ;;  %v1779_v56 = vpop.f32.mrb[13].mxu0 }
 0x15f   : >> { %v8156_v47 = vpop.f32.mrb[28].mxu1  ;;  %v1780_v16 = vpop.f32.mrb[14].mxu0  ;;  %v10006_v56 = vld [vmem:[#allocation13_spill] sm:$0xff] }
 0x160   : >> { %10002 = vst [vmem:[#allocation8_spill] sm:$0xff] %v8156_v47  ;;  %v8159_v50 = vadd.f32 %v8061_v32, %v1780_v16  ;;  %v8161_v3 = vpop.f32.mrb[29].mxu1  ;;  %v1782_v12 = vpop.f32.mrb[15].mxu0 }
 0x161   : >> { %v8163_v34 = vpop.f32.mrb[30].mxu1 }
 0x162   : >> { %10003 = vst [vmem:[#allocation11_spill] sm:$0xff] %v8163_v34  ;;  %v8165_v60 = vpop.f32.mrb[31].mxu1  ;;  %6654 = vmatmul.mubr.bf16.gmra.mrb[108].mxu0 %v10005_v19 }
 0x163   : >> { %10004 = vst [vmem:[#allocation12_spill] sm:$0xff] %v8165_v60  ;;  %6673 = vmatprep.mubr.bf16.mxu0 %v8030_v55 }
 0x164   : >> { %2863 = vmatmul.mubr.bf16.gmra.mrb[136].mxu1 %v7889_v45 }
 0x165   : >> { %v1785_v58 = vpop.f32.mrb[16].mxu0  ;;  %2870 = vmatprep.mubr.bf16.mxu1 %v10006_v56 }
 0x166   : >> { %v8172_v33 = vadd.f32 %v8072_v41, %v1785_v58  ;;  %v1787_v32 = vpop.f32.mrb[17].mxu0 }
 0x167   : >> { %v8174_v54 = vpop.f32.mrb[32].mxu1  ;;  %v1788_v12 = vpop.f32.mrb[18].mxu0 }
 0x168   : >> { %v8177_v16 = vadd.f32 %v8077_v23, %v1788_v12  ;;  %v2253_v34 = vpop.f32.mrb[33].mxu1  ;;  %v1790_v47 = vpop.f32.mrb[19].mxu0 }
 0x169   : >> { %v8179_v60 = vpop.f32.mrb[34].mxu1 }
 0x16a   : >> { %v2256_v55 = vpop.f32.mrb[35].mxu1  ;;  %6674 = vmatmul.mubr.bf16.vlgmr.msra.gmra.mrb[112].mxu0 %v7374_v39 }
 0x16b   : >> { %6677 = vmatprep.mubr.bf16.mxu0 %v7445_v49 }
 0x16c   : >> { %2871 = vmatmul.mubr.bf16.gmra.mrb[140].mxu1 %v7911_v11 }
 0x16d   : >> { %v1793_v45 = vpop.f32.mrb[20].mxu0  ;;  %2878 = vmatprep.mubr.bf16.mxu1 %v7914_v30 }
 0x16e   : >> { %v8186_v41 = vadd.f32 %v8070_v0, %v1793_v45  ;;  %v1795_v58 = vpop.f32.mrb[21].mxu0 }
 0x16f   : >> { %v8188_v23 = vpop.f32.mrb[36].mxu1  ;;  %v1796_v34 = vpop.f32.mrb[22].mxu0 }
 0x170   : >> { %v8191_v47 = vadd.f32 %v8075_v26, %v1796_v34  ;;  %v2261_v56 = vpop.f32.mrb[37].mxu1  ;;  %v1798_v32 = vpop.f32.mrb[23].mxu0 }
 0x171   : >> { %v8193_v39 = vpop.f32.mrb[38].mxu1 }
 0x172   : >> { %v2264_v49 = vpop.f32.mrb[39].mxu1  ;;  %6678 = vmatmul.mubr.bf16.gmra.mrb[116].mxu0 %v9983_v17 }
 0x173   : >> { %6681 = vmatprep.mubr.bf16.mxu0 %v9984_v51 }
 0x174   : >> { %2879 = vmatmul.mubr.bf16.gmra.mrb[144].mxu1 %v7931_v27 }
 0x175   : >> { %v1801_v11 = vpop.f32.mrb[24].mxu0  ;;  %2886 = vmatprep.mubr.bf16.mxu1 %v7934_v22 }
 0x176   : >> { %v8200_v30 = vadd.f32 %v8086_v2, %v1801_v11  ;;  %v1803_v0 = vpop.f32.mrb[25].mxu0 }
 0x177   : >> { %v2267_v26 = vpop.f32.mrb[40].mxu1  ;;  %v1804_v12 = vpop.f32.mrb[26].mxu0 }
 0x178   : >> { %v8202_v55 = vadd.f32 %v2267_v26, %v1947_v46  ;;  %v8205_v45 = vadd.f32 %v8091_v62, %v1804_v12  ;;  %v2269_v58 = vpop.f32.mrb[41].mxu1  ;;  %v1806_v17 = vpop.f32.mrb[27].mxu0  ;;  %v8231_v26 = vld [vmem:[#allocation2 + $0x1d0] sm:$0xff] }
 0x179   : >> { %v2270_v34 = vpop.f32.mrb[42].mxu1 }
 0x17a   : >> { %v8207_v51 = vadd.f32 %v2270_v34, %v1950_v1  ;;  %v2272_v27 = vpop.f32.mrb[43].mxu1  ;;  %6682 = vmatmul.mubr.bf16.gmra.mrb[120].mxu0 %v9985_v25  ;;  %v688_v34 = vshrl.u32 %v8231_v26, 16 }
 0x17b   : >> { %6685 = vmatprep.mubr.bf16.mxu0 %v9986_v21 }
 0x17c   : >> { %2887 = vmatmul.mubr.bf16.gmra.mrb[148].mxu1 %v7951_v4 }
 0x17d   : >> { %v1809_v22 = vpop.f32.mrb[28].mxu0  ;;  %2894 = vmatprep.mubr.bf16.mxu1 %v7954_v59 }
 0x17e   : >> { %v8214_v2 = vadd.f32 %v8084_v10, %v1809_v22  ;;  %v1811_v62 = vpop.f32.mrb[29].mxu0 }
 0x17f   : >> { %v2275_v46 = vpop.f32.mrb[44].mxu1  ;;  %v1812_v56 = vpop.f32.mrb[30].mxu0 }
 0x180   : >> { %v8216_v32 = vadd.f32 %v2275_v46, %v1955_v28  ;;  %v8219_v1 = vadd.f32 %v8089_v14, %v1812_v56  ;;  %v2277_v49 = vpop.f32.mrb[45].mxu1  ;;  %v1814_v25 = vpop.f32.mrb[31].mxu0  ;;  %v550_v46 = vld [vmem:[#allocation2 + $0x1d8] sm:$0x1] }
 0x181   : >> { %v2278_v11 = vpop.f32.mrb[46].mxu1  ;;  %v790_v25 = vrot.slane %v550_v46, 1 }
 0x182   : >> { %v8222_v21 = vadd.f32 %v2278_v11, %v8159_v50  ;;  %v2280_v4 = vpop.f32.mrb[47].mxu1  ;;  %6686 = vmatmul.mubr.bf16.gmra.mrb[124].mxu0 %v9987_v37 }
 0x183   : >> { %6689 = vmatprep.mubr.bf16.mxu0 %v7571_v18 }
 0x184   : >> { %2895 = vmatmul.mubr.bf16.gmra.mrb[152].mxu1 %v7967_v29 }
 0x185   : >> { %v1817_v59 = vpop.f32.mrb[32].mxu0  ;;  %2902 = vmatprep.mubr.bf16.mxu1 %v7970_v48 }
 0x186   : >> { %v8229_v10 = vadd.f32 %v8099_v6, %v1817_v59  ;;  %v1819_v14 = vpop.f32.mrb[33].mxu0  ;;  %v685_v6 = vshll.u32 %v8231_v26, 16 }
 0x187   : >> { %v2283_v28 = vpop.f32.mrb[48].mxu1  ;;  %v1820_v0 = vpop.f32.mrb[34].mxu0 }
 0x188   : >> { %v8234_v50 = vadd.f32 %v2283_v28, %v8172_v33  ;;  %v8237_v37 = vadd.f32 %v8103_v63, %v1820_v0  ;;  %v2285_v18 = vpop.f32.mrb[49].mxu1  ;;  %v1822_v12 = vpop.f32.mrb[35].mxu0 }
 0x189   : >> { %v2286_v29 = vpop.f32.mrb[50].mxu1 }
 0x18a   : >> { %v8240_v58 = vadd.f32 %v2286_v29, %v8177_v16  ;;  %v2288_v48 = vpop.f32.mrb[51].mxu1  ;;  %6690 = vmatmul.mubr.bf16.gmra.mrb[128].mxu0 %v7586_v40  ;;  %v687_v16 = vrot.slane %v685_v6, 1 }
 0x18b   : >> { %6693 = vmatprep.mubr.bf16.mxu0 %v7609_v36 }
 0x18c   : >> { %2903 = vmatmul.mubr.bf16.gmra.mrb[156].mxu1 %v7983_v20  ;;  %v690_v49 = vor.u32 %v688_v34, %v687_v16  ;;  %v1390_v12 = vshrl.u32 %v687_v16, 16 }
 0x18d   : >> { %v1825_v33 = vpop.f32.mrb[36].mxu0  ;;  %2910 = vmatprep.mubr.bf16.mxu1 %v7986_v43 }
 0x18e   : >> { %v8248_v63 = vadd.f32 %v8097_v7, %v1825_v33  ;;  %v1827_v17 = vpop.f32.mrb[37].mxu0  ;;  %v1397_v48 = vshll.u32 %v690_v49, 16 }
 0x18f   : >> { %v2291_v27 = vpop.f32.mrb[52].mxu1  ;;  %v1828_v40 = vpop.f32.mrb[38].mxu0 }
 0x190   : >> { %v8254_v22 = vadd.f32 %v2291_v27, %v8186_v41  ;;  %v8257_v36 = vadd.f32 %v8101_v9, %v1828_v40  ;;  %v2293_v20 = vpop.f32.mrb[53].mxu1  ;;  %v1830_v62 = vpop.f32.mrb[39].mxu0  ;;  %v789_v41 = vrot.slane %v8231_v26, 1  ;;  %v509_v40 = vld [vmem:[#allocation2 + $0x1c8] sm:$0x80] }
 0x191   : >> { %v2294_v43 = vpop.f32.mrb[54].mxu1 }
 0x192   : >> { %v8260_v7 = vadd.f32 %v2294_v43, %v8191_v47  ;;  %v2296_v56 = vpop.f32.mrb[55].mxu1  ;;  %6694 = vmatmul.mubr.bf16.gmra.mrb[132].mxu0 %v7623_v53  ;;  %v1394_v47 = vshrl.u32 %v690_v49, 16  ;;  %v791_v0 = vsel %vm731_vm0, %v789_v41, %v790_v25  ;;  %v1402_v16 = vshrl.u32 %v789_v41, 16 }
 0x193   : >> { %6697 = vmatprep.mubr.bf16.mxu0 %v7656_v31  ;;  %v1409_v43 = vshll.u32 %v791_v0, 16  ;;  %v1386_v49 = vrot.slane %v688_v34, 7 }
 0x194   : >> { %2911 = vmatmul.mubr.bf16.gmra.mrb[160].mxu1 %v7995_v44  ;;  %v1396_v29 = vrot.slane %v1394_v47, 7 }
 0x195   : >> { %v1833_v9 = vpop.f32.mrb[40].mxu0  ;;  %2918 = vmatprep.mubr.bf16.mxu1 %v7998_v57  ;;  %v1387_v34 = vor.u32 %v1386_v49, %v685_v6 }
 0x196   : >> { %v8268_v11 = vadd.f32 %v8115_v8, %v1833_v9  ;;  %v1835_v4 = vpop.f32.mrb[41].mxu0  ;;  %v1399_v27 = vor.u32 %v1397_v48, %v1396_v29 }
 0x197   : >> { %v2299_v59 = vpop.f32.mrb[56].mxu1  ;;  %v1836_v14 = vpop.f32.mrb[42].mxu0  ;;  %v10007_v4 = vld [vmem:[#allocation10_spill] sm:$0xff] }
 0x198   : >> { %v8271_v53 = vadd.f32 %v2299_v59, %v8200_v30  ;;  %v8274_v31 = vadd.f32 %v8119_v15, %v1836_v14  ;;  %v2301_v44 = vpop.f32.mrb[57].mxu1  ;;  %v1838_v28 = vpop.f32.mrb[43].mxu0  ;;  %v1406_v30 = vshrl.u32 %v791_v0, 16 }
 0x199   : >> { %v2302_v18 = vpop.f32.mrb[58].mxu1 }
 0x19a   : >> { %v8278_v57 = vadd.f32 %v2302_v18, %v8205_v45  ;;  %v2304_v8 = vpop.f32.mrb[59].mxu1  ;;  %6698 = vmatmul.mubr.bf16.gmra.mrb[136].mxu0 %v7678_v5  ;;  %v1392_v45 = vrot.slane %v1390_v12, 7  ;;  %v1408_v62 = vrot.slane %v1406_v30, 7  ;;  %v10008_v18 = vld [vmem:[#allocation15_spill] sm:$0xff]  ;;  %v10009_v30 = vld [vmem:[#allocation6_spill] sm:$0xff] }
 0x19b   : >> { %6701 = vmatprep.mubr.bf16.mxu0 %v9999_v13 }
 0x19c   : >> { %2919 = vmatmul.mubr.bf16.gmra.mrb[164].mxu1 %v8009_v42  ;;  %v1400_v41 = vsel %vm792_vm1, %v1392_v45, %v1399_v27  ;;  %v1411_v47 = vor.u32 %v1409_v43, %v1408_v62 }
 0x19d   : >> { %v1841_v15 = vpop.f32.mrb[44].mxu0  ;;  %2926 = vmatprep.mubr.bf16.mxu1 %v8012_v38 }
 0x19e   : >> { %v8285_v33 = vadd.f32 %v8111_v61, %v1841_v15  ;;  %v1843_v17 = vpop.f32.mrb[45].mxu0  ;;  %v1383_v61 = vshrl.u32 %v509_v40, 16  ;;  %v10010_v40 = vld [vmem:[#allocation14_spill] sm:$0xff] }
 0x19f   : >> { %v2307_v20 = vpop.f32.mrb[60].mxu1  ;;  %v1844_v5 = vpop.f32.mrb[46].mxu0 }
 0x1a0   : >> { %v8288_v13 = vadd.f32 %v2307_v20, %v8214_v2  ;;  %v8291_v42 = vadd.f32 %v8117_v35, %v1844_v5  ;;  %v2309_v46 = vpop.f32.mrb[61].mxu1  ;;  %v1846_v38 = vpop.f32.mrb[47].mxu0  ;;  %v1404_v2 = vrot.slane %v1402_v16, 7  ;;  %v1385_v59 = vrot.slane %v1383_v61, 7 }
 0x1a1   : >> { %v2310_v56 = vpop.f32.mrb[62].mxu1  ;;  %v10011_v38 = vld [vmem:[#allocation17_spill] sm:$0xff] }
 0x1a2   : >> { %v8294_v25 = vadd.f32 %v2310_v56, %v8219_v1  ;;  %v2312_v9 = vpop.f32.mrb[63].mxu1  ;;  %6702 = vmatmul.mubr.bf16.gmra.mrb[140].mxu0 %v10005_v19  ;;  %v1412_v19 = vsel %vm792_vm1, %v1404_v2, %v1411_v47  ;;  %v1388_v48 = vsel %vm792_vm1, %v1385_v59, %v1387_v34 }
 0x1a3   : >> { %6705 = vmatprep.mubr.bf16.mxu0 %v10007_v4 }
 0x1a4   : >> { %2927 = vmatmul.mubr.bf16.gmra.mrb[168].mxu1 %v8023_v24 }
 0x1a5   : >> { %v1849_v35 = vpop.f32.mrb[48].mxu0  ;;  %2934 = vmatprep.mubr.bf16.mxu1 %v1400_v41 }
 0x1a6   : >> { %v2027_v1 = vadd.f32 %v8131_v52, %v1849_v35  ;;  %v1851_v14 = vpop.f32.mrb[49].mxu0 }
 0x1a7   : >> { %v2315_v44 = vpop.f32.mrb[64].mxu1  ;;  %v1852_v28 = vpop.f32.mrb[50].mxu0  ;;  %v10013_v14 = vld [vmem:[#allocation16_spill] sm:$0xff] }
 0x1a8   : >> { %v8305_v0 = vadd.f32 %v2315_v44, %v8229_v10  ;;  %v2030_v8 = vadd.f32 %v10008_v18, %v1852_v28  ;;  %v2317_v12 = vpop.f32.mrb[65].mxu1  ;;  %v1854_v24 = vpop.f32.mrb[51].mxu0 }
 0x1a9   : >> { %v2318_v29 = vpop.f32.mrb[66].mxu1 }
 0x1aa   : >> { %v8310_v26 = vadd.f32 %v2318_v29, %v8237_v37  ;;  %v2320_v6 = vpop.f32.mrb[67].mxu1  ;;  %6706 = vmatmul.mubr.bf16.gmra.mrb[144].mxu0 %v1412_v19 }
 0x1ac   : >> { %2935 = vmatmul.mubr.bf16.gmra.mrb[172].mxu1 %v1388_v48 }
 0x1ad   : >> { %v1857_v52 = vpop.f32.mrb[52].mxu0 }
 0x1ae   : >> { %v2035_v15 = vadd.f32 %v10009_v30, %v1857_v52  ;;  %v1859_v17 = vpop.f32.mrb[53].mxu0 }
 0x1af   : >> { %v2323_v45 = vpop.f32.mrb[68].mxu1  ;;  %v1860_v10 = vpop.f32.mrb[54].mxu0 }
 0x1b0   : >> { %v8314_v27 = vadd.f32 %v2323_v45, %v8248_v63  ;;  %v2038_v20 = vadd.f32 %v10010_v40, %v1860_v10  ;;  %v2325_v5 = vpop.f32.mrb[69].mxu1  ;;  %v1862_v16 = vpop.f32.mrb[55].mxu0  ;;  %v10012_v63 = vld [vmem:[#allocation19_spill] sm:$0xff] }
 0x1b1   : >> { %v2326_v62 = vpop.f32.mrb[70].mxu1  ;;  %v10015_v16 = vld [vmem:[#allocation12_spill] sm:$0xff] }
 0x1b2   : >> { %v8318_v37 = vadd.f32 %v2326_v62, %v8257_v36  ;;  %v2328_v43 = vpop.f32.mrb[71].mxu1 }
 0x1b5   : >> { %v1865_v46 = vpop.f32.mrb[56].mxu0 }
 0x1b6   : >> { %v2043_v56 = vadd.f32 %v10011_v38, %v1865_v46  ;;  %v1867_v61 = vpop.f32.mrb[57].mxu0 }
 0x1b7   : >> { %v2331_v49 = vpop.f32.mrb[72].mxu1  ;;  %v1868_v9 = vpop.f32.mrb[58].mxu0 }
 0x1b8   : >> { %v8322_v41 = vadd.f32 %v2331_v49, %v8268_v11  ;;  %v2046_v4 = vadd.f32 %v10012_v63, %v1868_v9  ;;  %v2333_v2 = vpop.f32.mrb[73].mxu1  ;;  %v1870_v47 = vpop.f32.mrb[59].mxu0  ;;  %v10014_v11 = vld [vmem:[#allocation18_spill] sm:$0xff] }
 0x1b9   : >> { %v2334_v35 = vpop.f32.mrb[74].mxu1 }
 0x1ba   : >> { %v8326_v59 = vadd.f32 %v2334_v35, %v8274_v31  ;;  %v2336_v36 = vpop.f32.mrb[75].mxu1  ;;  %v10017_v35 = vld [vmem:[#allocation11_spill] sm:$0xff] }
 0x1bd   : >> { %v1873_v34 = vpop.f32.mrb[60].mxu0 }
 0x1be   : >> { %v2051_v44 = vadd.f32 %v10013_v14, %v1873_v34  ;;  %v1875_v28 = vpop.f32.mrb[61].mxu0 }
 0x1bf   : >> { %v2339_v19 = vpop.f32.mrb[76].mxu1  ;;  %v1876_v18 = vpop.f32.mrb[62].mxu0 }
 0x1c0   : >> { %v8330_v12 = vadd.f32 %v2339_v19, %v8285_v33  ;;  %v2054_v24 = vadd.f32 %v10014_v11, %v1876_v18  ;;  %v2341_v29 = vpop.f32.mrb[77].mxu1  ;;  %v1878_v48 = vpop.f32.mrb[63].mxu0 }
 0x1c1   : >> { %v2342_v6 = vpop.f32.mrb[78].mxu1  ;;  %v10019_v48 = vld [vmem:[#allocation3_spill] sm:$0xff] }
 0x1c2   : >> { %v8334_v52 = vadd.f32 %v2342_v6, %v8291_v42  ;;  %v2344_v31 = vpop.f32.mrb[79].mxu1  ;;  %v10016_v42 = vld [vmem:[#allocation8_spill] sm:$0xff] }
 0x1c5   : >> { %v1881_v30 = vpop.f32.mrb[64].mxu0 }
 0x1c6   : >> { %v2059_v17 = vadd.f32 %v8161_v3, %v1881_v30  ;;  %v1883_v45 = vpop.f32.mrb[65].mxu0 }
 0x1c7   : >> { %v2347_v10 = vpop.f32.mrb[80].mxu1  ;;  %v1884_v40 = vpop.f32.mrb[66].mxu0 }
 0x1c8   : >> { %v8337_v5 = vadd.f32 %v2347_v10, %v2027_v1  ;;  %v2062_v33 = vadd.f32 %v10015_v16, %v1884_v40  ;;  %v2349_v62 = vpop.f32.mrb[81].mxu1  ;;  %v1886_v43 = vpop.f32.mrb[67].mxu0 }
 0x1c9   : >> { %v2350_v46 = vpop.f32.mrb[82].mxu1  ;;  %v10021_v43 = vld [vmem:[#allocation4_spill] sm:$0xff] }
 0x1ca   : >> { %v8340_v38 = vadd.f32 %v2350_v46, %v2030_v8  ;;  %v2352_v61 = vpop.f32.mrb[83].mxu1  ;;  %v10018_v8 = vld [vmem:[#allocation5_spill] sm:$0xff] }
 0x1cd   : >> { %v1889_v49 = vpop.f32.mrb[68].mxu0 }
 0x1ce   : >> { %v2067_v9 = vadd.f32 %v10016_v42, %v1889_v49  ;;  %v1891_v63 = vpop.f32.mrb[69].mxu0 }
 0x1cf   : >> { %v2355_v2 = vpop.f32.mrb[84].mxu1  ;;  %v1892_v47 = vpop.f32.mrb[70].mxu0 }
 0x1d0   : >> { %v8343_v3 = vadd.f32 %v2355_v2, %v2035_v15  ;;  %v2070_v36 = vadd.f32 %v10017_v35, %v1892_v47  ;;  %v2357_v1 = vpop.f32.mrb[85].mxu1  ;;  %v1894_v34 = vpop.f32.mrb[71].mxu0  ;;  %v10020_v15 = vld [vmem:[#allocation7_spill] sm:$0xff] }
 0x1d1   : >> { %v2358_v14 = vpop.f32.mrb[86].mxu1 }
 0x1d2   : >> { %v8346_v28 = vadd.f32 %v2358_v14, %v2038_v20  ;;  %v2360_v19 = vpop.f32.mrb[87].mxu1 }
 0x1d5   : >> { %v6571_v18 = vpop.f32.mrb[72].mxu0 }
 0x1d6   : >> { %v1939_v11 = vadd.f32 %v6571_v18, %v10018_v8  ;;  %v1930_v29 = vpop.f32.mrb[73].mxu0 }
 0x1d7   : >> { %v1931_v6 = vadd.f32 %v1930_v29, %v10019_v48  ;;  %v2363_v31 = vpop.f32.mrb[88].mxu1  ;;  %v6572_v30 = vpop.f32.mrb[74].mxu0 }
 0x1d8   : >> { %v8350_v45 = vadd.f32 %v2363_v31, %v2043_v56  ;;  %v1942_v10 = vadd.f32 %v6572_v30, %v10020_v15  ;;  %v2365_v40 = vpop.f32.mrb[89].mxu1  ;;  %v1933_v16 = vpop.f32.mrb[75].mxu0  ;;  %v2260_v62 = vadd.f32 %v8188_v23, %v1939_v11 }
 0x1d9   : >> { %v1934_v20 = vadd.f32 %v1933_v16, %v10021_v43  ;;  %v2366_v46 = vpop.f32.mrb[90].mxu1  ;;  %v2252_v61 = vadd.f32 %v8174_v54, %v1931_v6 }
 0x1da   : >> { %v8356_v49 = vadd.f32 %v2366_v46, %v2046_v4  ;;  %v2368_v42 = vpop.f32.mrb[91].mxu1  ;;  %v2263_v63 = vadd.f32 %v8193_v39, %v1942_v10 }
 0x1db   : >> { %v2255_v2 = vadd.f32 %v8179_v60, %v1934_v20 }
 0x1df   : >> { %v2371_v56 = vpop.f32.mrb[92].mxu1 }
 0x1e0   : >> { %v8360_v47 = vadd.f32 %v2371_v56, %v2051_v44  ;;  %v2373_v35 = vpop.f32.mrb[93].mxu1 }
 0x1e1   : >> { %v2374_v1 = vpop.f32.mrb[94].mxu1 }
 0x1e2   : >> { %v8362_v34 = vadd.f32 %v2374_v1, %v2054_v24  ;;  %v2376_v23 = vpop.f32.mrb[95].mxu1 }
 0x1e7   : >> { %v2379_v14 = vpop.f32.mrb[96].mxu1 }
 0x1e8   : >> { %v8364_v19 = vadd.f32 %v2379_v14, %v2059_v17  ;;  %v2381_v18 = vpop.f32.mrb[97].mxu1 }
 0x1e9   : >> { %v2382_v54 = vpop.f32.mrb[98].mxu1 }
 0x1ea   : >> { %v8366_v4 = vadd.f32 %v2382_v54, %v2062_v33  ;;  %v2384_v8 = vpop.f32.mrb[99].mxu1 }
 0x1ef   : >> { %v2387_v11 = vpop.f32.mrb[100].mxu1 }
 0x1f0   : >> { %v8368_v39 = vadd.f32 %v2387_v11, %v2067_v9  ;;  %v2389_v60 = vpop.f32.mrb[101].mxu1 }
 0x1f1   : >> { %v2390_v29 = vpop.f32.mrb[102].mxu1 }
 0x1f2   : >> { %v8370_v44 = vadd.f32 %v2390_v29, %v2070_v36  ;;  %v2392_v48 = vpop.f32.mrb[103].mxu1 }
 0x1f5   : >> { %v6623_v6 = vpop.f32.mrb[76].mxu0 }
 0x1f6   : >> { %v8372_v24 = vadd.f32 %v6623_v6, %v2260_v62  ;;  %v2428_v31 = vpop.f32.mrb[77].mxu0 }
 0x1f7   : >> { %v8374_v30 = vadd.f32 %v2428_v31, %v2252_v61  ;;  %v6624_v17 = vpop.f32.mrb[78].mxu0  ;;  %v8376_v15 = vpop.f32.mrb[104].mxu1 }
 0x1f8   : >> { %v8378_v33 = vadd.f32 %v6624_v17, %v2263_v63  ;;  %v2431_v10 = vpop.f32.mrb[79].mxu0  ;;  %v2802_v40 = vpop.f32.mrb[105].mxu1 }
 0x1f9   : >> { %v8380_v9 = vadd.f32 %v2431_v10, %v2255_v2  ;;  %v8382_v16 = vpop.f32.mrb[106].mxu1 }
 0x1fa   : >> { %v2805_v36 = vpop.f32.mrb[107].mxu1 }
 0x1fd   : >> { %v6627_v43 = vpop.f32.mrb[80].mxu0 }
 0x1fe   : >> { %v8385_v20 = vadd.f32 %v6627_v43, %v8216_v32  ;;  %v2444_v62 = vpop.f32.mrb[81].mxu0 }
 0x1ff   : >> { %v8388_v46 = vadd.f32 %v2444_v62, %v8202_v55  ;;  %v6628_v61 = vpop.f32.mrb[82].mxu0  ;;  %v8390_v42 = vpop.f32.mrb[108].mxu1 }
 0x200   : >> { %v8393_v63 = vadd.f32 %v6628_v61, %v8222_v21  ;;  %v2447_v56 = vpop.f32.mrb[83].mxu0  ;;  %v2810_v2 = vpop.f32.mrb[109].mxu1 }
 0x201   : >> { %v8396_v35 = vadd.f32 %v2447_v56, %v8207_v51  ;;  %v8398_v1 = vpop.f32.mrb[110].mxu1 }
 0x202   : >> { %v2813_v23 = vpop.f32.mrb[111].mxu1 }
 0x205   : >> { %v6631_v32 = vpop.f32.mrb[84].mxu0 }
 0x206   : >> { %v8401_v14 = vadd.f32 %v6631_v32, %v8254_v22  ;;  %v2460_v55 = vpop.f32.mrb[85].mxu0 }
 0x207   : >> { %v8404_v18 = vadd.f32 %v2460_v55, %v8234_v50  ;;  %v6632_v54 = vpop.f32.mrb[86].mxu0  ;;  %v8406_v8 = vpop.f32.mrb[112].mxu1 }
 0x208   : >> { %v8409_v21 = vadd.f32 %v6632_v54, %v8260_v7  ;;  %v2463_v11 = vpop.f32.mrb[87].mxu0  ;;  %v2818_v51 = vpop.f32.mrb[113].mxu1 }
 0x209   : >> { %v8412_v60 = vadd.f32 %v2463_v11, %v8240_v58  ;;  %v8414_v29 = vpop.f32.mrb[114].mxu1 }
 0x20a   : >> { %v2821_v48 = vpop.f32.mrb[115].mxu1 }
 0x20d   : >> { %v6635_v22 = vpop.f32.mrb[88].mxu0 }
 0x20e   : >> { %v8417_v6 = vadd.f32 %v6635_v22, %v8288_v13  ;;  %v2476_v50 = vpop.f32.mrb[89].mxu0 }
 0x20f   : >> { %v8420_v31 = vadd.f32 %v2476_v50, %v8271_v53  ;;  %v6636_v17 = vpop.f32.mrb[90].mxu0  ;;  %v8422_v10 = vpop.f32.mrb[116].mxu1 }
 0x210   : >> { %v8425_v7 = vadd.f32 %v6636_v17, %v8294_v25  ;;  %v2479_v40 = vpop.f32.mrb[91].mxu0  ;;  %v2826_v58 = vpop.f32.mrb[117].mxu1 }
 0x211   : >> { %v8428_v36 = vadd.f32 %v2479_v40, %v8278_v57  ;;  %v8430_v43 = vpop.f32.mrb[118].mxu1 }
 0x212   : >> { %v2829_v62 = vpop.f32.mrb[119].mxu1 }
 0x215   : >> { %v6639_v13 = vpop.f32.mrb[92].mxu0 }
 0x216   : >> { %v8433_v61 = vadd.f32 %v6639_v13, %v8314_v27  ;;  %v2492_v53 = vpop.f32.mrb[93].mxu0 }
 0x217   : >> { %v8436_v56 = vadd.f32 %v2492_v53, %v8305_v0  ;;  %v6640_v2 = vpop.f32.mrb[94].mxu0  ;;  %v8438_v23 = vpop.f32.mrb[120].mxu1 }
 0x218   : >> { %v8441_v25 = vadd.f32 %v6640_v2, %v8318_v37  ;;  %v2495_v32 = vpop.f32.mrb[95].mxu0  ;;  %v2834_v57 = vpop.f32.mrb[121].mxu1 }
 0x219   : >> { %v8444_v55 = vadd.f32 %v2495_v32, %v8310_v26  ;;  %v8446_v54 = vpop.f32.mrb[122].mxu1 }
 0x21a   : >> { %v2837_v11 = vpop.f32.mrb[123].mxu1 }
 0x21d   : >> { %v6643_v27 = vpop.f32.mrb[96].mxu0 }
 0x21e   : >> { %v8449_v51 = vadd.f32 %v6643_v27, %v8330_v12  ;;  %v2508_v0 = vpop.f32.mrb[97].mxu0 }
 0x21f   : >> { %v8452_v48 = vadd.f32 %v2508_v0, %v8322_v41  ;;  %v6644_v22 = vpop.f32.mrb[98].mxu0  ;;  %v8454_v50 = vpop.f32.mrb[124].mxu1 }
 0x220   : >> { %v8457_v37 = vadd.f32 %v6644_v22, %v8334_v52  ;;  %v2511_v17 = vpop.f32.mrb[99].mxu0  ;;  %v2842_v26 = vpop.f32.mrb[125].mxu1 }
 0x221   : >> { %v8460_v40 = vadd.f32 %v2511_v17, %v8326_v59  ;;  %v8462_v58 = vpop.f32.mrb[126].mxu1 }
 0x222   : >> { %v2845_v62 = vpop.f32.mrb[127].mxu1 }
 0x225   : >> { %v6647_v12 = vpop.f32.mrb[100].mxu0 }
 0x226   : >> { %v8465_v13 = vadd.f32 %v6647_v12, %v8343_v3  ;;  %v2524_v41 = vpop.f32.mrb[101].mxu0 }
 0x227   : >> { %v8468_v53 = vadd.f32 %v2524_v41, %v8337_v5  ;;  %v6648_v2 = vpop.f32.mrb[102].mxu0  ;;  %v8470_v32 = vpop.f32.mrb[128].mxu1 }
 0x228   : >> { %v8473_v52 = vadd.f32 %v6648_v2, %v8346_v28  ;;  %v2527_v57 = vpop.f32.mrb[103].mxu0  ;;  %v2850_v59 = vpop.f32.mrb[129].mxu1 }
 0x229   : >> { %v8476_v11 = vadd.f32 %v2527_v57, %v8340_v38  ;;  %v8478_v27 = vpop.f32.mrb[130].mxu1 }
 0x22a   : >> { %v2853_v0 = vpop.f32.mrb[131].mxu1 }
 0x22d   : >> { %v6651_v3 = vpop.f32.mrb[104].mxu0 }
 0x22e   : >> { %v8481_v22 = vadd.f32 %v6651_v3, %v8360_v47  ;;  %v2540_v5 = vpop.f32.mrb[105].mxu0 }
 0x22f   : >> { %v8484_v17 = vadd.f32 %v2540_v5, %v8350_v45  ;;  %v6652_v26 = vpop.f32.mrb[106].mxu0  ;;  %v8486_v62 = vpop.f32.mrb[132].mxu1 }
 0x230   : >> { %v8489_v28 = vadd.f32 %v6652_v26, %v8362_v34  ;;  %v2543_v12 = vpop.f32.mrb[107].mxu0  ;;  %v2858_v38 = vpop.f32.mrb[133].mxu1 }
 0x231   : >> { %v8492_v41 = vadd.f32 %v2543_v12, %v8356_v49  ;;  %v8494_v2 = vpop.f32.mrb[134].mxu1 }
 0x232   : >> { %10022 = vst [vmem:[#allocation9_spill] sm:$0xff] %v8489_v28  ;;  %v2861_v47 = vpop.f32.mrb[135].mxu1 }
 0x233   : >> { %10023 = vst [vmem:[#allocation13_spill] sm:$0xff] %v8492_v41 }
 0x235   : >> { %v6655_v57 = vpop.f32.mrb[108].mxu0 }
 0x236   : >> { %v8497_v45 = vadd.f32 %v6655_v57, %v8368_v39  ;;  %v2556_v59 = vpop.f32.mrb[109].mxu0  ;;  %v8521_v57 = vld [vmem:[%s3156_s27] ss:$0 sm:$0xff] }
 0x237   : >> { %v8500_v0 = vadd.f32 %v2556_v59, %v8364_v19  ;;  %v6656_v34 = vpop.f32.mrb[110].mxu0  ;;  %v8502_v3 = vpop.f32.mrb[136].mxu1 }
 0x238   : >> { %10024 = vst [vmem:[#allocation10_spill] sm:$0xff] %v8497_v45  ;;  %v8505_v5 = vadd.f32 %v6656_v34, %v8370_v44  ;;  %v2559_v49 = vpop.f32.mrb[111].mxu0  ;;  %v2866_v26 = vpop.f32.mrb[137].mxu1 }
 0x239   : >> { %10025 = vst [vmem:[#allocation15_spill] sm:$0xff] %v8500_v0  ;;  %v8508_v12 = vadd.f32 %v2559_v49, %v8366_v4  ;;  %v8510_v38 = vpop.f32.mrb[138].mxu1 }
 0x23a   : >> { %10026 = vst [vmem:[#allocation6_spill] sm:$0xff] %v8505_v5  ;;  %v2869_v47 = vpop.f32.mrb[139].mxu1 }
 0x23b   : >> { %10027 = vst [vmem:[#allocation14_spill] sm:$0xff] %v8508_v12  ;;  %v8528_v12 = vld [vmem:[%s3200_s30] ss:$0 sm:$0xff] }
 0x23d   : >> { %v6675_v19 = vpop.f32.mrb[112].mxu0 }
 0x23e   : >> { %v2986_v39 = vadd.f32 %v6675_v19, %v8390_v42  ;;  %v2977_v44 = vpop.f32.mrb[113].mxu0 }
 0x23f   : >> { %v2978_v4 = vadd.f32 %v2977_v44, %v8376_v15  ;;  %v8524_v59 = vpop.f32.mrb[140].mxu1  ;;  %v6676_v34 = vpop.f32.mrb[114].mxu0 }
 0x240   : >> { %v3122_v49 = vadd.f32 %v2986_v39, %v8372_v24  ;;  %v2989_v26 = vadd.f32 %v6676_v34, %v8398_v1  ;;  %v2874_v47 = vpop.f32.mrb[141].mxu1  ;;  %v2980_v5 = vpop.f32.mrb[115].mxu0 }
 0x241   : >> { %v3120_v42 = vadd.f32 %v2978_v4, %v8374_v30  ;;  %v2981_v19 = vadd.f32 %v2980_v5, %v8382_v16  ;;  %v8532_v45 = vpop.f32.mrb[142].mxu1 }
 0x242   : >> { %v3166_v0 = vmul.f32 %v8521_v57, %v3122_v49  ;;  %v3123_v15 = vadd.f32 %v2989_v26, %v8378_v33  ;;  %v2877_v44 = vpop.f32.mrb[143].mxu1 }
 0x243   : >> { %v3164_v41 = vmul.f32 %v8521_v57, %v3120_v42  ;;  %v3121_v24 = vadd.f32 %v2981_v19, %v8380_v9 }
 0x244   : >> { %v3210_v1 = vadd.f32 %v8528_v12, %v3166_v0  ;;  %v3167_v39 = vmul.f32 %v8521_v57, %v3123_v15 }
 0x245   : >> { %v3208_v34 = vadd.f32 %v8528_v12, %v3164_v41  ;;  %v3165_v30 = vmul.f32 %v8521_v57, %v3121_v24  ;;  %v6679_v16 = vpop.f32.mrb[116].mxu0 }
 0x246   : >> { %v3211_v5 = vadd.f32 %v8528_v12, %v3167_v39  ;;  %v3002_v4 = vadd.f32 %v6679_v16, %v8422_v10  ;;  %v2993_v49 = vpop.f32.mrb[117].mxu0  ;;  %v3246_v0 = vmax.f32 %v3210_v1, 0.0 }
 0x247   : >> { %v3209_v33 = vadd.f32 %v8528_v12, %v3165_v30  ;;  %v2994_v26 = vadd.f32 %v2993_v49, %v8406_v8  ;;  %v8546_v47 = vpop.f32.mrb[144].mxu1  ;;  %v6680_v9 = vpop.f32.mrb[118].mxu0  ;;  %v3244_v24 = vmax.f32 %v3208_v34, 0.0 }
 0x248   : >> { %v3247_v42 = vmax.f32 %v3211_v5, 0.0  ;;  %v3126_v19 = vadd.f32 %v3002_v4, %v8385_v20  ;;  %v3005_v41 = vadd.f32 %v6680_v9, %v8430_v43  ;;  %v2882_v15 = vpop.f32.mrb[145].mxu1  ;;  %v2996_v44 = vpop.f32.mrb[119].mxu0 }
 0x249   : >> { %v3245_v39 = vmax.f32 %v3209_v33, 0.0  ;;  %v3124_v10 = vadd.f32 %v2994_v26, %v8388_v46  ;;  %v2997_v16 = vadd.f32 %v2996_v44, %v8414_v29  ;;  %v8552_v30 = vpop.f32.mrb[146].mxu1 }
 0x24a   : >> { %v3281_v8 = vpack.c.bf16 %v3247_v42, %v3246_v0  ;;  %v3170_v49 = vmul.f32 %v8521_v57, %v3126_v19  ;;  %v3127_v1 = vadd.f32 %v3005_v41, %v8393_v63  ;;  %v2885_v5 = vpop.f32.mrb[147].mxu1 }
 0x24b   : >> { %v3280_v28 = vpack.c.bf16 %v3245_v39, %v3244_v24  ;;  %v3168_v20 = vmul.f32 %v8521_v57, %v3124_v10  ;;  %v3125_v43 = vadd.f32 %v2997_v16, %v8396_v35 }
 0x24c   : >> { %3299 = vst [vmem:[#allocation2 + $0x38] sm:$0xff] %v3281_v8  ;;  %v3214_v34 = vadd.f32 %v8528_v12, %v3170_v49  ;;  %v3171_v46 = vmul.f32 %v8521_v57, %v3127_v1 }
 0x24d   : >> { %3298 = vst [vmem:[#allocation2 + $0x20] sm:$0xff] %v3280_v28  ;;  %v3212_v29 = vadd.f32 %v8528_v12, %v3168_v20  ;;  %v3169_v4 = vmul.f32 %v8521_v57, %v3125_v43  ;;  %v6683_v33 = vpop.f32.mrb[120].mxu0 }
 0x24e   : >> { %v3215_v26 = vadd.f32 %v8528_v12, %v3171_v46  ;;  %v3018_v63 = vadd.f32 %v6683_v33, %v8454_v50  ;;  %v3009_v9 = vpop.f32.mrb[121].mxu0  ;;  %v3250_v41 = vmax.f32 %v3214_v34, 0.0 }
 0x24f   : >> { %v3213_v0 = vadd.f32 %v8528_v12, %v3169_v4  ;;  %v3010_v35 = vadd.f32 %v3009_v9, %v8438_v23  ;;  %v8566_v42 = vpop.f32.mrb[148].mxu1  ;;  %v6684_v19 = vpop.f32.mrb[122].mxu0  ;;  %v3248_v10 = vmax.f32 %v3212_v29, 0.0 }
 0x250   : >> { %v3251_v15 = vmax.f32 %v3215_v26, 0.0  ;;  %v3130_v28 = vadd.f32 %v3018_v63, %v8401_v14  ;;  %v3021_v44 = vadd.f32 %v6684_v19, %v8462_v58  ;;  %v2890_v24 = vpop.f32.mrb[149].mxu1  ;;  %v3012_v39 = vpop.f32.mrb[123].mxu0 }
 0x251   : >> { %v3249_v16 = vmax.f32 %v3213_v0, 0.0  ;;  %v3128_v50 = vadd.f32 %v3010_v35, %v8404_v18  ;;  %v3013_v8 = vadd.f32 %v3012_v39, %v8446_v54  ;;  %v8572_v49 = vpop.f32.mrb[150].mxu1 }
 0x252   : >> { %v3283_v23 = vpack.c.bf16 %v3251_v15, %v3250_v41  ;;  %v3174_v1 = vmul.f32 %v8521_v57, %v3130_v28  ;;  %v3131_v5 = vadd.f32 %v3021_v44, %v8409_v21  ;;  %v2893_v20 = vpop.f32.mrb[151].mxu1 }
 0x253   : >> { %v3282_v43 = vpack.c.bf16 %v3249_v16, %v3248_v10  ;;  %v3172_v14 = vmul.f32 %v8521_v57, %v3128_v50  ;;  %v3129_v58 = vadd.f32 %v3013_v8, %v8412_v60 }
 0x254   : >> { %3301 = vst [vmem:[#allocation2 + $0x68] sm:$0xff] %v3283_v23  ;;  %v3218_v34 = vadd.f32 %v8528_v12, %v3174_v1  ;;  %v3175_v18 = vmul.f32 %v8521_v57, %v3131_v5 }
 0x255   : >> { %3300 = vst [vmem:[#allocation2 + $0x50] sm:$0xff] %v3282_v43  ;;  %v3216_v54 = vadd.f32 %v8528_v12, %v3172_v14  ;;  %v3173_v46 = vmul.f32 %v8521_v57, %v3129_v58  ;;  %v6687_v29 = vpop.f32.mrb[124].mxu0 }
 0x256   : >> { %v3219_v4 = vadd.f32 %v8528_v12, %v3175_v18  ;;  %v3034_v21 = vadd.f32 %v6687_v29, %v8486_v62  ;;  %v3025_v33 = vpop.f32.mrb[125].mxu0  ;;  %v3254_v0 = vmax.f32 %v3218_v34, 0.0 }
 0x257   : >> { %v3217_v26 = vadd.f32 %v8528_v12, %v3173_v46  ;;  %v3026_v60 = vadd.f32 %v3025_v33, %v8470_v32  ;;  %v8586_v63 = vpop.f32.mrb[152].mxu1  ;;  %v6688_v9 = vpop.f32.mrb[126].mxu0  ;;  %v3252_v44 = vmax.f32 %v3216_v54, 0.0 }
 0x258   : >> { %v3255_v35 = vmax.f32 %v3219_v4, 0.0  ;;  %v3134_v19 = vadd.f32 %v3034_v21, %v8417_v6  ;;  %v3037_v41 = vadd.f32 %v6688_v9, %v8494_v2  ;;  %v2898_v15 = vpop.f32.mrb[153].mxu1  ;;  %v3028_v28 = vpop.f32.mrb[127].mxu0 }
 0x259   : >> { %v3253_v24 = vmax.f32 %v3217_v26, 0.0  ;;  %v3132_v62 = vadd.f32 %v3026_v60, %v8420_v31  ;;  %v3029_v39 = vadd.f32 %v3028_v28, %v8478_v27  ;;  %v8592_v10 = vpop.f32.mrb[154].mxu1 }
 0x25a   : >> { %v3285_v32 = vpack.c.bf16 %v3255_v35, %v3254_v0  ;;  %v3178_v16 = vmul.f32 %v8521_v57, %v3134_v19  ;;  %v3135_v50 = vadd.f32 %v3037_v41, %v8425_v7  ;;  %v2901_v8 = vpop.f32.mrb[155].mxu1 }
 0x25b   : >> { %v3284_v23 = vpack.c.bf16 %v3253_v24, %v3252_v44  ;;  %v3176_v6 = vmul.f32 %v8521_v57, %v3132_v62  ;;  %v3133_v2 = vadd.f32 %v3029_v39, %v8428_v36 }
 0x25c   : >> { %3303 = vst [vmem:[#allocation2 + $0x98] sm:$0xff] %v3285_v32  ;;  %v3222_v1 = vadd.f32 %v8528_v12, %v3178_v16  ;;  %v3179_v31 = vmul.f32 %v8521_v57, %v3135_v50 }
 0x25d   : >> { %3302 = vst [vmem:[#allocation2 + $0x80] sm:$0xff] %v3284_v23  ;;  %v3220_v27 = vadd.f32 %v8528_v12, %v3176_v6  ;;  %v3177_v5 = vmul.f32 %v8521_v57, %v3133_v2  ;;  %v6691_v20 = vpop.f32.mrb[128].mxu0 }
 0x25e   : >> { %v3223_v43 = vadd.f32 %v8528_v12, %v3179_v31  ;;  %v3050_v7 = vadd.f32 %v6691_v20, %v8524_v59  ;;  %v3041_v14 = vpop.f32.mrb[129].mxu0  ;;  %v3258_v54 = vmax.f32 %v3222_v1, 0.0 }
 0x25f   : >> { %v3221_v58 = vadd.f32 %v8528_v12, %v3177_v5  ;;  %v3042_v36 = vadd.f32 %v3041_v14, %v8502_v3  ;;  %v2904_v34 = vpop.f32.mrb[156].mxu1  ;;  %v6692_v18 = vpop.f32.mrb[130].mxu0  ;;  %v3256_v26 = vmax.f32 %v3220_v27, 0.0 }
 0x260   : >> { %v3259_v46 = vmax.f32 %v3223_v43, 0.0  ;;  %v3138_v29 = vadd.f32 %v3050_v7, %v8433_v61  ;;  %v3053_v4 = vadd.f32 %v6692_v18, %v8532_v45  ;;  %v2906_v21 = vpop.f32.mrb[157].mxu1  ;;  %v3044_v33 = vpop.f32.mrb[131].mxu0 }
 0x261   : >> { %v3257_v60 = vmax.f32 %v3221_v58, 0.0  ;;  %v3136_v9 = vadd.f32 %v3042_v36, %v8436_v56  ;;  %v3045_v59 = vadd.f32 %v3044_v33, %v8510_v38  ;;  %v2907_v0 = vpop.f32.mrb[158].mxu1 }
 0x262   : >> { %v3287_v35 = vpack.c.bf16 %v3259_v46, %v3258_v54  ;;  %v3182_v3 = vmul.f32 %v8521_v57, %v3138_v29  ;;  %v3139_v19 = vadd.f32 %v3053_v4, %v8441_v25  ;;  %v2909_v41 = vpop.f32.mrb[159].mxu1 }
 0x263   : >> { %v3286_v15 = vpack.c.bf16 %v3257_v60, %v3256_v26  ;;  %v3180_v61 = vmul.f32 %v8521_v57, %v3136_v9  ;;  %v3137_v45 = vadd.f32 %v3045_v59, %v8444_v55 }
 0x264   : >> { %3305 = vst [vmem:[#allocation2 + $0xc8] sm:$0xff] %v3287_v35  ;;  %v3226_v28 = vadd.f32 %v8528_v12, %v3182_v3  ;;  %v3183_v44 = vmul.f32 %v8521_v57, %v3139_v19 }
 0x265   : >> { %3304 = vst [vmem:[#allocation2 + $0xb0] sm:$0xff] %v3286_v15  ;;  %v3224_v56 = vadd.f32 %v8528_v12, %v3180_v61  ;;  %v3181_v38 = vmul.f32 %v8521_v57, %v3137_v45  ;;  %v6695_v24 = vpop.f32.mrb[132].mxu0 }
 0x266   : >> { %v3227_v62 = vadd.f32 %v8528_v12, %v3183_v44  ;;  %v3066_v25 = vadd.f32 %v6695_v24, %v8566_v42  ;;  %v3057_v39 = vpop.f32.mrb[133].mxu0  ;;  %v3262_v8 = vmax.f32 %v3226_v28, 0.0 }
 0x267   : >> { %v3225_v32 = vadd.f32 %v8528_v12, %v3181_v38  ;;  %v3058_v55 = vadd.f32 %v3057_v39, %v8546_v47  ;;  %v8622_v16 = vpop.f32.mrb[160].mxu1  ;;  %v6696_v50 = vpop.f32.mrb[134].mxu0  ;;  %v3260_v27 = vmax.f32 %v3224_v56, 0.0 }
 0x268   : >> { %v3263_v23 = vmax.f32 %v3227_v62, 0.0  ;;  %v3142_v6 = vadd.f32 %v3066_v25, %v8449_v51  ;;  %v3069_v2 = vadd.f32 %v6696_v50, %v8572_v49  ;;  %v2914_v1 = vpop.f32.mrb[161].mxu1  ;;  %v3060_v31 = vpop.f32.mrb[135].mxu0 }
 0x269   : >> { %v3261_v5 = vmax.f32 %v3225_v32, 0.0  ;;  %v3140_v42 = vadd.f32 %v3058_v55, %v8452_v48  ;;  %v3061_v20 = vadd.f32 %v3060_v31, %v8552_v30  ;;  %v8628_v43 = vpop.f32.mrb[162].mxu1 }
 0x26a   : >> { %v3289_v47 = vpack.c.bf16 %v3263_v23, %v3262_v8  ;;  %v3186_v7 = vmul.f32 %v8521_v57, %v3142_v6  ;;  %v3143_v14 = vadd.f32 %v3069_v2, %v8457_v37  ;;  %v2917_v58 = vpop.f32.mrb[163].mxu1 }
 0x26b   : >> { %v3288_v36 = vpack.c.bf16 %v3261_v5, %v3260_v27  ;;  %v3184_v51 = vmul.f32 %v8521_v57, %v3140_v42  ;;  %v3141_v49 = vadd.f32 %v3061_v20, %v8460_v40 }
 0x26c   : >> { %3307 = vst [vmem:[#allocation2 + $0xf8] sm:$0xff] %v3289_v47  ;;  %v3230_v18 = vadd.f32 %v8528_v12, %v3186_v7  ;;  %v3187_v48 = vmul.f32 %v8521_v57, %v3143_v14 }
 0x26d   : >> { %3306 = vst [vmem:[#allocation2 + $0xe0] sm:$0xff] %v3288_v36  ;;  %v3228_v30 = vadd.f32 %v8528_v12, %v3184_v51  ;;  %v3185_v54 = vmul.f32 %v8521_v57, %v3141_v49  ;;  %v6699_v46 = vpop.f32.mrb[136].mxu0 }
 0x26e   : >> { %v3231_v29 = vadd.f32 %v8528_v12, %v3187_v48  ;;  %v3082_v37 = vadd.f32 %v6699_v46, %v2904_v34  ;;  %v3073_v4 = vpop.f32.mrb[137].mxu0  ;;  %v3266_v60 = vmax.f32 %v3230_v18, 0.0 }
 0x26f   : >> { %v3229_v21 = vadd.f32 %v8528_v12, %v3185_v54  ;;  %v3074_v33 = vadd.f32 %v3073_v4, %v8586_v63  ;;  %v2920_v40 = vpop.f32.mrb[164].mxu1  ;;  %v6700_v26 = vpop.f32.mrb[138].mxu0  ;;  %v3264_v41 = vmax.f32 %v3228_v30, 0.0 }
 0x270   : >> { %v3267_v9 = vmax.f32 %v3231_v29, 0.0  ;;  %v3146_v59 = vadd.f32 %v3082_v37, %v8465_v13  ;;  %v3085_v35 = vadd.f32 %v6700_v26, %v2907_v0  ;;  %v2922_v3 = vpop.f32.mrb[165].mxu1  ;;  %v3076_v19 = vpop.f32.mrb[139].mxu0 }
 0x271   : >> { %v3265_v15 = vmax.f32 %v3229_v21, 0.0  ;;  %v3144_v61 = vadd.f32 %v3074_v33, %v8468_v53  ;;  %v3077_v34 = vadd.f32 %v3076_v19, %v8592_v10  ;;  %v2923_v45 = vpop.f32.mrb[166].mxu1 }
 0x272   : >> { %v3291_v28 = vpack.c.bf16 %v3267_v9, %v3266_v60  ;;  %v3190_v44 = vmul.f32 %v8521_v57, %v3146_v59  ;;  %v3147_v63 = vadd.f32 %v3085_v35, %v8473_v52  ;;  %v2925_v56 = vpop.f32.mrb[167].mxu1 }
 0x273   : >> { %v3290_v38 = vpack.c.bf16 %v3265_v15, %v3264_v41  ;;  %v3188_v24 = vmul.f32 %v8521_v57, %v3144_v61  ;;  %v3145_v13 = vadd.f32 %v3077_v34, %v8476_v11  ;;  %v10030_v41 = vld [vmem:[#allocation15_spill] sm:$0xff] }
 0x274   : >> { %3309 = vst [vmem:[#allocation2 + $0x128] sm:$0xff] %v3291_v28  ;;  %v3234_v0 = vadd.f32 %v8528_v12, %v3190_v44  ;;  %v3191_v62 = vmul.f32 %v8521_v57, %v3147_v63  ;;  %v10031_v28 = vld [vmem:[#allocation10_spill] sm:$0xff] }
 0x275   : >> { %3308 = vst [vmem:[#allocation2 + $0x110] sm:$0xff] %v3290_v38  ;;  %v3232_v53 = vadd.f32 %v8528_v12, %v3188_v24  ;;  %v3189_v10 = vmul.f32 %v8521_v57, %v3145_v13  ;;  %v6703_v25 = vpop.f32.mrb[140].mxu0  ;;  %v10032_v13 = vld [vmem:[#allocation14_spill] sm:$0xff] }
 0x276   : >> { %v3235_v39 = vadd.f32 %v8528_v12, %v3191_v62  ;;  %v3098_v52 = vadd.f32 %v6703_v25, %v2920_v40  ;;  %v3089_v32 = vpop.f32.mrb[141].mxu0  ;;  %v3270_v23 = vmax.f32 %v3234_v0, 0.0 }
 0x277   : >> { %v3233_v55 = vadd.f32 %v8528_v12, %v3189_v10  ;;  %v3090_v50 = vadd.f32 %v3089_v32, %v8622_v16  ;;  %v2928_v11 = vpop.f32.mrb[168].mxu1  ;;  %v6704_v8 = vpop.f32.mrb[142].mxu0  ;;  %v3268_v5 = vmax.f32 %v3232_v53, 0.0  ;;  %v10028_v16 = vld [vmem:[#allocation9_spill] sm:$0xff]  ;;  %v10033_v53 = vld [vmem:[#allocation6_spill] sm:$0xff] }
 0x278   : >> { %v3271_v6 = vmax.f32 %v3235_v39, 0.0  ;;  %v3150_v2 = vadd.f32 %v3098_v52, %v8481_v22  ;;  %v3101_v1 = vadd.f32 %v6704_v8, %v2923_v45  ;;  %v2930_v31 = vpop.f32.mrb[169].mxu1  ;;  %v3092_v27 = vpop.f32.mrb[143].mxu0  ;;  %v10029_v22 = vld [vmem:[#allocation13_spill] sm:$0xff] }
 0x279   : >> { %v3269_v42 = vmax.f32 %v3233_v55, 0.0  ;;  %v3148_v20 = vadd.f32 %v3090_v50, %v8484_v17  ;;  %v3093_v47 = vadd.f32 %v3092_v27, %v8628_v43  ;;  %v2931_v7 = vpop.f32.mrb[170].mxu1  ;;  %v7192_v31 = vmov (!%p6222_p7), 0  }
 0x27a   : >> { %v3293_v14 = vpack.c.bf16 %v3271_v6, %v3270_v23  ;;  %v3194_v58 = vmul.f32 %v8521_v57, %v3150_v2  ;;  %v3151_v36 = vadd.f32 %v3101_v1, %v10028_v16  ;;  %v2933_v51 = vpop.f32.mrb[171].mxu1  ;;  %3320 = vst [vmem:[#allocation2 + $0x18] sm:$0xff] (!%p6222_p7), %v7192_v31  ;;  %3321 = vst [vmem:[#allocation2 + $0x20] sm:$0xff] (!%p6222_p7), %v7192_v31 }
 0x27b   : >> { %v3292_v49 = vpack.c.bf16 %v3269_v42, %v3268_v5  ;;  %v3192_v18 = vmul.f32 %v8521_v57, %v3148_v20  ;;  %v3149_v48 = vadd.f32 %v3093_v47, %v10029_v22  ;;  %3322 = vst [vmem:[#allocation2 + $0x28] sm:$0xff] (!%p6222_p7), %v7192_v31  ;;  %3323 = vst [vmem:[#allocation2 + $0x30] sm:$0xff] (!%p6222_p7), %v7192_v31 }
 0x27c   : >> { %3311 = vst [vmem:[#allocation2 + $0x158] sm:$0xff] %v3293_v14  ;;  %v3238_v30 = vadd.f32 %v8528_v12, %v3194_v58  ;;  %v3195_v54 = vmul.f32 %v8521_v57, %v3151_v36  ;;  %3324 = vst [vmem:[#allocation2 + $0x38] sm:$0xff] (!%p6222_p7), %v7192_v31 }
 0x27d   : >> { %3310 = vst [vmem:[#allocation2 + $0x140] sm:$0xff] %v3292_v49  ;;  %v3236_v17 = vadd.f32 %v8528_v12, %v3192_v18  ;;  %v3193_v43 = vmul.f32 %v8521_v57, %v3149_v48  ;;  %v6707_v46 = vpop.f32.mrb[144].mxu0  ;;  %3325 = vst [vmem:[#allocation2 + $0x40] sm:$0xff] (!%p6222_p7), %v7192_v31 }
 0x27e   : >> { %v3239_v29 = vadd.f32 %v8528_v12, %v3195_v54  ;;  %v3105_v37 = vpop.f32.mrb[145].mxu0  ;;  %v3274_v26 = vmax.f32 %v3238_v30, 0.0  ;;  %3326 = vst [vmem:[#allocation2 + $0x48] sm:$0xff] (!%p6222_p7), %v7192_v31  ;;  %3327 = vst [vmem:[#allocation2 + $0x50] sm:$0xff] (!%p6222_p7), %v7192_v31 }
 0x27f   : >> { %v3237_v4 = vadd.f32 %v8528_v12, %v3193_v43  ;;  %v3106_v21 = vadd.f32 %v3105_v37, %v2928_v11  ;;  %v2936_v33 = vpop.f32.mrb[172].mxu1  ;;  %v6708_v40 = vpop.f32.mrb[146].mxu0  ;;  %v3272_v3 = vmax.f32 %v3236_v17, 0.0  ;;  %3328 = vst [vmem:[#allocation2 + $0x58] sm:$0xff] (!%p6222_p7), %v7192_v31  ;;  %3329 = vst [vmem:[#allocation2 + $0x60] sm:$0xff] (!%p6222_p7), %v7192_v31 }
 0x280   : >> { %v3275_v60 = vmax.f32 %v3239_v29, 0.0  ;;  %v3114_v9 = vadd.f32 %v6707_v46, %v2936_v33  ;;  %v2938_v59 = vpop.f32.mrb[173].mxu1  ;;  %v3108_v35 = vpop.f32.mrb[147].mxu0  ;;  %3330 = vst [vmem:[#allocation2 + $0x68] sm:$0xff] (!%p6222_p7), %v7192_v31  ;;  %3331 = vst [vmem:[#allocation2 + $0x70] sm:$0xff] (!%p6222_p7), %v7192_v31 }
 0x281   : >> { %v3273_v19 = vmax.f32 %v3237_v4, 0.0  ;;  %v3152_v15 = vadd.f32 %v3106_v21, %v10030_v41  ;;  %v3109_v61 = vadd.f32 %v3108_v35, %v2931_v7  ;;  %v2939_v34 = vpop.f32.mrb[174].mxu1  ;;  %3332 = vst [vmem:[#allocation2 + $0x78] sm:$0xff] (!%p6222_p7), %v7192_v31  ;;  %3333 = vst [vmem:[#allocation2 + $0x80] sm:$0xff] (!%p6222_p7), %v7192_v31 }
 0x282   : >> { %v3295_v45 = vpack.c.bf16 %v3275_v60, %v3274_v26  ;;  %v3154_v44 = vadd.f32 %v3114_v9, %v10031_v28  ;;  %v3117_v63 = vadd.f32 %v6708_v40, %v2939_v34  ;;  %v2941_v56 = vpop.f32.mrb[175].mxu1  ;;  %3334 = vst [vmem:[#allocation2 + $0x88] sm:$0xff] (!%p6222_p7), %v7192_v31 }
 0x283   : >> { %v3294_v38 = vpack.c.bf16 %v3273_v19, %v3272_v3  ;;  %v3196_v24 = vmul.f32 %v8521_v57, %v3152_v15  ;;  %v3153_v0 = vadd.f32 %v3109_v61, %v10032_v13 }
 0x284   : >> { %3313 = vst [vmem:[#allocation2 + $0x188] sm:$0xff] %v3295_v45  ;;  %v3198_v62 = vmul.f32 %v8521_v57, %v3154_v44  ;;  %v3155_v10 = vadd.f32 %v3117_v63, %v10033_v53 }
 0x285   : >> { %3312 = vst [vmem:[#allocation2 + $0x170] sm:$0xff] %v3294_v38  ;;  %v3240_v25 = vadd.f32 %v8528_v12, %v3196_v24  ;;  %v3197_v39 = vmul.f32 %v8521_v57, %v3153_v0 }
 0x286   : >> { %v3242_v52 = vadd.f32 %v8528_v12, %v3198_v62  ;;  %v3199_v32 = vmul.f32 %v8521_v57, %v3155_v10 }
 0x287   : >> { %v3241_v55 = vadd.f32 %v8528_v12, %v3197_v39  ;;  %v3276_v11 = vmax.f32 %v3240_v25, 0.0 }
 0x288   : >> { %v3243_v50 = vadd.f32 %v8528_v12, %v3199_v32  ;;  %v3278_v23 = vmax.f32 %v3242_v52, 0.0  ;;  %3319 = sbr.rel (%p6222_p7) target bundleno = 655 (0x28f), region = 51 }
 0x289   : >> { %v3277_v8 = vmax.f32 %v3241_v55, 0.0 }
 0x28a   : >> { %v3279_v6 = vmax.f32 %v3243_v50, 0.0 }
 0x28b   : >> { %v3296_v2 = vpack.c.bf16 %v3277_v8, %v3276_v11 }
 0x28c   : >> { %v3297_v1 = vpack.c.bf16 %v3279_v6, %v3278_v23 }
 0x28d   : >> { %3314 = vst [vmem:[#allocation2 + $0x1a0] sm:$0xff] %v3296_v2 }
 0x28e   : >> { %3315 = vst [vmem:[#allocation2 + $0x1b8] sm:$0xff] %v3297_v1 }
 0x28f PF: >> { %p6223_p8 = scmp.ne.s32.totalorder %s7168_s18, 1 }
 0x290   : >> { %v7193_v12 = vmov (!%p6223_p8), 0  }
 0x291   : >> { %3338 = sbr.rel (%p6223_p8) target bundleno = 665 (0x299), region = 55  ;;  %3340 = vst [vmem:[#allocation2 + $0x150] sm:$0xff] (!%p6223_p8), %v7193_v12  ;;  %3341 = vst [vmem:[#allocation2 + $0x158] sm:$0xff] (!%p6223_p8), %v7193_v12 }
 0x292   : >> { %3342 = vst [vmem:[#allocation2 + $0x160] sm:$0xff] (!%p6223_p8), %v7193_v12  ;;  %3343 = vst [vmem:[#allocation2 + $0x168] sm:$0xff] (!%p6223_p8), %v7193_v12 }
 0x293   : >> { %3344 = vst [vmem:[#allocation2 + $0x170] sm:$0xff] (!%p6223_p8), %v7193_v12  ;;  %3345 = vst [vmem:[#allocation2 + $0x178] sm:$0xff] (!%p6223_p8), %v7193_v12 }
 0x294   : >> { %3346 = vst [vmem:[#allocation2 + $0x180] sm:$0xff] (!%p6223_p8), %v7193_v12  ;;  %3347 = vst [vmem:[#allocation2 + $0x188] sm:$0xff] (!%p6223_p8), %v7193_v12 }
 0x295   : >> { %3348 = vst [vmem:[#allocation2 + $0x190] sm:$0xff] (!%p6223_p8), %v7193_v12  ;;  %3349 = vst [vmem:[#allocation2 + $0x198] sm:$0xff] (!%p6223_p8), %v7193_v12 }
 0x296   : >> { %3350 = vst [vmem:[#allocation2 + $0x1a0] sm:$0xff] (!%p6223_p8), %v7193_v12  ;;  %3351 = vst [vmem:[#allocation2 + $0x1a8] sm:$0xff] (!%p6223_p8), %v7193_v12 }
 0x297   : >> { %3352 = vst [vmem:[#allocation2 + $0x1b0] sm:$0xff] (!%p6223_p8), %v7193_v12  ;;  %3353 = vst [vmem:[#allocation2 + $0x1b8] sm:$0xff] (!%p6223_p8), %v7193_v12 }
 0x298   : >> { %3354 = vst [vmem:[#allocation2 + $0x1c0] sm:$0xff] %v7193_v12 }
 0x299 PF: >> { %s470_s14 = sadd.s32 1, %s7188_s14  }
 0x29a   : >> { %p467_p9 = scmp.ge.s32.totalorder %s470_s14, 4  }
 0x29b   : > { %v10034_v57 = vmov (%p467_p9), 0   ;;  %v7070_v27 = vld [vmem:[%s9863_s4 + $0xc0] sm:$0xff] (%p467_p9)   ;;  %v7072_v42 = vld [vmem:[%s9863_s4 + $0xc8] sm:$0xff] (%p467_p9)   ;;  %v7075_v47 = vld [vmem:[%s9863_s4 + $0x150] sm:$0xff] (%p467_p9)  }
 0x29c   : > { %469 = sbr.rel (!%p467_p9) target bundleno = 47 (0x2f), region = 96  ;;  %4598 = vmatprep.subr.bf16.mxu1 (%p467_p9), %v10034_v57  ;;  %v7071_v5 = vld [vmem:[%s9863_s4 + $0x140] sm:$0xff] (%p467_p9)   ;;  %v7073_v20 = vld [vmem:[%s9863_s4 + $0x148] sm:$0xff] (%p467_p9)   ;;  %v7074_v7 = vld [vmem:[%s9863_s4 + $0xd0] sm:$0xff] (%p467_p9)  }
 0x29d   : > { %4599 = vmatpush1.bf16.msra.mxu1 (%p467_p9), %v7070_v27  ;;  %6709 = vmatprep.subr.bf16.mxu0 (%p467_p9), %v7071_v5  ;;  %v7077_v14 = vld [vmem:[%s9863_s4 + $0x158] sm:$0xff] (%p467_p9)   ;;  %v7079_v16 = vld [vmem:[%s9863_s4 + $0x160] sm:$0xff] (%p467_p9)   ;;  %v3398_v49 = vld [vmem:[#allocation2 + $0x28] sm:$0x1] (%p467_p9) }
 0x29e   : > { %4600 = vmatprep.subr.bf16.mxu1 (%p467_p9), %v10034_v57  ;;  %6710 = vmatpush3.bf16.msra.mxu0 (%p467_p9), %v7071_v5  ;;  %v7076_v58 = vld [vmem:[%s9863_s4 + $0xd8] sm:$0xff] (%p467_p9)   ;;  %v7078_v36 = vld [vmem:[%s9863_s4 + $0xe0] sm:$0xff] (%p467_p9)   ;;  %v7081_v18 = vld [vmem:[%s9863_s4 + $0x168] sm:$0xff] (%p467_p9)   ;;  %v3620_v48 = vrot.slane (%p467_p9), %v3398_v49, 1 }
 0x29f   : > { %6711 = vmatprep.subr.bf16.mxu0 (%p467_p9), %v7073_v20  ;;  %v8720_v51 = vld [vmem:[#allocation2 + $0x20] sm:$0xff] (%p467_p9)  ;;  %v8726_v30 = vld [vmem:[#allocation2 + $0x38] sm:$0xff] (%p467_p9)  ;;  %v7080_v54 = vld [vmem:[%s9863_s4 + $0xe8] sm:$0xff] (%p467_p9)  }
 0x2a0   : > { %v3619_v22 = vrot.slane (%p467_p9), %v8720_v51, 1  ;;  %v3400_v17 = vld [vmem:[#allocation2 + $0x40] sm:$0x1] (%p467_p9)  ;;  %v3622_v43 = vrot.slane (%p467_p9), %v8726_v30, 1  ;;  %v7082_v4 = vld [vmem:[%s9863_s4 + $0xf0] sm:$0xff] (%p467_p9)   ;;  %v8745_v34 = vld [vmem:[#allocation2 + $0x68] sm:$0xff] (%p467_p9) }
 0x2a1   : > { %4601 = vmatpush1.bf16.msra.mxu1 (%p467_p9), %v7072_v42  ;;  %v3623_v37 = vrot.slane (%p467_p9), %v3400_v17, 1  ;;  %v7083_v21 = vld [vmem:[%s9863_s4 + $0x170] sm:$0xff] (%p467_p9)   ;;  %v3402_v9 = vld [vmem:[#allocation2 + $0x58] sm:$0x1] (%p467_p9)  ;;  %v3628_v63 = vrot.slane (%p467_p9), %v8745_v34, 1  ;;  %v8758_v25 = vld [vmem:[#allocation2 + $0x80] sm:$0xff] (%p467_p9) }
 0x2a2   : > { %4602 = vmatprep.subr.bf16.mxu1 (%p467_p9), %v10034_v57  ;;  %6712 = vmatpush3.bf16.msra.mxu0 (%p467_p9), %v7073_v20  ;;  %v3621_v46 = vsel (%p467_p9), %vm731_vm0, %v3619_v22, %v3620_v48  ;;  %v3728_v29 = vshrl.u32 (%p467_p9), %v3619_v22, 16  ;;  %v8741_v60 = vld [vmem:[#allocation2 + $0x50] sm:$0xff] (%p467_p9)  ;;  %v3759_v3 = vshrl.u32 (%p467_p9), %v3622_v43, 16  ;;  %v3626_v61 = vrot.slane (%p467_p9), %v3402_v9, 1  ;;  %v7085_v38 = vld [vmem:[%s9863_s4 + $0x178] sm:$0xff] (%p467_p9)   ;;  %v7086_v11 = vld [vmem:[%s9863_s4 + $0x100] sm:$0xff] (%p467_p9)  }
 0x2a3   : > { %6713 = vmatprep.subr.bf16.mxu0 %v7075_v47  ;;  %v3732_v33 = vshrl.u32 %v3621_v46, 16  ;;  %v3735_v40 = vshll.u32 %v3621_v46, 16  ;;  %v3624_v26 = vsel %vm731_vm0, %v3622_v43, %v3623_v37  ;;  %v3625_v15 = vrot.slane %v8741_v60, 1  ;;  %v3404_v45 = vld [vmem:[#allocation2 + $0x70] sm:$0x1]  ;;  %v7084_v0 = vld [vmem:[%s9863_s4 + $0xf8] sm:$0xff]  }
 0x2a4   : > { %v3730_v59 = vrot.slane %v3728_v29, 7  ;;  %v3763_v19 = vshrl.u32 %v3624_v26, 16  ;;  %v3766_v41 = vshll.u32 %v3624_v26, 16  ;;  %v3629_v56 = vrot.slane %v3404_v45, 1  ;;  %v3406_v32 = vld [vmem:[#allocation2 + $0x88] sm:$0x1] }
 0x2a5   : > { %4603 = vmatpush1.bf16.msra.mxu1 %v7074_v7  ;;  %v3734_v35 = vrot.slane %v3732_v33, 7  ;;  %v3627_v24 = vsel %vm731_vm0, %v3625_v15, %v3626_v61  ;;  %v3790_v13 = vshrl.u32 %v3625_v15, 16  ;;  %v3761_v39 = vrot.slane %v3759_v3, 7  ;;  %v8764_v50 = vld [vmem:[#allocation2 + $0x98] sm:$0xff]  ;;  %v7087_v23 = vld [vmem:[%s9863_s4 + $0x80] sm:$0xff]   ;;  %v8780_v49 = vld [vmem:[#allocation2 + $0xb0] sm:$0xff] }
 0x2a6   : > { %4604 = vmatprep.subr.bf16.mxu1 %v10034_v57  ;;  %6714 = vmatpush3.bf16.msra.mxu0 %v7075_v47  ;;  %v3765_v44 = vrot.slane %v3763_v19, 7  ;;  %v3794_v53 = vshrl.u32 %v3627_v24, 16  ;;  %v3797_v10 = vshll.u32 %v3627_v24, 16  ;;  %v3630_v52 = vsel %vm731_vm0, %v3628_v63, %v3629_v56  ;;  %v3408_v7 = vld [vmem:[#allocation2 + $0xa0] sm:$0x1]  ;;  %v7088_v37 = vld [vmem:[%s9863_s4 + $0x108] sm:$0xff]  }
 0x2a7   : > { %6715 = vmatprep.subr.bf16.mxu0 %v7077_v14  ;;  %v3737_v28 = vor.u32 %v3735_v40, %v3734_v35  ;;  %v3631_v55 = vrot.slane %v8758_v25, 1  ;;  %v3792_v6 = vrot.slane %v3790_v13, 7  ;;  %v3825_v1 = vshrl.u32 %v3630_v52, 16  ;;  %v3410_v46 = vld [vmem:[#allocation2 + $0xb8] sm:$0x1]  ;;  %v8796_v35 = vld [vmem:[#allocation2 + $0xc8] sm:$0xff] }
 0x2a8   : > { %v3768_v8 = vor.u32 %v3766_v41, %v3765_v44  ;;  %v3796_v2 = vrot.slane %v3794_v53, 7  ;;  %v3821_v31 = vshrl.u32 %v3628_v63, 16  ;;  %v3828_v12 = vshll.u32 %v3630_v52, 16  ;;  %v3412_v3 = vld [vmem:[#allocation2 + $0xd0] sm:$0x1] }
 0x2a9   : > { %4605 = vmatpush1.bf16.msra.mxu1 %v7076_v58  ;;  %v8756_v62 = vsel %vm792_vm1, %v3730_v59, %v3737_v28  ;;  %v3632_v27 = vrot.slane %v3406_v32, 1  ;;  %v3634_v5 = vrot.slane %v8764_v50, 1  ;;  %v3827_v20 = vrot.slane %v3825_v1, 7  ;;  %v7089_v19 = vld [vmem:[%s9863_s4 + $0x110] sm:$0xff]   ;;  %v8820_v32 = vld [vmem:[#allocation2 + $0xe0] sm:$0xff] }
 0x2aa   : > { %4606 = vmatprep.subr.bf16.mxu1 %v10034_v57  ;;  %6716 = vmatpush3.bf16.msra.mxu0 %v7077_v14  ;;  %v3799_v42 = vor.u32 %v3797_v10, %v3796_v2  ;;  %v3852_v47 = vshrl.u32 %v3631_v55, 16  ;;  %v7090_v14 = vld [vmem:[%s9863_s4 + $0x88] sm:$0xff]   ;;  %v3823_v17 = vrot.slane %v3821_v31, 7  ;;  %v3637_v29 = vrot.slane %v8780_v49, 1  ;;  %v7093_v15 = vld [vmem:[%s9863_s4 + $0x90] sm:$0xff]   ;;  %v7096_v31 = vld [vmem:[%s9863_s4 + $0x98] sm:$0xff]  }
 0x2ab   : > { %6717 = vmatprep.subr.bf16.mxu0 %v7079_v16  ;;  %6725 = vmatprep.mubr.bf16.mxu0 %v8756_v62  ;;  %v3633_v58 = vsel %vm731_vm0, %v3631_v55, %v3632_v27  ;;  %v3638_v59 = vrot.slane %v3410_v46, 1  ;;  %v3640_v45 = vrot.slane %v8796_v35, 1  ;;  %v3641_v28 = vrot.slane %v3412_v3, 1  ;;  %v7091_v55 = vld [vmem:[%s9863_s4 + $0x118] sm:$0xff]   ;;  %v3414_v2 = vld [vmem:[#allocation2 + $0xe8] sm:$0x1] }
 0x2ac   : > { %v3856_v22 = vshrl.u32 %v3633_v58, 16  ;;  %v3859_v48 = vshll.u32 %v3633_v58, 16  ;;  %v8805_v61 = vshrl.u32 %v3637_v29, 16  ;;  %v3443_v56 = vshll.u32 %v8720_v51, 16 }
 0x2ad   : > { %4607 = vmatpush1.bf16.msra.mxu1 %v7078_v36  ;;  %v8778_v36 = vshrl.u32 %v3634_v5, 16  ;;  %v3639_v63 = vsel %vm731_vm0, %v3637_v29, %v3638_v59  ;;  %v3642_v53 = vsel %vm731_vm0, %v3640_v45, %v3641_v28  ;;  %v8815_v10 = vshrl.u32 %v3640_v45, 16 }
 0x2ae   : > { %4608 = vmatprep.subr.bf16.mxu1 %v10034_v57  ;;  %6718 = vmatpush3.bf16.msra.mxu0 %v7079_v16  ;;  %v3635_v16 = vrot.slane %v3408_v7, 1  ;;  %v3858_v33 = vrot.slane %v3856_v22, 7  ;;  %v3918_v24 = vshrl.u32 %v3639_v63, 16  ;;  %v3921_v13 = vshll.u32 %v3639_v63, 16  ;;  %v3416_v7 = vld [vmem:[#allocation2 + $0x100] sm:$0x1] }
 0x2af   : > { %6719 = vmatprep.subr.bf16.mxu0 %v7081_v18  ;;  %v3885_v26 = vrot.slane %v8778_v36, 7  ;;  %v3446_v52 = vshrl.u32 %v8720_v51, 16  ;;  %v3952_v1 = vshll.u32 %v3642_v53, 16  ;;  %v3947_v58 = vrot.slane %v8815_v10, 7  ;;  %v8865_v63 = vld [vmem:[#allocation2 + $0x110] sm:$0xff] }
 0x2b0   : > { %v3636_v43 = vsel %vm731_vm0, %v3634_v5, %v3635_v16  ;;  %v3861_v41 = vor.u32 %v3859_v48, %v3858_v33  ;;  %v7092_v48 = vld [vmem:[%s9863_s4 + $0x120] sm:$0xff]   ;;  %v3644_v29 = vrot.slane %v3414_v2, 1  ;;  %v3420_v2 = vld [vmem:[#allocation2 + $0x130] sm:$0x1] }
 0x2b1   : > { %4609 = vmatpush1.bf16.msra.mxu1 %v7080_v54  ;;  %v8786_v54 = vsel %vm792_vm1, %v3792_v6, %v3799_v42  ;;  %v3887_v40 = vshrl.u32 %v3636_v43, 16  ;;  %v3890_v9 = vshll.u32 %v3636_v43, 16  ;;  %v3949_v6 = vshrl.u32 %v3642_v53, 16 }
 0x2b2   : > { %4610 = vmatprep.subr.bf16.mxu1 %v10034_v57  ;;  %6720 = vmatpush3.bf16.msra.mxu0 %v7081_v18  ;;  %v8783_v18 = vsel %vm792_vm1, %v3761_v39, %v3768_v8  ;;  %10036 = vst [vmem:[#allocation21_spill] sm:$0xff] %v8786_v54  ;;  %v3445_v39 = vrot.slane %v3443_v56, 1  ;;  %v3916_v8 = vrot.slane %v8805_v61, 7  ;;  %v3712_v46 = vrot.slane %v3446_v52, 7 }
 0x2b3   : > { %6721 = vmatprep.subr.bf16.mxu0 %v7083_v21  ;;  %10035 = vst [vmem:[#allocation20_spill] sm:$0xff] %v8783_v18  ;;  %v3889_v44 = vrot.slane %v3887_v40, 7  ;;  %v3647_v40 = vrot.slane %v3416_v7, 1 }
 0x2b4   : > { %v3716_v27 = vshrl.u32 %v3445_v39, 16 }
 0x2b5   : > { %4611 = vmatpush1.bf16.msra.mxu1 %v7082_v4  ;;  %v3830_v4 = vor.u32 %v3828_v12, %v3827_v20  ;;  %v3448_v12 = vor.u32 %v3446_v52, %v3445_v39  ;;  %v3892_v42 = vor.u32 %v3890_v9, %v3889_v44  ;;  %v3643_v20 = vrot.slane %v8820_v32, 1  ;;  %v3359_v39 = vld [vmem:[#allocation2 + $0x30] sm:$0x80]  ;;  %v7100_v52 = vld [vmem:[%s9863_s4 + $0xa8] sm:$0xff]  }
 0x2b6   : > { %4612 = vmatprep.subr.bf16.mxu1 %v10034_v57  ;;  %6722 = vmatpush3.bf16.msra.mxu0 %v7083_v21  ;;  %v3854_v21 = vrot.slane %v3852_v47, 7  ;;  %v8833_v47 = vld [vmem:[#allocation2 + $0xf8] sm:$0xff]  ;;  %v3718_v43 = vrot.slane %v3716_v27, 7  ;;  %v3453_v44 = vshrl.u32 %v8726_v30, 16  ;;  %v3649_v27 = vrot.slane %v8865_v63, 1 }
 0x2b7   : > { %6723 = vmatprep.subr.bf16.mxu0 %v7085_v38  ;;  %v3720_v16 = vshrl.u32 %v3448_v12, 16  ;;  %v3723_v22 = vshll.u32 %v3448_v12, 16  ;;  %v3646_v33 = vrot.slane %v8833_v47, 1  ;;  %v8851_v9 = vsel %vm792_vm1, %v3885_v26, %v3892_v42 }
 0x2b8   : > { %10039 = vst [vmem:[#allocation24_spill] sm:$0xff] %v8851_v9  ;;  %v3645_v59 = vsel %vm731_vm0, %v3643_v20, %v3644_v29  ;;  %v3976_v3 = vshrl.u32 %v3643_v20, 16  ;;  %v3740_v7 = vshrl.u32 %v3359_v39, 16  ;;  %v3361_v39 = vld [vmem:[#allocation2 + $0x48] sm:$0x80] }
 0x2b9   : > { %4613 = vmatpush1.bf16.msra.mxu1 %v7084_v0  ;;  %v3357_v0 = vld [vmem:[#allocation2 + $0x18] sm:$0x80]  ;;  %v3980_v61 = vshrl.u32 %v3645_v59, 16  ;;  %v3983_v45 = vshll.u32 %v3645_v59, 16  ;;  %v3648_v28 = vsel %vm731_vm0, %v3646_v33, %v3647_v40  ;;  %v8860_v36 = vshrl.u32 %v3646_v33, 16 }
 0x2ba   : > { %4614 = vmatprep.subr.bf16.mxu1 %v10034_v57  ;;  %6724 = vmatpush3.bf16.msra.mxu0 %v7085_v38  ;;  %v8811_v38 = vsel %vm792_vm1, %v3823_v17, %v3830_v4  ;;  %v3709_v5 = vshrl.u32 %v3357_v0, 16  ;;  %v3951_v17 = vrot.slane %v3949_v6, 7  ;;  %v3722_v4 = vrot.slane %v3720_v16, 7  ;;  %v8877_v6 = vld [vmem:[#allocation2 + $0x128] sm:$0xff] }
 0x2bb   : > { %6761 = vmatprep.subr.bf16.mxu0 %v7087_v23  ;;  %10037 = vst [vmem:[#allocation22_spill] sm:$0xff] %v8811_v38  ;;  %v3982_v53 = vrot.slane %v3980_v61, 7  ;;  %v4011_v10 = vshrl.u32 %v3648_v28, 16  ;;  %v4009_v42 = vrot.slane %v8860_v36, 7  ;;  %v3653_v33 = vrot.slane %v3420_v2, 1  ;;  %v7097_v61 = vld [vmem:[%s9863_s4 + $0x138] sm:$0xff]  }
 0x2bc   : > { %v4038_v59 = vshrl.u32 %v3649_v27, 16  ;;  %v3422_v2 = vld [vmem:[#allocation2 + $0x148] sm:$0x1] }
 0x2bd   : > { %4615 = vmatpush1.bf16.msra.mxu1 %v7086_v11  ;;  %6726 = vmatmul.mubr.bf16.vlgmr.msra.gmra.mrb[0].mxu0 %v8783_v18  ;;  %v8826_v11 = vsel %vm792_vm1, %v3854_v21, %v3861_v41  ;;  %v8845_v21 = vrot.slane %v3709_v5, 7  ;;  %v3985_v5 = vor.u32 %v3983_v45, %v3982_v53 }
 0x2be   : > { %4616 = vmatprep.subr.bf16.mxu1 %v10034_v57  ;;  %6762 = vmatpush3.bf16.msra.mxu0 %v7087_v23  ;;  %10038 = vst [vmem:[#allocation23_spill] sm:$0xff] %v8826_v11  ;;  %v3920_v23 = vrot.slane %v3918_v24, 7  ;;  %v7094_v24 = vld [vmem:[%s9863_s4 + $0x128] sm:$0xff]  }
 0x2bf   : > { %6729 = vmatprep.mubr.bf16.mxu0 %v8786_v54  ;;  %6763 = vmatprep.subr.bf16.mxu0 %v7090_v14 }
 0x2c1   : > { %4617 = vmatpush1.bf16.msra.mxu1 %v7088_v37  ;;  %v7098_v37 = vld [vmem:[%s9863_s4 + $0xa0] sm:$0xff]  }
 0x2c2   : > { %4618 = vmatprep.subr.bf16.mxu1 %v10034_v57  ;;  %6764 = vmatpush3.bf16.msra.mxu0 %v7090_v14  ;;  %v3923_v14 = vor.u32 %v3921_v13, %v3920_v23  ;;  %v3954_v13 = vor.u32 %v3952_v1, %v3951_v17  ;;  %v3418_v23 = vld [vmem:[#allocation2 + $0x118] sm:$0x1]  ;;  %v4013_v1 = vrot.slane %v4011_v10, 7 }
 0x2c3   : > { %6765 = vmatprep.subr.bf16.mxu0 %v7093_v15  ;;  %v3650_v17 = vrot.slane %v3418_v23, 1 }
 0x2c4   : > { %v8857_v41 = vsel %vm792_vm1, %v3916_v8, %v3923_v14  ;;  %v7102_v14 = vld [vmem:[%s9863_s4 + $0xb0] sm:$0xff]   ;;  %v8888_v16 = vsel %vm792_vm1, %v3947_v58, %v3954_v13 }
 0x2c5   : > { %4619 = vmatpush1.bf16.msra.mxu1 %v7089_v19  ;;  %6730 = vmatmul.mubr.bf16.gmra.mrb[4].mxu0 %v8811_v38  ;;  %v3450_v19 = vshll.u32 %v8726_v30, 16  ;;  %10040 = vst [vmem:[#allocation25_spill] sm:$0xff] %v8857_v41  ;;  %10042 = vst [vmem:[#allocation27_spill] sm:$0xff] %v8888_v16  ;;  %v3651_v51 = vsel %vm731_vm0, %v3649_v27, %v3650_v17  ;;  %v7099_v30 = vld [vmem:[%s9863_s4] sm:$0xff]  }
 0x2c6   : > { %4620 = vmatprep.subr.bf16.mxu1 %v10034_v57  ;;  %6733 = vmatprep.mubr.bf16.mxu0 %v8826_v11 }
 0x2c7   : > { %6766 = vmatpush3.bf16.msra.mxu0 %v7093_v15  ;;  %v3725_v15 = vor.u32 %v3723_v22, %v3722_v4  ;;  %v3452_v26 = vrot.slane %v3450_v19, 1  ;;  %v3713_v22 = vor.u32 %v3712_v46, %v3443_v56  ;;  %v3652_v4 = vrot.slane %v8877_v6, 1 }
 0x2c8   : > { %6767 = vmatprep.subr.bf16.mxu0 %v7096_v31  ;;  %v3457_v56 = vshll.u32 %v8741_v60, 16 }
 0x2c9   : > { %4621 = vmatpush1.bf16.msra.mxu1 %v7091_v55  ;;  %v8871_v0 = vsel %vm792_vm1, %v3718_v43, %v3725_v15  ;;  %v3978_v55 = vrot.slane %v3976_v3, 7  ;;  %v3455_v8 = vor.u32 %v3453_v44, %v3452_v26  ;;  %v3747_v12 = vshrl.u32 %v3452_v26, 16  ;;  %v7095_v43 = vld [vmem:[%s9863_s4 + $0x130] sm:$0xff]  }
 0x2ca   : > { %4622 = vmatprep.subr.bf16.mxu1 %v10034_v57  ;;  %10041 = vst [vmem:[#allocation26_spill] sm:$0xff] %v8871_v0  ;;  %4630 = vmatprep.mubr.bf16.mxu1 %v8871_v0  ;;  %v4042_v3 = vshrl.u32 %v3651_v51, 16  ;;  %v4045_v15 = vshll.u32 %v3651_v51, 16  ;;  %v3459_v36 = vrot.slane %v3457_v56, 1  ;;  %v3460_v26 = vshrl.u32 %v8741_v60, 16 }
 0x2cb   : > { %6768 = vmatpush3.bf16.msra.mxu0 %v7096_v31  ;;  %v4014_v31 = vshll.u32 %v3648_v28, 16  ;;  %v3751_v20 = vshrl.u32 %v3455_v8, 16  ;;  %v3749_v40 = vrot.slane %v3747_v12, 7  ;;  %v8900_v46 = vsel %vm792_vm1, %v3978_v55, %v3985_v5 }
 0x2cc   : > { %6769 = vmatprep.subr.bf16.mxu0 %v7098_v37  ;;  %10043 = vst [vmem:[#allocation28_spill] sm:$0xff] %v8900_v46  ;;  %v3654_v28 = vsel %vm731_vm0, %v3652_v4, %v3653_v33  ;;  %v4044_v13 = vrot.slane %v4042_v3, 7  ;;  %v8915_v53 = vshrl.u32 %v3652_v4, 16  ;;  %v3462_v23 = vor.u32 %v3460_v26, %v3459_v36 }
 0x2cd   : > { %4623 = vmatpush1.bf16.msra.mxu1 %v7092_v48  ;;  %6734 = vmatmul.mubr.bf16.gmra.mrb[8].mxu0 %v8851_v9  ;;  %v3754_v48 = vshll.u32 %v3455_v8, 16  ;;  %v3753_v29 = vrot.slane %v3751_v20, 7  ;;  %v4016_v58 = vor.u32 %v4014_v31, %v4013_v1  ;;  %v4073_v10 = vshrl.u32 %v3654_v28, 16  ;;  %v3424_v1 = vld [vmem:[#allocation2 + $0x160] sm:$0x1]  ;;  %v8929_v20 = vld [vmem:[#allocation2 + $0x158] sm:$0xff] }
 0x2ce   : > { %4624 = vmatprep.subr.bf16.mxu1 %v10034_v57  ;;  %6737 = vmatprep.mubr.bf16.mxu0 %v8857_v41  ;;  %v3742_v8 = vrot.slane %v3740_v7, 7  ;;  %v4040_v31 = vrot.slane %v4038_v59, 7  ;;  %v4047_v12 = vor.u32 %v4045_v15, %v4044_v13  ;;  %v3778_v27 = vshrl.u32 %v3459_v36, 16 }
 0x2cf   : > { %6770 = vmatpush3.bf16.msra.mxu0 %v7098_v37  ;;  %v3743_v37 = vrot.slane %v3453_v44, 7  ;;  %v3756_v45 = vor.u32 %v3754_v48, %v3753_v29  ;;  %v8909_v44 = vld [vmem:[#allocation2 + $0x140] sm:$0xff]  ;;  %v8923_v55 = vsel %vm792_vm1, %v4009_v42, %v4016_v58  ;;  %v4075_v7 = vrot.slane %v4073_v10, 7  ;;  %v8955_v10 = vld [vmem:[#allocation2 + $0x170] sm:$0xff] }
 0x2d0   : > { %6771 = vmatprep.subr.bf16.mxu0 %v7100_v52  ;;  %10045 = vst [vmem:[#allocation30_spill] sm:$0xff] %v8923_v55  ;;  %v3655_v5 = vrot.slane %v8909_v44, 1  ;;  %v4071_v48 = vrot.slane %v8915_v53, 7  ;;  %v3785_v17 = vshll.u32 %v3462_v23, 16  ;;  %v3656_v29 = vrot.slane %v3422_v2, 1 }
 0x2d1   : > { %4625 = vmatpush1.bf16.msra.mxu1 %v7094_v24  ;;  %v8913_v24 = vsel %vm792_vm1, %v8845_v21, %v3713_v22  ;;  %v3744_v21 = vor.u32 %v3743_v37, %v3450_v19  ;;  %v8932_v42 = vsel %vm792_vm1, %v3749_v40, %v3756_v45  ;;  %v4076_v22 = vshll.u32 %v3654_v28, 16 }
 0x2d2   : > { %4626 = vmatprep.subr.bf16.mxu1 %v10034_v57  ;;  %10044 = vst [vmem:[#allocation29_spill] sm:$0xff] %v8913_v24  ;;  %v3782_v19 = vshrl.u32 %v3462_v23, 16  ;;  %v3774_v37 = vrot.slane %v3460_v26, 7  ;;  %v3658_v4 = vrot.slane %v8929_v20, 1  ;;  %v3659_v33 = vrot.slane %v3424_v1, 1  ;;  %v7101_v26 = vld [vmem:[%s9863_s4 + $0x8] sm:$0xff]  }
 0x2d3   : > { %6772 = vmatpush3.bf16.msra.mxu0 %v7100_v52  ;;  %v7104_v52 = vld [vmem:[%s9863_s4 + $0xb8] sm:$0xff]   ;;  %v8941_v58 = vsel %vm792_vm1, %v4040_v31, %v4047_v12  ;;  %v3780_v40 = vrot.slane %v3778_v27, 7  ;;  %v3657_v51 = vsel %vm731_vm0, %v3655_v5, %v3656_v29  ;;  %v9904_v59 = vshll.u32 %v8745_v34, 16  ;;  %v3363_v27 = vld [vmem:[#allocation2 + $0x60] sm:$0x80]  ;;  %v7103_v29 = vld [vmem:[%s9863_s4 + $0x10] sm:$0xff]  }
 0x2d4   : > { %6773 = vmatprep.subr.bf16.mxu0 %v7102_v14  ;;  %10046 = vst [vmem:[#allocation31_spill] sm:$0xff] %v8941_v58  ;;  %v4078_v3 = vor.u32 %v4076_v22, %v4075_v7  ;;  %v4100_v15 = vshrl.u32 %v3655_v5, 16  ;;  %v4107_v45 = vshll.u32 %v3657_v51, 16  ;;  %v3660_v36 = vsel %vm731_vm0, %v3658_v4, %v3659_v33  ;;  %v3426_v5 = vld [vmem:[#allocation2 + $0x178] sm:$0x1]  ;;  %v8967_v7 = vld [vmem:[#allocation2 + $0x188] sm:$0xff] }
 0x2d5   : > { %4627 = vmatpush1.bf16.msra.mxu1 %v7095_v43  ;;  %6738 = vmatmul.mubr.bf16.gmra.mrb[12].mxu0 %v8888_v16  ;;  %v3771_v43 = vshrl.u32 %v3361_v39, 16  ;;  %v3466_v13 = vrot.slane %v9904_v59, 1  ;;  %v3467_v53 = vshrl.u32 %v8745_v34, 16  ;;  %v4135_v23 = vshrl.u32 %v3660_v36, 16 }
 0x2d6   : > { %4628 = vmatprep.subr.bf16.mxu1 %v10034_v57  ;;  %6741 = vmatprep.mubr.bf16.mxu0 %v8900_v46  ;;  %v8962_v2 = vsel %vm792_vm1, %v3742_v8, %v3744_v21  ;;  %v3775_v31 = vor.u32 %v3774_v37, %v3457_v56  ;;  %v8970_v22 = vsel %vm792_vm1, %v4071_v48, %v4078_v3  ;;  %v3428_v8 = vld [vmem:[#allocation2 + $0x190] sm:$0x1]  ;;  %v10055_v0 = vshll.u32 %v8758_v25, 16 }
 0x2d7   : > { %6774 = vmatpush3.bf16.msra.mxu0 %v7102_v14  ;;  %v3784_v14 = vrot.slane %v3782_v19, 7  ;;  %v3773_v1 = vrot.slane %v3771_v43, 7  ;;  %v3469_v12 = vor.u32 %v3467_v53, %v3466_v13  ;;  %10047 = vst [vmem:[#allocation32_spill] sm:$0xff] %v8970_v22  ;;  %v4138_v43 = vshll.u32 %v3660_v36, 16 }
 0x2d8   : > { %6775 = vmatprep.subr.bf16.mxu0 %v7104_v52  ;;  %v3809_v60 = vshrl.u32 %v3466_v13, 16  ;;  %v4137_v48 = vrot.slane %v4135_v23, 7  ;;  %v3665_v3 = vrot.slane %v3428_v8, 1  ;;  %v7105_v23 = vld [vmem:[%s9863_s4 + $0x18] sm:$0xff]  }
 0x2d9   : > { %4629 = vmatpush1.bf16.msra.mxu1 %v7097_v61  ;;  %v4104_v61 = vshrl.u32 %v3657_v51, 16  ;;  %v3787_v28 = vor.u32 %v3785_v17, %v3784_v14  ;;  %v3661_v17 = vrot.slane %v8955_v10, 1  ;;  %v3813_v56 = vshrl.u32 %v3469_v12, 16 }
 0x2da   : > { %5056 = vmatprep.subr.bf16.mxu1 %v10034_v57  ;;  %v3816_v37 = vshll.u32 %v3469_v12, 16  ;;  %v3811_v36 = vrot.slane %v3809_v60, 7 }
 0x2db   : > { %6776 = vmatpush3.bf16.msra.mxu0 %v7104_v52  ;;  %v4106_v39 = vrot.slane %v4104_v61, 7  ;;  %v8958_v52 = vshrl.u32 %v3658_v4, 16  ;;  %v8974_v21 = vsel %vm792_vm1, %v3780_v40, %v3787_v28  ;;  %v3662_v4 = vrot.slane %v3426_v5, 1 }
 0x2dc   : > { %4631 = vmatmul.mubr.bf16.vlgmr.msra.gmra.mrb[0].mxu1 %v8913_v24  ;;  %5563 = vmatprep.subr.bf16.mxu0 %v10034_v57  ;;  %v3815_v33 = vrot.slane %v3813_v56, 7  ;;  %v4162_v51 = vshrl.u32 %v3661_v17, 16  ;;  %v3664_v40 = vrot.slane %v8967_v7, 1  ;;  %v3802_v61 = vshrl.u32 %v3363_v27, 16  ;;  %v9001_v56 = vld [vmem:[#allocation2 + $0x1b8] sm:$0xff] }
 0x2dd   : > { %4636 = vmatprep.mubr.bf16.mxu1 %v8932_v42  ;;  %5057 = vmatpush1.bf16.msra.mxu1 %v7099_v30  ;;  %v4102_v30 = vrot.slane %v4100_v15, 7  ;;  %v4109_v19 = vor.u32 %v4107_v45, %v4106_v39  ;;  %v4133_v14 = vrot.slane %v8958_v52, 7  ;;  %v3663_v45 = vsel %vm731_vm0, %v3661_v17, %v3662_v4  ;;  %v8989_v52 = vld [vmem:[#allocation2 + $0x1a0] sm:$0xff] }
 0x2de   : > { %6742 = vmatmul.mubr.bf16.gmra.mrb[16].mxu0 %v8923_v55  ;;  %5058 = vmatprep.subr.bf16.mxu1 %v10034_v57  ;;  %v9903_v28 = vshll.u32 %v8758_v25, 16  ;;  %v4166_v13 = vshrl.u32 %v3663_v45, 16  ;;  %v4169_v39 = vshll.u32 %v3663_v45, 16  ;;  %v3818_v12 = vor.u32 %v3816_v37, %v3815_v33 }
 0x2df   : > { %6745 = vmatprep.mubr.bf16.mxu0 %v8941_v58  ;;  %v8984_v15 = vsel %vm792_vm1, %v4102_v30, %v4109_v19  ;;  %v3666_v27 = vsel %vm731_vm0, %v3664_v40, %v3665_v3  ;;  %v3474_v30 = vshrl.u32 %v8758_v25, 16  ;;  %v4140_v19 = vor.u32 %v4138_v43, %v4137_v48  ;;  %v3432_v3 = vld [vmem:[#allocation2 + $0x1c0] sm:$0x1] }
 0x2e0   : > { %10048 = vst [vmem:[#allocation33_spill] sm:$0xff] %v8984_v15  ;;  %v3473_v5 = vrot.slane %v9903_v28, 1  ;;  %v4164_v17 = vrot.slane %v4162_v51, 7  ;;  %v4168_v8 = vrot.slane %v4166_v13, 7  ;;  %v4197_v60 = vshrl.u32 %v3666_v27, 16  ;;  %v7107_v43 = vld [vmem:[%s9863_s4 + $0x20] sm:$0xff]  }
 0x2e1   : > { %5059 = vmatpush1.bf16.msra.mxu1 %v7101_v26  ;;  %v3805_v26 = vrot.slane %v3467_v53, 7  ;;  %v3430_v53 = vld [vmem:[#allocation2 + $0x1a8] sm:$0x1]  ;;  %v3804_v37 = vrot.slane %v3802_v61, 7  ;;  %v4193_v4 = vshrl.u32 %v3664_v40, 16  ;;  %v4200_v59 = vshll.u32 %v3666_v27, 16 }
 0x2e2   : > { %5060 = vmatprep.subr.bf16.mxu1 %v10034_v57  ;;  %v3476_v33 = vor.u32 %v3474_v30, %v3473_v5  ;;  %v4171_v45 = vor.u32 %v4169_v39, %v4168_v8  ;;  %v4199_v28 = vrot.slane %v4197_v60, 7  ;;  %v3667_v24 = vrot.slane %v8989_v52, 1  ;;  %v3365_v61 = vld [vmem:[#allocation2 + $0x78] sm:$0x80] }
 0x2e3   : > { %v9011_v48 = vsel %vm792_vm1, %v3811_v36, %v3818_v12  ;;  %v3840_v51 = vshrl.u32 %v3473_v5, 16  ;;  %v9015_v40 = vsel %vm792_vm1, %v4133_v14, %v4140_v19  ;;  %v10051_v13 = vshll.u32 %v8745_v34, 16  ;;  %v7110_v36 = vld [vmem:[%s9863_s4 + $0x28] sm:$0xff]  }
 0x2e4   : > { %4637 = vmatmul.mubr.bf16.gmra.mrb[4].mxu1 %v8962_v2  ;;  %10049 = vst [vmem:[#allocation34_spill] sm:$0xff] %v9011_v48  ;;  %10050 = vst [vmem:[#allocation35_spill] sm:$0xff] %v9015_v40  ;;  %v3668_v27 = vrot.slane %v3430_v53, 1  ;;  %v4224_v5 = vshrl.u32 %v3667_v24, 16  ;;  %v3670_v8 = vrot.slane %v9001_v56, 1  ;;  %v3671_v60 = vrot.slane %v3432_v3, 1 }
 0x2e5   : > { %4642 = vmatprep.mubr.bf16.mxu1 %v8974_v21  ;;  %5061 = vmatpush1.bf16.msra.mxu1 %v7103_v29  ;;  %v9004_v29 = vsel %vm792_vm1, %v3773_v1, %v3775_v31  ;;  %v3844_v1 = vshrl.u32 %v3476_v33, 16  ;;  %v3847_v31 = vshll.u32 %v3476_v33, 16  ;;  %v3806_v39 = vor.u32 %v3805_v26, %v10051_v13 }
 0x2e6   : > { %6746 = vmatmul.mubr.bf16.gmra.mrb[20].mxu0 %v8970_v22  ;;  %5062 = vmatprep.subr.bf16.mxu1 %v10034_v57  ;;  %v4195_v14 = vrot.slane %v4193_v4, 7  ;;  %v4202_v34 = vor.u32 %v4200_v59, %v4199_v28  ;;  %v3669_v26 = vsel %vm731_vm0, %v3667_v24, %v3668_v27  ;;  %v9906_v19 = vshll.u32 %v8764_v50, 16  ;;  %v9037_v28 = vld [vmem:[#allocation2 + $0x8] sm:$0xff] }
 0x2e7   : > { %6749 = vmatprep.mubr.bf16.mxu0 %v8984_v15  ;;  %v3846_v12 = vrot.slane %v3844_v1, 7  ;;  %v3842_v53 = vrot.slane %v3840_v51, 7  ;;  %v4228_v33 = vshrl.u32 %v3669_v26, 16  ;;  %v3833_v3 = vshrl.u32 %v3365_v61, 16 }
 0x2e8   : > { %v3672_v1 = vsel %vm731_vm0, %v3670_v8, %v3671_v60  ;;  %v3480_v59 = vrot.slane %v9906_v19, 1  ;;  %v3481_v24 = vshrl.u32 %v8764_v50, 16  ;;  %v3836_v4 = vrot.slane %v3474_v30, 7  ;;  %v3396_v60 = vld [vmem:[#allocation2 + $0x10] sm:$0x1] }
 0x2e9   : > { %5063 = vmatpush1.bf16.msra.mxu1 %v7105_v23  ;;  %v9020_v23 = vsel %vm792_vm1, %v4164_v17, %v4171_v45  ;;  %v3849_v17 = vor.u32 %v3847_v31, %v3846_v12  ;;  %v4231_v45 = vshll.u32 %v3669_v26, 16  ;;  %v4230_v51 = vrot.slane %v4228_v33, 7  ;;  %v7113_v26 = vld [vmem:[%s9863_s4 + $0x30] sm:$0xff]  }
 0x2ea   : > { %5064 = vmatprep.subr.bf16.mxu1 %v10034_v57  ;;  %10052 = vst [vmem:[#allocation36_spill] sm:$0xff] %v9020_v23  ;;  %v4259_v31 = vshrl.u32 %v3672_v1, 16  ;;  %v9040_v13 = vsel %vm792_vm1, %v3804_v37, %v3806_v39  ;;  %v9043_v27 = vsel %vm792_vm1, %v4195_v14, %v4202_v34  ;;  %v4255_v61 = vshrl.u32 %v3670_v8, 16  ;;  %v3367_v34 = vld [vmem:[#allocation2 + $0x90] sm:$0x80] }
 0x2eb   : > { %10053 = vst [vmem:[#allocation37_spill] sm:$0xff] %v9043_v27  ;;  %v3483_v12 = vor.u32 %v3481_v24, %v3480_v59  ;;  %v9049_v19 = vsel %vm792_vm1, %v3842_v53, %v3849_v17  ;;  %v4233_v30 = vor.u32 %v4231_v45, %v4230_v51  ;;  %v3616_v33 = vrot.slane %v9037_v28, 1 }
 0x2ec   : > { %4643 = vmatmul.mubr.bf16.gmra.mrb[8].mxu1 %v9004_v29  ;;  %10054 = vst [vmem:[#allocation38_spill] sm:$0xff] %v9049_v19  ;;  %v4261_v37 = vrot.slane %v4259_v31, 7  ;;  %v4262_v39 = vshll.u32 %v3672_v1, 16  ;;  %v3617_v17 = vrot.slane %v3396_v60, 1  ;;  %v4257_v45 = vrot.slane %v4255_v61, 7  ;;  %v7116_v31 = vld [vmem:[%s9863_s4 + $0x38] sm:$0xff]  }
 0x2ed   : > { %4648 = vmatprep.mubr.bf16.mxu1 %v9011_v48  ;;  %5065 = vmatpush1.bf16.msra.mxu1 %v7107_v43  ;;  %v4226_v43 = vrot.slane %v4224_v5, 7  ;;  %v3871_v5 = vshrl.u32 %v3480_v59, 16  ;;  %v3875_v14 = vshrl.u32 %v3483_v12, 16  ;;  %v3878_v8 = vshll.u32 %v3483_v12, 16 }
 0x2ee   : > { %6750 = vmatmul.mubr.bf16.gmra.mrb[24].mxu0 %v9015_v40  ;;  %5066 = vmatprep.subr.bf16.mxu1 %v10034_v57  ;;  %v3837_v48 = vor.u32 %v3836_v4, %v10055_v0  ;;  %v3697_v51 = vshrl.u32 %v3616_v33, 16  ;;  %v3485_v1 = vshll.u32 %v8780_v49, 16  ;;  %v3618_v0 = vsel %vm731_vm0, %v3616_v33, %v3617_v17  ;;  %v7119_v33 = vld [vmem:[%s9863_s4 + $0x40] sm:$0xff]  }
 0x2ef   : > { %6753 = vmatprep.mubr.bf16.mxu0 %v9020_v23  ;;  %v9057_v53 = vsel %vm792_vm1, %v4226_v43, %v4233_v30  ;;  %v3877_v59 = vrot.slane %v3875_v14, 7  ;;  %v3873_v25 = vrot.slane %v3871_v5, 7  ;;  %v4264_v4 = vor.u32 %v4262_v39, %v4261_v37 }
 0x2f0   : > { %10056 = vst [vmem:[#allocation39_spill] sm:$0xff] %v9057_v53  ;;  %v3701_v61 = vshrl.u32 %v3618_v0, 16  ;;  %v3704_v12 = vshll.u32 %v3618_v0, 16  ;;  %v3487_v30 = vrot.slane %v3485_v1, 1  ;;  %v9912_v5 = vshll.u32 %v8796_v35, 16 }
 0x2f1   : > { %5067 = vmatpush1.bf16.msra.mxu1 %v7110_v36  ;;  %v3835_v36 = vrot.slane %v3833_v3, 7  ;;  %v3488_v3 = vshrl.u32 %v8780_v49, 16  ;;  %v3880_v43 = vor.u32 %v3878_v8, %v3877_v59  ;;  %v3867_v14 = vrot.slane %v3481_v24, 7  ;;  %v3369_v0 = vld [vmem:[#allocation2 + $0xa8] sm:$0x80] }
 0x2f2   : > { %5068 = vmatprep.subr.bf16.mxu1 %v10034_v57  ;;  %v3699_v17 = vrot.slane %v3697_v51, 7  ;;  %v3495_v37 = vshrl.u32 %v8796_v35, 16  ;;  %v3902_v8 = vshrl.u32 %v3487_v30, 16  ;;  %v9913_v24 = vshll.u32 %v8820_v32, 16  ;;  %v9138_v49 = vld [vmem:[%s9863_s4 + $0x188] sm:$0xff]  }
 0x2f3   : > { %v9070_v60 = vsel %vm792_vm1, %v3835_v36, %v3837_v48  ;;  %v9080_v39 = vsel %vm792_vm1, %v3873_v25, %v3880_v43  ;;  %v3490_v48 = vor.u32 %v3488_v3, %v3487_v30  ;;  %v9086_v36 = vsel %vm792_vm1, %v4257_v45, %v4264_v4 }
 0x2f4   : > { %4649 = vmatmul.mubr.bf16.gmra.mrb[12].mxu1 %v9040_v13  ;;  %10057 = vst [vmem:[#allocation40_spill] sm:$0xff] %v9086_v36  ;;  %v10058_v43 = vshll.u32 %v8764_v50, 16  ;;  %v3904_v4 = vrot.slane %v3902_v8, 7  ;;  %v3502_v50 = vshrl.u32 %v8820_v32, 16  ;;  %v7125_v8 = vld [vmem:[%s9863_s4 + $0x50] sm:$0xff]  }
 0x2f5   : > { %4654 = vmatprep.mubr.bf16.mxu1 %v9049_v19  ;;  %5069 = vmatpush1.bf16.msra.mxu1 %v7113_v26  ;;  %v3864_v26 = vshrl.u32 %v3367_v34, 16  ;;  %v3703_v19 = vrot.slane %v3701_v61, 7  ;;  %v3494_v34 = vrot.slane %v9912_v5, 1  ;;  %v3906_v51 = vshrl.u32 %v3490_v48, 16 }
 0x2f6   : > { %6754 = vmatmul.mubr.bf16.gmra.mrb[28].mxu0 %v9043_v27  ;;  %5070 = vmatprep.subr.bf16.mxu1 %v10034_v57  ;;  %v3868_v61 = vor.u32 %v3867_v14, %v10058_v43 }
 0x2f7   : > { %6757 = vmatprep.mubr.bf16.mxu0 %v9057_v53  ;;  %v3706_v59 = vor.u32 %v3704_v12, %v3703_v19  ;;  %v3866_v25 = vrot.slane %v3864_v26, 7  ;;  %v3497_v45 = vor.u32 %v3495_v37, %v3494_v34  ;;  %v7122_v19 = vld [vmem:[%s9863_s4 + $0x48] sm:$0xff]   ;;  %v3908_v12 = vrot.slane %v3906_v51, 7 }
 0x2f8   : > { %v3501_v26 = vrot.slane %v9913_v24, 1  ;;  %v3933_v43 = vshrl.u32 %v3494_v34, 16 }
 0x2f9   : > { %5071 = vmatpush1.bf16.msra.mxu1 %v7116_v31  ;;  %v3909_v31 = vshll.u32 %v3490_v48, 16  ;;  %v3707_v30 = vsel %vm792_vm1, %v3699_v17, %v3706_v59  ;;  %v3937_v14 = vshrl.u32 %v3497_v45, 16  ;;  %v3895_v48 = vshrl.u32 %v3369_v0, 16  ;;  %v3371_v0 = vld [vmem:[#allocation2 + $0xc0] sm:$0x80] }
 0x2fa   : > { %5072 = vmatprep.subr.bf16.mxu1 %v10034_v57  ;;  %v3898_v59 = vrot.slane %v3488_v3, 7  ;;  %v3940_v5 = vshll.u32 %v3497_v45, 16  ;;  %v9120_v3 = vld [vmem:[%s9863_s4 + $0x180] sm:$0xff]   ;;  %v3935_v45 = vrot.slane %v3933_v43, 7 }
 0x2fb   : > { %v3911_v17 = vor.u32 %v3909_v31, %v3908_v12  ;;  %v3939_v24 = vrot.slane %v3937_v14, 7  ;;  %v9914_v31 = vshll.u32 %v8833_v47, 16  ;;  %v3897_v34 = vrot.slane %v3895_v48, 7  ;;  %v7131_v48 = vld [vmem:[%s9863_s4 + $0x60] sm:$0xff]  }
 0x2fc   : > { %4655 = vmatmul.mubr.bf16.gmra.mrb[16].mxu1 %v9070_v60 }
 0x2fd   : > { %4660 = vmatprep.mubr.bf16.mxu1 %v9080_v39  ;;  %5073 = vmatpush1.bf16.msra.mxu1 %v7119_v33  ;;  %v9105_v33 = vsel %vm792_vm1, %v3866_v25, %v3868_v61  ;;  %v9111_v51 = vsel %vm792_vm1, %v3904_v4, %v3911_v17  ;;  %v7128_v25 = vld [vmem:[%s9863_s4 + $0x58] sm:$0xff]   ;;  %v3899_v61 = vor.u32 %v3898_v59, %v3485_v1  ;;  %v3508_v14 = vrot.slane %v9914_v31, 1 }
 0x2fe   : > { %6758 = vmatmul.mubr.bf16.gmra.mrb[32].mxu0 %v9086_v36  ;;  %5074 = vmatprep.subr.bf16.mxu1 %v10034_v57  ;;  %v3942_v4 = vor.u32 %v3940_v5, %v3939_v24  ;;  %v3926_v1 = vshrl.u32 %v3371_v0, 16  ;;  %v3929_v5 = vrot.slane %v3495_v37, 7  ;;  %v3964_v24 = vshrl.u32 %v3501_v26, 16  ;;  %v9161_v37 = vld [vmem:[%s9863_s4 + $0x190] sm:$0xff]  }
 0x2ff   : > { %6777 = vmatprep.mubr.bf16.mxu0 %v3707_v30  ;;  %v3504_v30 = vor.u32 %v3502_v50, %v3501_v26  ;;  %v9916_v17 = vshll.u32 %v8865_v63, 16  ;;  %v3373_v26 = vld [vmem:[#allocation2 + $0xd8] sm:$0x80]  ;;  %v10059_v0 = vshll.u32 %v8796_v35, 16 }
 0x300   : > { %v9152_v59 = vsel %vm792_vm1, %v3935_v45, %v3942_v4  ;;  %v9917_v45 = vshrl.u32 %v8865_v63, 16  ;;  %v7132_v4 = vld [vmem:[%s9863_s4 + $0x68] sm:$0xff]   ;;  %v9183_v35 = vld [vmem:[%s9863_s4 + $0x198] sm:$0xff]  }
 0x301   : > { %5075 = vmatpush1.bf16.msra.mxu1 %v7122_v19  ;;  %v9915_v19 = vshrl.u32 %v8833_v47, 16  ;;  %v3968_v12 = vshrl.u32 %v3504_v30, 16 }
 0x302   : > { %5076 = vmatprep.subr.bf16.mxu1 %v10034_v57 }
 0x303   : > { %v3970_v43 = vrot.slane %v3968_v12, 7  ;;  %v3966_v12 = vrot.slane %v3964_v24, 7  ;;  %v3960_v24 = vrot.slane %v3502_v50, 7  ;;  %v9206_v50 = vld [vmem:[%s9863_s4 + $0x1a0] sm:$0xff]  }
 0x304   : > { %4661 = vmatmul.mubr.bf16.gmra.mrb[20].mxu1 %v9105_v33 }
 0x305   : > { %4668 = vmatprep.mubr.bf16.mxu1 %v9111_v51  ;;  %5077 = vmatpush1.bf16.msra.mxu1 %v7125_v8  ;;  %v3971_v8 = vshll.u32 %v3504_v30, 16  ;;  %v3928_v30 = vrot.slane %v3926_v1, 7  ;;  %v3957_v1 = vshrl.u32 %v3373_v26, 16 }
 0x306   : > { %6778 = vmatmul.mubr.bf16.vlgmr.msra.gmra.mrb[36].mxu0 %v8756_v62  ;;  %5078 = vmatprep.subr.bf16.mxu1 %v10034_v57  ;;  %v9143_v62 = vsel %vm792_vm1, %v3897_v34, %v3899_v61  ;;  %v3511_v34 = vor.u32 %v9915_v19, %v3508_v14  ;;  %v9170_v61 = vrot.slane %v9916_v17, 1 }
 0x307   : > { %5564 = vmatpush1.bf16.msra.mxu0 %v9120_v3  ;;  %6781 = vmatprep.mubr.bf16.mxu0 %v8783_v18  ;;  %v3973_v31 = vor.u32 %v3971_v8, %v3970_v43  ;;  %v7134_v8 = vld [vmem:[%s9863_s4 + $0x70] sm:$0xff]   ;;  %v9932_v18 = vshll.u32 %v8955_v10, 16 }
 0x308   : > { %5565 = vmatprep.subr.bf16.mxu0 %v10034_v57  ;;  %v3999_v19 = vshrl.u32 %v3511_v34, 16  ;;  %v3518_v43 = vor.u32 %v9917_v45, %v9170_v61  ;;  %v4002_v17 = vshll.u32 %v3511_v34, 16  ;;  %v10060_v34 = vshll.u32 %v8820_v32, 16  ;;  %v9226_v32 = vld [vmem:[%s9863_s4 + $0x1a8] sm:$0xff]  }
 0x309   : > { %5079 = vmatpush1.bf16.msra.mxu1 %v7128_v25  ;;  %v3930_v25 = vor.u32 %v3929_v5, %v10059_v0  ;;  %v9198_v0 = vsel %vm792_vm1, %v3966_v12, %v3973_v31  ;;  %v3375_v31 = vld [vmem:[#allocation2 + $0xf0] sm:$0x80] }
 0x30a   : > { %5080 = vmatprep.subr.bf16.mxu1 %v10034_v57  ;;  %v4001_v26 = vrot.slane %v3999_v19, 7  ;;  %v7135_v19 = vld [vmem:[%s9863_s4 + $0x78] sm:$0xff]   ;;  %v4030_v12 = vshrl.u32 %v3518_v43, 16 }
 0x30b   : > { %5566 = vmatpush1.bf16.msra.mxu0 %v9138_v49  ;;  %v9187_v5 = vsel %vm792_vm1, %v3928_v30, %v3930_v25  ;;  %v9919_v30 = vshll.u32 %v8877_v6, 16  ;;  %v3961_v25 = vor.u32 %v3960_v24, %v10060_v34  ;;  %v3988_v24 = vshrl.u32 %v3375_v31, 16  ;;  %v3377_v31 = vld [vmem:[#allocation2 + $0x108] sm:$0x80] }
 0x30c   : > { %4669 = vmatmul.mubr.bf16.gmra.mrb[24].mxu1 %v9143_v62  ;;  %5567 = vmatprep.subr.bf16.mxu0 %v10034_v57  ;;  %v4004_v45 = vor.u32 %v4002_v17, %v4001_v26  ;;  %v4026_v26 = vshrl.u32 %v9170_v61, 16  ;;  %v4033_v34 = vshll.u32 %v3518_v43, 16 }
 0x30d   : > { %4676 = vmatprep.mubr.bf16.mxu1 %v9152_v59  ;;  %5081 = vmatpush1.bf16.msra.mxu1 %v7131_v48  ;;  %v3995_v48 = vshrl.u32 %v3508_v14, 16  ;;  %v3959_v14 = vrot.slane %v3957_v1, 7  ;;  %v3522_v36 = vrot.slane %v9919_v30, 1  ;;  %v4032_v1 = vrot.slane %v4030_v12, 7 }
 0x30e   : > { %6782 = vmatmul.mubr.bf16.gmra.mrb[40].mxu0 %v8786_v54  ;;  %5082 = vmatprep.subr.bf16.mxu1 %v10034_v57  ;;  %v3990_v61 = vrot.slane %v3988_v24, 7  ;;  %v4028_v43 = vrot.slane %v4026_v26, 7  ;;  %v3530_v12 = vshrl.u32 %v8909_v44, 16  ;;  %v4019_v24 = vshrl.u32 %v3377_v31, 16  ;;  %v9278_v31 = vld [vmem:[%s9863_s4 + $0x1c0] sm:$0xff]  }
 0x30f   : > { %5568 = vmatpush1.bf16.msra.mxu0 %v9161_v37  ;;  %6785 = vmatprep.mubr.bf16.mxu0 %v8811_v38  ;;  %v9230_v17 = vsel %vm792_vm1, %v3959_v14, %v3961_v25  ;;  %v9923_v38 = vshll.u32 %v8909_v44, 16  ;;  %v9246_v14 = vld [vmem:[%s9863_s4 + $0x1b0] sm:$0xff]   ;;  %v4057_v26 = vshrl.u32 %v3522_v36, 16  ;;  %v3537_v54 = vshrl.u32 %v8929_v20, 16 }
 0x310   : > { %5569 = vmatprep.subr.bf16.mxu0 %v10034_v57 }
 0x311   : > { %5083 = vmatpush1.bf16.msra.mxu1 %v7132_v4  ;;  %v3997_v4 = vrot.slane %v3995_v48, 7  ;;  %v10061_v48 = vshrl.u32 %v8833_v47, 16 }
 0x312   : > { %5084 = vmatprep.subr.bf16.mxu1 %v10034_v57 }
 0x313   : > { %5570 = vmatpush1.bf16.msra.mxu0 %v9183_v35  ;;  %v9236_v30 = vsel %vm792_vm1, %v3997_v4, %v4004_v45  ;;  %v3529_v4 = vrot.slane %v9923_v38, 1 }
 0x314   : > { %4677 = vmatmul.mubr.bf16.gmra.mrb[28].mxu1 %v9187_v5  ;;  %5571 = vmatprep.subr.bf16.mxu0 %v10034_v57 }
 0x315   : > { %4684 = vmatprep.mubr.bf16.mxu1 %v9198_v0  ;;  %5085 = vmatpush1.bf16.msra.mxu1 %v7134_v8  ;;  %v3991_v8 = vrot.slane %v10061_v48, 7  ;;  %v10064_v48 = vshrl.u32 %v8865_v63, 16 }
 0x316   : > { %6786 = vmatmul.mubr.bf16.gmra.mrb[44].mxu0 %v8826_v11  ;;  %5086 = vmatprep.subr.bf16.mxu1 %v10034_v57 }
 0x317   : > { %5572 = vmatpush1.bf16.msra.mxu0 %v9206_v50  ;;  %6789 = vmatprep.mubr.bf16.mxu0 %v8851_v9  ;;  %v10062_v9 = vshrl.u32 %v8877_v6, 16 }
 0x318   : > { %5573 = vmatprep.subr.bf16.mxu0 %v10034_v57 }
 0x319   : > { %5087 = vmatpush1.bf16.msra.mxu1 %v7135_v19  ;;  %v3525_v11 = vor.u32 %v10062_v9, %v3522_v36  ;;  %v10063_v9 = vshll.u32 %v8833_v47, 16  ;;  %v4035_v19 = vor.u32 %v4033_v34, %v4032_v1  ;;  %v9262_v47 = vld [vmem:[%s9863_s4 + $0x1b8] sm:$0xff]   ;;  %v10065_v36 = vshll.u32 %v8865_v63, 16  ;;  %v9294_v63 = vld [vmem:[%s9863_s4 + $0x1c8] sm:$0xff]  }
 0x31a   : > { %6881 = vmatprep.subr.bf16.mxu1 %v10034_v57  ;;  %10066 = vst [vmem:[#allocation41_spill] sm:$0xff] %v9294_v63 }
 0x31b   : > { %5574 = vmatpush1.bf16.msra.mxu0 %v9226_v32  ;;  %v3992_v45 = vor.u32 %v3991_v8, %v10063_v9  ;;  %v4061_v25 = vshrl.u32 %v3525_v11, 16  ;;  %v4022_v8 = vrot.slane %v10064_v48, 7  ;;  %v4064_v34 = vshll.u32 %v3525_v11, 16 }
 0x31c   : > { %4685 = vmatmul.mubr.bf16.gmra.mrb[32].mxu1 %v9230_v17  ;;  %5575 = vmatprep.subr.bf16.mxu0 %v10034_v57  ;;  %v9271_v9 = vsel %vm792_vm1, %v4028_v43, %v4035_v19  ;;  %v4021_v11 = vrot.slane %v4019_v24, 7  ;;  %v3379_v43 = vld [vmem:[#allocation2 + $0x120] sm:$0x80] }
 0x31d   : > { %4692 = vmatprep.mubr.bf16.mxu1 %v9236_v30  ;;  %v9266_v1 = vsel %vm792_vm1, %v3990_v61, %v3992_v45  ;;  %v4063_v38 = vrot.slane %v4061_v25, 7  ;;  %v4023_v61 = vor.u32 %v4022_v8, %v10065_v36  ;;  %v4059_v45 = vrot.slane %v4057_v26, 7 }
 0x31e   : > { %6790 = vmatmul.mubr.bf16.gmra.mrb[48].mxu0 %v8857_v41  ;;  %v9927_v41 = vshll.u32 %v8929_v20, 16  ;;  %v4050_v24 = vshrl.u32 %v3379_v43, 16  ;;  %v10067_v8 = vshrl.u32 %v8877_v6, 16  ;;  %v9310_v43 = vld [vmem:[%s9863_s4 + $0x1d0] sm:$0xff]  }
 0x31f   : > { %5576 = vmatpush1.bf16.msra.mxu0 %v9246_v14  ;;  %6793 = vmatprep.mubr.bf16.mxu0 %v8888_v16  ;;  %v3532_v16 = vor.u32 %v3530_v12, %v3529_v4  ;;  %v4066_v19 = vor.u32 %v4064_v34, %v4063_v38  ;;  %v9298_v38 = vsel %vm792_vm1, %v4021_v11, %v4023_v61  ;;  %v4088_v34 = vshrl.u32 %v3529_v4, 16 }
 0x320   : > { %5577 = vmatprep.subr.bf16.mxu0 %v10034_v57  ;;  %v3536_v48 = vrot.slane %v9927_v41, 1  ;;  %v4053_v26 = vrot.slane %v10067_v8, 7  ;;  %v10068_v4 = vshll.u32 %v8877_v6, 16  ;;  %v3543_v8 = vrot.slane %v9932_v18, 1  ;;  %v9326_v6 = vld [vmem:[%s9863_s4 + $0x1d8] sm:$0xff]  }
 0x321   : > { %v4092_v25 = vshrl.u32 %v3532_v16, 16  ;;  %v4095_v36 = vshll.u32 %v3532_v16, 16  ;;  %v9303_v41 = vsel %vm792_vm1, %v4059_v45, %v4066_v19  ;;  %v4052_v16 = vrot.slane %v4050_v24, 7  ;;  %v3381_v45 = vld [vmem:[#allocation2 + $0x138] sm:$0x80] }
 0x322   : > { %v4054_v11 = vor.u32 %v4053_v26, %v10068_v4  ;;  %v4090_v61 = vrot.slane %v4088_v34, 7  ;;  %v4081_v24 = vshrl.u32 %v3381_v45, 16  ;;  %v4084_v26 = vrot.slane %v3530_v12, 7  ;;  %v9342_v45 = vld [vmem:[%s9863_s4 + $0x1e0] sm:$0xff]  }
 0x323   : > { %5578 = vmatpush1.bf16.msra.mxu0 %v9262_v47  ;;  %v4119_v34 = vshrl.u32 %v3536_v48, 16  ;;  %v10070_v12 = vshll.u32 %v8909_v44, 16  ;;  %v9358_v44 = vld [vmem:[%s9863_s4 + $0x1e8] sm:$0xff]  }
 0x324   : > { %4693 = vmatmul.mubr.bf16.gmra.mrb[36].mxu1 %v9266_v1  ;;  %5579 = vmatprep.subr.bf16.mxu0 %v10034_v57 }
 0x325   : > { %4700 = vmatprep.mubr.bf16.mxu1 %v9271_v9 }
 0x326   : > { %6794 = vmatmul.mubr.bf16.gmra.mrb[52].mxu0 %v8900_v46  ;;  %v3539_v46 = vor.u32 %v3537_v54, %v3536_v48  ;;  %v4085_v48 = vor.u32 %v4084_v26, %v10070_v12  ;;  %v4115_v26 = vrot.slane %v3537_v54, 7 }
 0x327   : > { %5580 = vmatpush1.bf16.msra.mxu0 %v9278_v31  ;;  %6797 = vmatprep.mubr.bf16.mxu0 %v8923_v55  ;;  %v4094_v55 = vrot.slane %v4092_v25, 7 }
 0x328   : > { %5581 = vmatprep.subr.bf16.mxu0 %v10034_v57  ;;  %v4123_v25 = vshrl.u32 %v3539_v46, 16 }
 0x329   : > { %v4097_v19 = vor.u32 %v4095_v36, %v4094_v55  ;;  %v9330_v55 = vsel %vm792_vm1, %v4052_v16, %v4054_v11  ;;  %v4126_v36 = vshll.u32 %v3539_v46, 16  ;;  %v4083_v46 = vrot.slane %v4081_v24, 7  ;;  %v3383_v11 = vld [vmem:[#allocation2 + $0x150] sm:$0x80] }
 0x32a   : > { %v4125_v18 = vrot.slane %v4123_v25, 7  ;;  %v4121_v16 = vrot.slane %v4119_v34, 7  ;;  %v4112_v24 = vshrl.u32 %v3383_v11, 16  ;;  %v4150_v34 = vshrl.u32 %v3543_v8, 16 }
 0x32b   : > { %5582 = vmatpush1.bf16.msra.mxu0 %v9294_v63  ;;  %v9935_v63 = vshrl.u32 %v8955_v10, 16  ;;  %v9333_v4 = vsel %vm792_vm1, %v4090_v61, %v4097_v19 }
 0x32c   : > { %4701 = vmatmul.mubr.bf16.gmra.mrb[40].mxu1 %v9298_v38  ;;  %5583 = vmatprep.subr.bf16.mxu0 %v10034_v57  ;;  %10069 = vst [vmem:[#allocation42_spill] sm:$0xff] %v9333_v4  ;;  %v4128_v61 = vor.u32 %v4126_v36, %v4125_v18  ;;  %v9362_v18 = vsel %vm792_vm1, %v4083_v46, %v4085_v48  ;;  %v4114_v54 = vrot.slane %v4112_v24, 7  ;;  %v4152_v46 = vrot.slane %v4150_v34, 7  ;;  %v3385_v48 = vld [vmem:[#allocation2 + $0x168] sm:$0x80] }
 0x32d   : > { %4708 = vmatprep.mubr.bf16.mxu1 %v9303_v41  ;;  %10071 = vst [vmem:[#allocation43_spill] sm:$0xff] %v9362_v18  ;;  %v4143_v24 = vshrl.u32 %v3385_v48, 16  ;;  %v10075_v34 = vshrl.u32 %v8955_v10, 16 }
 0x32e   : > { %6798 = vmatmul.mubr.bf16.gmra.mrb[56].mxu0 %v8941_v58  ;;  %v9936_v58 = vshll.u32 %v8967_v7, 16  ;;  %v9365_v12 = vsel %vm792_vm1, %v4121_v16, %v4128_v61 }
 0x32f   : > { %5584 = vmatpush1.bf16.msra.mxu0 %v9310_v43  ;;  %6801 = vmatprep.mubr.bf16.mxu0 %v8970_v22  ;;  %v3546_v22 = vor.u32 %v9935_v63, %v3543_v8  ;;  %v3551_v63 = vshrl.u32 %v8967_v7, 16  ;;  %10072 = vst [vmem:[#allocation44_spill] sm:$0xff] %v9365_v12 }
 0x330   : > { %5585 = vmatprep.subr.bf16.mxu0 %v10034_v57  ;;  %v3550_v25 = vrot.slane %v9936_v58, 1 }
 0x331   : > { %v4154_v19 = vshrl.u32 %v3546_v22, 16  ;;  %v4157_v36 = vshll.u32 %v3546_v22, 16  ;;  %v10073_v22 = vshll.u32 %v8929_v20, 16  ;;  %v9388_v20 = vld [vmem:[%s9863_s4 + $0x1f8] sm:$0xff]  }
 0x333   : > { %5586 = vmatpush1.bf16.msra.mxu0 %v9326_v6  ;;  %v4156_v58 = vrot.slane %v4154_v19, 7  ;;  %v4116_v8 = vor.u32 %v4115_v26, %v10073_v22  ;;  %v3558_v19 = vshrl.u32 %v8989_v52, 16  ;;  %v4181_v22 = vshrl.u32 %v3550_v25, 16 }
 0x334   : > { %4709 = vmatmul.mubr.bf16.gmra.mrb[44].mxu1 %v9330_v55  ;;  %5587 = vmatprep.subr.bf16.mxu0 %v10034_v57 }
 0x335   : > { %4716 = vmatprep.mubr.bf16.mxu1 %v9333_v4  ;;  %v9372_v4 = vld [vmem:[%s9863_s4 + $0x1f0] sm:$0xff]   ;;  %v4159_v16 = vor.u32 %v4157_v36, %v4156_v58  ;;  %v7130_v58 = vld [vmem:[%s9863_s4 + $0x200] sm:$0xff]   ;;  %v9395_v26 = vsel %vm792_vm1, %v4114_v54, %v4116_v8  ;;  %v4146_v36 = vrot.slane %v10075_v34, 7  ;;  %v4145_v54 = vrot.slane %v4143_v24, 7 }
 0x336   : > { %6802 = vmatmul.mubr.bf16.gmra.mrb[60].mxu0 %v8984_v15  ;;  %v9941_v15 = vshll.u32 %v8989_v52, 16  ;;  %10074 = vst [vmem:[#allocation45_spill] sm:$0xff] %v9395_v26  ;;  %v10077_v8 = vshll.u32 %v8955_v10, 16  ;;  %v3565_v34 = vshrl.u32 %v9001_v56, 16  ;;  %v4177_v24 = vrot.slane %v3551_v63, 7 }
 0x337   : > { %6805 = vmatprep.mubr.bf16.mxu0 %v9015_v40  ;;  %5588 = vmatpush1.bf16.msra.mxu0 %v9342_v45  ;;  %v3553_v40 = vor.u32 %v3551_v63, %v3550_v25  ;;  %v4183_v25 = vrot.slane %v4181_v22, 7  ;;  %v10078_v63 = vshll.u32 %v8967_v7, 16  ;;  %v7136_v7 = vld [vmem:[%s9863_s4 + $0x210] sm:$0xff]  }
 0x338   : > { %5589 = vmatprep.subr.bf16.mxu0 %v10034_v57  ;;  %v3557_v61 = vrot.slane %v9941_v15, 1  ;;  %v4147_v48 = vor.u32 %v4146_v36, %v10077_v8 }
 0x339   : > { %v4185_v11 = vshrl.u32 %v3553_v40, 16  ;;  %v4188_v15 = vshll.u32 %v3553_v40, 16  ;;  %v3387_v40 = vld [vmem:[#allocation2 + $0x180] sm:$0x80] }
 0x33a   : > { %v4212_v10 = vshrl.u32 %v3557_v61, 16 }
 0x33b   : > { %5590 = vmatpush1.bf16.msra.mxu0 %v9358_v44 }
 0x33c   : > { %4717 = vmatmul.mubr.bf16.gmra.mrb[48].mxu1 %v9362_v18  ;;  %5591 = vmatprep.subr.bf16.mxu0 %v10034_v57  ;;  %v9952_v18 = vshll.u32 %v9001_v56, 16 }
 0x33d   : > { %4724 = vmatprep.mubr.bf16.mxu1 %v9365_v12  ;;  %v3560_v12 = vor.u32 %v3558_v19, %v3557_v61  ;;  %v4178_v61 = vor.u32 %v4177_v24, %v10078_v63 }
 0x33e   : > { %6806 = vmatmul.mubr.bf16.gmra.mrb[64].mxu0 %v9020_v23  ;;  %v4187_v23 = vrot.slane %v4185_v11, 7  ;;  %v3564_v11 = vrot.slane %v9952_v18, 1  ;;  %v7133_v18 = vld [vmem:[%s9863_s4 + $0x208] sm:$0xff]  }
 0x33f   : > { %6809 = vmatprep.mubr.bf16.mxu0 %v9043_v27  ;;  %5592 = vmatpush1.bf16.msra.mxu0 %v9372_v4  ;;  %v9400_v27 = vsel %vm792_vm1, %v4152_v46, %v4159_v16  ;;  %v4216_v16 = vshrl.u32 %v3560_v12, 16  ;;  %v4219_v36 = vshll.u32 %v3560_v12, 16  ;;  %v4214_v12 = vrot.slane %v4212_v10, 7 }
 0x340   : > { %5593 = vmatprep.subr.bf16.mxu0 %v10034_v57  ;;  %10076 = vst [vmem:[#allocation46_spill] sm:$0xff] %v9400_v27  ;;  %v4190_v46 = vor.u32 %v4188_v15, %v4187_v23  ;;  %v3567_v15 = vor.u32 %v3565_v34, %v3564_v11  ;;  %v9953_v23 = vshll.u32 %v9037_v28, 16  ;;  %v4208_v10 = vrot.slane %v3558_v19, 7 }
 0x341   : > { %v4218_v8 = vrot.slane %v4216_v16, 7  ;;  %v3439_v16 = vshrl.u32 %v9037_v28, 16  ;;  %v10079_v19 = vshll.u32 %v8989_v52, 16  ;;  %v4239_v52 = vrot.slane %v3565_v34, 7 }
 0x342   : > { %v9417_v22 = vsel %vm792_vm1, %v4183_v25, %v4190_v46  ;;  %v3389_v25 = vld [vmem:[#allocation2 + $0x198] sm:$0x80]  ;;  %v3438_v46 = vrot.slane %v9953_v23, 1  ;;  %v4250_v23 = vshll.u32 %v3567_v15, 16 }
 0x343   : > { %5594 = vmatpush1.bf16.msra.mxu0 %v9388_v20  ;;  %v4205_v24 = vshrl.u32 %v3389_v25, 16  ;;  %v7138_v25 = vld [vmem:[%s9863_s4 + $0x220] sm:$0xff]  }
 0x344   : > { %4725 = vmatmul.mubr.bf16.gmra.mrb[52].mxu1 %v9395_v26  ;;  %6813 = vmatprep.subr.bf16.mxu0 %v7130_v58  ;;  %v4174_v26 = vshrl.u32 %v3387_v40, 16  ;;  %v4247_v40 = vshrl.u32 %v3567_v15, 16  ;;  %v3391_v15 = vld [vmem:[#allocation2 + $0x1b0] sm:$0x80] }
 0x345   : > { %4730 = vmatprep.mubr.bf16.mxu1 %v9400_v27  ;;  %v9414_v27 = vsel %vm792_vm1, %v4145_v54, %v4147_v48  ;;  %v4221_v48 = vor.u32 %v4219_v36, %v4218_v8  ;;  %v4243_v36 = vshrl.u32 %v3564_v11, 16  ;;  %v4209_v11 = vor.u32 %v4208_v10, %v10079_v19 }
 0x346   : > { %6810 = vmatmul.mubr.bf16.gmra.mrb[68].mxu0 %v9057_v53  ;;  %v4176_v54 = vrot.slane %v4174_v26, 7  ;;  %v4249_v63 = vrot.slane %v4247_v40, 7  ;;  %v3441_v53 = vor.u32 %v3439_v16, %v3438_v46  ;;  %v10081_v19 = vshll.u32 %v9001_v56, 16 }
 0x347   : > { %5595 = vmatprep.mubr.bf16.mxu0 %v8932_v42  ;;  %v9439_v8 = vsel %vm792_vm1, %v4214_v12, %v4221_v48 }
 0x348   : > { %v9436_v26 = vsel %vm792_vm1, %v4176_v54, %v4178_v61  ;;  %v4207_v54 = vrot.slane %v4205_v24, 7  ;;  %v4245_v61 = vrot.slane %v4243_v36, 7  ;;  %v4252_v12 = vor.u32 %v4250_v23, %v4249_v63 }
 0x349   : > { %v3689_v48 = vshrl.u32 %v3441_v53, 16  ;;  %v4236_v24 = vshrl.u32 %v3391_v15, 16  ;;  %v3685_v36 = vshrl.u32 %v3438_v46, 16  ;;  %v3692_v63 = vshll.u32 %v3441_v53, 16  ;;  %v10082_v53 = vld [vmem:[#allocation38_spill] sm:$0xff] }
 0x34a   : > { %v9454_v40 = vsel %vm792_vm1, %v4207_v54, %v4209_v11  ;;  %v9457_v10 = vsel %vm792_vm1, %v4245_v61, %v4252_v12  ;;  %v4240_v34 = vor.u32 %v4239_v52, %v10081_v19  ;;  %v3355_v61 = vld [vmem:[#allocation2] sm:$0x80]  ;;  %v10083_v52 = vshll.u32 %v9037_v28, 16  ;;  %v10085_v28 = vld [vmem:[#allocation29_spill] sm:$0xff] }
 0x34b   : > { %v3691_v23 = vrot.slane %v3689_v48, 7  ;;  %v4238_v54 = vrot.slane %v4236_v24, 7  ;;  %v3687_v11 = vrot.slane %v3685_v36, 7  ;;  %v3678_v15 = vshrl.u32 %v3355_v61, 16 }
 0x34c   : > { %4731 = vmatmul.mubr.bf16.gmra.mrb[56].mxu1 %v9414_v27  ;;  %v3681_v48 = vrot.slane %v3439_v16, 7 }
 0x34d   : > { %4736 = vmatprep.mubr.bf16.mxu1 %v9417_v22  ;;  %v3694_v46 = vor.u32 %v3692_v63, %v3691_v23  ;;  %v9472_v12 = vsel %vm792_vm1, %v4238_v54, %v4240_v34  ;;  %v3680_v24 = vrot.slane %v3678_v15, 7  ;;  %v10084_v23 = vld [vmem:[#allocation26_spill] sm:$0xff] }
 0x34e   : > { %5596 = vmatmul.mubr.bf16.vlgmr.msra.gmra.mrb[72].mxu0 %v8962_v2  ;;  %v3682_v36 = vor.u32 %v3681_v48, %v10083_v52 }
 0x34f   : > { %6814 = vmatpush3.bf16.msra.mxu0 %v7130_v58  ;;  %5601 = vmatprep.mubr.bf16.mxu0 %v8974_v21  ;;  %v7137_v58 = vld [vmem:[%s9863_s4 + $0x218] sm:$0xff]   ;;  %v3695_v56 = vsel %vm792_vm1, %v3687_v11, %v3694_v46 }
 0x350   : > { %6815 = vmatprep.subr.bf16.mxu0 %v7133_v18  ;;  %v3683_v16 = vsel %vm792_vm1, %v3680_v24, %v3682_v36 }
 0x353   : > { %6816 = vmatpush3.bf16.msra.mxu0 %v7133_v18  ;;  %v10080_v18 = vld [vmem:[#allocation34_spill] sm:$0xff] }
 0x354   : > { %4737 = vmatmul.mubr.bf16.gmra.mrb[60].mxu1 %v9436_v26  ;;  %6817 = vmatprep.subr.bf16.mxu0 %v7136_v7 }
 0x355   : > { %4742 = vmatprep.mubr.bf16.mxu1 %v9439_v8 }
 0x356   : > { %5602 = vmatmul.mubr.bf16.gmra.mrb[76].mxu0 %v9004_v29 }
 0x357   : > { %5607 = vmatprep.mubr.bf16.mxu0 %v10080_v18  ;;  %6818 = vmatpush3.bf16.msra.mxu0 %v7136_v7  ;;  %v7139_v7 = vld [vmem:[%s9863_s4 + $0x228] sm:$0xff]  }
 0x358   : > { %6819 = vmatprep.subr.bf16.mxu0 %v7137_v58 }
 0x35b   : > { %6820 = vmatpush3.bf16.msra.mxu0 %v7137_v58  ;;  %v7140_v58 = vld [vmem:[%s9863_s4 + $0x230] sm:$0xff]  }
 0x35c   : > { %4743 = vmatmul.mubr.bf16.gmra.mrb[64].mxu1 %v9454_v40  ;;  %6821 = vmatprep.subr.bf16.mxu0 %v7138_v25 }
 0x35d   : > { %4748 = vmatprep.mubr.bf16.mxu1 %v9457_v10 }
 0x35e   : > { %5608 = vmatmul.mubr.bf16.gmra.mrb[80].mxu0 %v9040_v13 }
 0x35f   : > { %5613 = vmatprep.mubr.bf16.mxu0 %v10082_v53  ;;  %6822 = vmatpush3.bf16.msra.mxu0 %v7138_v25  ;;  %v7141_v25 = vld [vmem:[%s9863_s4 + $0x238] sm:$0xff]  }
 0x360   : > { %6823 = vmatprep.subr.bf16.mxu0 %v7139_v7 }
 0x363   : > { %6824 = vmatpush3.bf16.msra.mxu0 %v7139_v7 }
 0x364   : > { %4749 = vmatmul.mubr.bf16.gmra.mrb[68].mxu1 %v9472_v12  ;;  %6825 = vmatprep.subr.bf16.mxu0 %v7140_v58 }
 0x365   : > { %5088 = vmatprep.mubr.bf16.mxu1 %v3695_v56 }
 0x366   : > { %5614 = vmatmul.mubr.bf16.gmra.mrb[84].mxu0 %v9070_v60 }
 0x367   : > { %5619 = vmatprep.mubr.bf16.mxu0 %v9080_v39  ;;  %6826 = vmatpush3.bf16.msra.mxu0 %v7140_v58 }
 0x368   : > { %6827 = vmatprep.subr.bf16.mxu0 %v7141_v25 }
 0x36b   : > { %6828 = vmatpush3.bf16.msra.mxu0 %v7141_v25 }
 0x36c   : > { %5089 = vmatmul.mubr.bf16.vlgmr.msra.gmra.mrb[72].mxu1 %v3683_v16 }
 0x36d   : > { %5094 = vmatprep.mubr.bf16.mxu1 %v10084_v23  ;;  %6897 = vmatpush1.bf16.msra.mxu1 %v9120_v3 }
 0x36e   : > { %5620 = vmatmul.mubr.bf16.gmra.mrb[88].mxu0 %v9105_v33  ;;  %6882 = vmatprep.subr.bf16.mxu1 %v10034_v57 }
 0x36f   : > { %5625 = vmatprep.mubr.bf16.mxu0 %v9111_v51 }
 0x371   : > { %6898 = vmatpush1.bf16.msra.mxu1 %v9138_v49 }
 0x372   : > { %6883 = vmatprep.subr.bf16.mxu1 %v10034_v57 }
 0x374   : > { %5095 = vmatmul.mubr.bf16.gmra.mrb[76].mxu1 %v10085_v28 }
 0x375   : > { %5100 = vmatprep.mubr.bf16.mxu1 %v8932_v42  ;;  %6899 = vmatpush1.bf16.msra.mxu1 %v9161_v37 }
 0x376   : > { %5626 = vmatmul.mubr.bf16.gmra.mrb[44].mxu0 %v9143_v62  ;;  %6884 = vmatprep.subr.bf16.mxu1 %v10034_v57 }
 0x377   : > { %5633 = vmatprep.mubr.bf16.mxu0 %v9152_v59 }
 0x379   : > { %6900 = vmatpush1.bf16.msra.mxu1 %v9183_v35 }
 0x37a   : > { %6885 = vmatprep.subr.bf16.mxu1 %v10034_v57 }
 0x37c   : > { %5101 = vmatmul.mubr.bf16.gmra.mrb[80].mxu1 %v8962_v2  ;;  %v10086_v2 = vld [vmem:[#allocation41_spill] sm:$0xff] }
 0x37d   : > { %5106 = vmatprep.mubr.bf16.mxu1 %v8974_v21  ;;  %6901 = vmatpush1.bf16.msra.mxu1 %v9206_v50 }
 0x37e   : > { %5634 = vmatmul.mubr.bf16.gmra.mrb[92].mxu0 %v9187_v5  ;;  %6886 = vmatprep.subr.bf16.mxu1 %v10034_v57 }
 0x37f   : > { %5641 = vmatprep.mubr.bf16.mxu0 %v9198_v0 }
 0x381   : > { %6902 = vmatpush1.bf16.msra.mxu1 %v9226_v32 }
 0x382   : > { %6887 = vmatprep.subr.bf16.mxu1 %v10034_v57 }
 0x384   : > { %5107 = vmatmul.mubr.bf16.gmra.mrb[84].mxu1 %v9004_v29 }
 0x385   : > { %5112 = vmatprep.mubr.bf16.mxu1 %v10080_v18  ;;  %6903 = vmatpush1.bf16.msra.mxu1 %v9246_v14  ;;  %v10089_v14 = vld [vmem:[#allocation44_spill] sm:$0xff] }
 0x386   : > { %5642 = vmatmul.mubr.bf16.gmra.mrb[96].mxu0 %v9230_v17  ;;  %6888 = vmatprep.subr.bf16.mxu1 %v10034_v57 }
 0x387   : > { %5649 = vmatprep.mubr.bf16.mxu0 %v9236_v30 }
 0x389   : > { %6904 = vmatpush1.bf16.msra.mxu1 %v9262_v47 }
 0x38a   : > { %6889 = vmatprep.subr.bf16.mxu1 %v10034_v57 }
 0x38c   : > { %5113 = vmatmul.mubr.bf16.gmra.mrb[88].mxu1 %v9040_v13 }
 0x38d   : > { %5118 = vmatprep.mubr.bf16.mxu1 %v10082_v53  ;;  %6905 = vmatpush1.bf16.msra.mxu1 %v9278_v31 }
 0x38e   : > { %5650 = vmatmul.mubr.bf16.gmra.mrb[100].mxu0 %v9266_v1  ;;  %6890 = vmatprep.subr.bf16.mxu1 %v10034_v57 }
 0x38f   : > { %5657 = vmatprep.mubr.bf16.mxu0 %v9271_v9 }
 0x390   : > { %v6727_v42 = vpop.f32.mrb[0].mxu0 }
 0x391   : > { %6906 = vmatpush1.bf16.msra.mxu1 %v10086_v2  ;;  %v4789_v21 = vpop.f32.mrb[1].mxu0  ;;  %v10093_v2 = vld [vmem:[#allocation21_spill] sm:$0xff] }
 0x392   : > { %6891 = vmatprep.subr.bf16.mxu1 %v10034_v57  ;;  %v6728_v29 = vpop.f32.mrb[2].mxu0 }
 0x393   : > { %v4791_v3 = vpop.f32.mrb[3].mxu0 }
 0x394   : > { %5119 = vmatmul.mubr.bf16.gmra.mrb[92].mxu1 %v9070_v60  ;;  %v10087_v60 = vld [vmem:[#allocation42_spill] sm:$0xff] }
 0x395   : > { %5126 = vmatprep.mubr.bf16.mxu1 %v9080_v39  ;;  %6907 = vmatpush1.bf16.msra.mxu1 %v9310_v43 }
 0x396   : > { %5658 = vmatmul.mubr.bf16.gmra.mrb[104].mxu0 %v9298_v38  ;;  %6892 = vmatprep.subr.bf16.mxu1 %v10034_v57 }
 0x397   : > { %5665 = vmatprep.mubr.bf16.mxu0 %v9303_v41 }
 0x398   : > { %v6731_v13 = vpop.f32.mrb[4].mxu0 }
 0x399   : > { %6908 = vmatpush1.bf16.msra.mxu1 %v9326_v6  ;;  %v4801_v49 = vpop.f32.mrb[5].mxu0 }
 0x39a   : > { %6893 = vmatprep.subr.bf16.mxu1 %v10034_v57  ;;  %v6732_v37 = vpop.f32.mrb[6].mxu0 }
 0x39b   : > { %v4803_v35 = vpop.f32.mrb[7].mxu0 }
 0x39c   : > { %5127 = vmatmul.mubr.bf16.gmra.mrb[96].mxu1 %v9105_v33 }
 0x39d   : > { %5134 = vmatprep.mubr.bf16.mxu1 %v9111_v51  ;;  %6909 = vmatpush1.bf16.msra.mxu1 %v9342_v45  ;;  %v10088_v51 = vld [vmem:[#allocation43_spill] sm:$0xff] }
 0x39e   : > { %5666 = vmatmul.mubr.bf16.gmra.mrb[108].mxu0 %v9330_v55  ;;  %6894 = vmatprep.subr.bf16.mxu1 %v10034_v57 }
 0x39f   : > { %5673 = vmatprep.mubr.bf16.mxu0 %v10087_v60 }
 0x3a0   : > { %v9537_v39 = vpop.f32.mrb[8].mxu0 }
 0x3a1   : > { %6910 = vmatpush1.bf16.msra.mxu1 %v9358_v44  ;;  %v4813_v50 = vpop.f32.mrb[9].mxu0 }
 0x3a2   : > { %6895 = vmatprep.subr.bf16.mxu1 %v10034_v57  ;;  %v9541_v32 = vpop.f32.mrb[10].mxu0  ;;  %v10095_v50 = vld [vmem:[#allocation23_spill] sm:$0xff] }
 0x3a3   : > { %v4815_v33 = vpop.f32.mrb[11].mxu0 }
 0x3a4   : > { %5135 = vmatmul.mubr.bf16.gmra.mrb[100].mxu1 %v9143_v62  ;;  %v10090_v62 = vld [vmem:[#allocation45_spill] sm:$0xff] }
 0x3a5   : > { %5142 = vmatprep.mubr.bf16.mxu1 %v9152_v59  ;;  %6911 = vmatpush1.bf16.msra.mxu1 %v9372_v4  ;;  %v10091_v59 = vld [vmem:[#allocation46_spill] sm:$0xff] }
 0x3a6   : > { %5674 = vmatmul.mubr.bf16.gmra.mrb[112].mxu0 %v10088_v51  ;;  %6896 = vmatprep.subr.bf16.mxu1 %v10034_v57 }
 0x3a7   : > { %5681 = vmatprep.mubr.bf16.mxu0 %v10089_v14 }
 0x3a8   : > { %v9549_v47 = vpop.f32.mrb[12].mxu0 }
 0x3a9   : > { %6912 = vmatpush1.bf16.msra.mxu1 %v9388_v20  ;;  %v9552_v31 = vpop.f32.mrb[13].mxu0 }
 0x3aa   : > { %v9554_v43 = vpop.f32.mrb[14].mxu0 }
 0x3ab   : > { %v9556_v6 = vpop.f32.mrb[15].mxu0 }
 0x3ac   : > { %5143 = vmatmul.mubr.bf16.gmra.mrb[104].mxu1 %v9187_v5 }
 0x3ad   : > { %5150 = vmatprep.mubr.bf16.mxu1 %v9198_v0 }
 0x3ae   : > { %5682 = vmatmul.mubr.bf16.gmra.mrb[116].mxu0 %v10090_v62 }
 0x3af   : > { %5689 = vmatprep.mubr.bf16.mxu0 %v10091_v59  ;;  %v4632_v57 = vpop.f32.mrb[0].mxu1 }
 0x3b0   : > { %v4633_v4 = vpop.f32.mrb[1].mxu1 }
 0x3b1   : > { %v9562_v45 = vpop.f32.mrb[16].mxu0  ;;  %v4634_v44 = vpop.f32.mrb[2].mxu1 }
 0x3b2   : > { %v9564_v20 = vpop.f32.mrb[17].mxu0  ;;  %v4635_v18 = vpop.f32.mrb[3].mxu1 }
 0x3b3   : > { %v9566_v63 = vpop.f32.mrb[18].mxu0 }
 0x3b4   : > { %v9568_v7 = vpop.f32.mrb[19].mxu0  ;;  %5151 = vmatmul.mubr.bf16.gmra.mrb[108].mxu1 %v9230_v17 }
 0x3b5   : > { %5158 = vmatprep.mubr.bf16.mxu1 %v9236_v30 }
 0x3b6   : > { %5690 = vmatmul.mubr.bf16.gmra.mrb[120].mxu0 %v9414_v27 }
 0x3b7   : > { %5695 = vmatprep.mubr.bf16.mxu0 %v9417_v22  ;;  %v4638_v5 = vpop.f32.mrb[4].mxu1 }
 0x3b8   : > { %v4639_v0 = vpop.f32.mrb[5].mxu1 }
 0x3b9   : > { %v9574_v54 = vpop.f32.mrb[20].mxu0  ;;  %v4640_v19 = vpop.f32.mrb[6].mxu1 }
 0x3ba   : > { %v9576_v34 = vpop.f32.mrb[21].mxu0  ;;  %v4641_v11 = vpop.f32.mrb[7].mxu1 }
 0x3bb   : > { %v9578_v46 = vpop.f32.mrb[22].mxu0 }
 0x3bc   : > { %v9580_v61 = vpop.f32.mrb[23].mxu0  ;;  %5159 = vmatmul.mubr.bf16.gmra.mrb[112].mxu1 %v9266_v1  ;;  %v10092_v1 = vld [vmem:[#allocation20_spill] sm:$0xff] }
 0x3bd   : > { %5166 = vmatprep.mubr.bf16.mxu1 %v9271_v9 }
 0x3be   : > { %5696 = vmatmul.mubr.bf16.gmra.mrb[124].mxu0 %v9436_v26 }
 0x3bf   : > { %5701 = vmatprep.mubr.bf16.mxu0 %v9439_v8  ;;  %v4644_v30 = vpop.f32.mrb[8].mxu1 }
 0x3c0   : > { %v4645_v17 = vpop.f32.mrb[9].mxu1  ;;  %v10098_v30 = vld [vmem:[#allocation27_spill] sm:$0xff] }
 0x3c1   : > { %v6751_v53 = vpop.f32.mrb[24].mxu0  ;;  %v4646_v58 = vpop.f32.mrb[10].mxu1 }
 0x3c2   : > { %v9586_v15 = vpop.f32.mrb[25].mxu0  ;;  %v4647_v48 = vpop.f32.mrb[11].mxu1 }
 0x3c3   : > { %v6752_v56 = vpop.f32.mrb[26].mxu0 }
 0x3c4   : > { %v9588_v25 = vpop.f32.mrb[27].mxu0  ;;  %5167 = vmatmul.mubr.bf16.gmra.mrb[116].mxu1 %v9298_v38 }
 0x3c5   : > { %5174 = vmatprep.mubr.bf16.mxu1 %v9303_v41  ;;  %v10094_v41 = vld [vmem:[#allocation22_spill] sm:$0xff] }
 0x3c6   : > { %5702 = vmatmul.mubr.bf16.gmra.mrb[128].mxu0 %v9454_v40 }
 0x3c7   : > { %6829 = vmatprep.mubr.bf16.mxu0 %v10092_v1  ;;  %v4650_v9 = vpop.f32.mrb[12].mxu1 }
 0x3c8   : > { %v4651_v24 = vpop.f32.mrb[13].mxu1 }
 0x3c9   : > { %v6755_v52 = vpop.f32.mrb[28].mxu0  ;;  %v4652_v36 = vpop.f32.mrb[14].mxu1  ;;  %v10099_v24 = vld [vmem:[#allocation28_spill] sm:$0xff] }
 0x3ca   : > { %v4889_v16 = vpop.f32.mrb[29].mxu0  ;;  %v4653_v23 = vpop.f32.mrb[15].mxu1 }
 0x3cb   : > { %v6756_v28 = vpop.f32.mrb[30].mxu0  ;;  %v10100_v16 = vld [vmem:[#allocation30_spill] sm:$0xff] }
 0x3cc   : > { %v4891_v42 = vpop.f32.mrb[31].mxu0  ;;  %5175 = vmatmul.mubr.bf16.gmra.mrb[120].mxu1 %v9330_v55 }
 0x3cd   : > { %5182 = vmatprep.mubr.bf16.mxu1 %v10087_v60  ;;  %v10096_v60 = vld [vmem:[#allocation24_spill] sm:$0xff] }
 0x3ce   : > { %6830 = vmatmul.mubr.bf16.vlgmr.msra.gmra.mrb[132].mxu0 %v10093_v2 }
 0x3cf   : > { %v4656_v38 = vpop.f32.mrb[16].mxu1  ;;  %6833 = vmatprep.mubr.bf16.mxu0 %v10094_v41 }
 0x3d0   : > { %v4657_v21 = vpop.f32.mrb[17].mxu1 }
 0x3d1   : > { %v6759_v29 = vpop.f32.mrb[32].mxu0  ;;  %v4658_v3 = vpop.f32.mrb[18].mxu1  ;;  %v10102_v21 = vld [vmem:[#allocation32_spill] sm:$0xff] }
 0x3d2   : > { %v4901_v13 = vpop.f32.mrb[33].mxu0  ;;  %v4659_v49 = vpop.f32.mrb[19].mxu1 }
 0x3d3   : > { %v6760_v37 = vpop.f32.mrb[34].mxu0 }
 0x3d4   : > { %v4903_v35 = vpop.f32.mrb[35].mxu0  ;;  %5183 = vmatmul.mubr.bf16.gmra.mrb[124].mxu1 %v10088_v51 }
 0x3d5   : > { %5188 = vmatprep.mubr.bf16.mxu1 %v10089_v14  ;;  %v10097_v14 = vld [vmem:[#allocation25_spill] sm:$0xff] }
 0x3d6   : > { %6834 = vmatmul.mubr.bf16.gmra.mrb[136].mxu0 %v10095_v50 }
 0x3d7   : > { %v4662_v55 = vpop.f32.mrb[20].mxu1  ;;  %6837 = vmatprep.mubr.bf16.mxu0 %v10096_v60  ;;  %v10103_v60 = vld [vmem:[#allocation33_spill] sm:$0xff] }
 0x3d8   : > { %v9603_v33 = vadd.f32 %v9537_v39, %v4662_v55  ;;  %v4664_v57 = vpop.f32.mrb[21].mxu1  ;;  %v9612_v39 = vld [vmem:[#allocation2 + $0x1d0] sm:$0xff] }
 0x3d9   : > { %v6779_v4 = vpop.f32.mrb[36].mxu0  ;;  %v4665_v44 = vpop.f32.mrb[22].mxu1  ;;  %v3572_v52 = vshrl.u32 %v9612_v39, 16 }
 0x3da   : > { %v9606_v18 = vadd.f32 %v9541_v32, %v4665_v44  ;;  %v5247_v5 = vpop.f32.mrb[37].mxu0  ;;  %v4667_v0 = vpop.f32.mrb[23].mxu1  ;;  %v3393_v4 = vld [vmem:[#allocation2 + $0x1c8] sm:$0x80] }
 0x3db   : > { %v6780_v19 = vpop.f32.mrb[38].mxu0  ;;  %v10104_v5 = vld [vmem:[#allocation35_spill] sm:$0xff] }
 0x3dc   : > { %v5249_v51 = vpop.f32.mrb[39].mxu0  ;;  %5189 = vmatmul.mubr.bf16.gmra.mrb[128].mxu1 %v10090_v62 }
 0x3dd   : > { %5194 = vmatprep.mubr.bf16.mxu1 %v10091_v59  ;;  %v3569_v59 = vshll.u32 %v9612_v39, 16  ;;  %v3673_v51 = vrot.slane %v9612_v39, 1 }
 0x3de   : > { %6838 = vmatmul.mubr.bf16.gmra.mrb[44].mxu0 %v10097_v14 }
 0x3df   : > { %v4670_v11 = vpop.f32.mrb[24].mxu1  ;;  %6841 = vmatprep.mubr.bf16.mxu0 %v10098_v30  ;;  %v4270_v30 = vrot.slane %v3572_v52, 7 }
 0x3e0   : > { %v9615_v17 = vadd.f32 %v9552_v31, %v4670_v11  ;;  %v4672_v32 = vpop.f32.mrb[25].mxu1  ;;  %v3571_v31 = vrot.slane %v3569_v59, 1 }
 0x3e1   : > { %v6783_v53 = vpop.f32.mrb[40].mxu0  ;;  %v4673_v58 = vpop.f32.mrb[26].mxu1 }
 0x3e2   : > { %v9618_v48 = vadd.f32 %v9556_v6, %v4673_v58  ;;  %v5259_v56 = vpop.f32.mrb[41].mxu0  ;;  %v4675_v62 = vpop.f32.mrb[27].mxu1 }
 0x3e3   : > { %v6784_v1 = vpop.f32.mrb[42].mxu0 }
 0x3e4   : > { %v5261_v9 = vpop.f32.mrb[43].mxu0  ;;  %5195 = vmatmul.mubr.bf16.gmra.mrb[132].mxu1 %v9414_v27  ;;  %v3574_v27 = vor.u32 %v3572_v52, %v3571_v31 }
 0x3e5   : > { %5200 = vmatprep.mubr.bf16.mxu1 %v9417_v22  ;;  %v10101_v22 = vld [vmem:[#allocation31_spill] sm:$0xff]  ;;  %v4271_v9 = vor.u32 %v4270_v30, %v3569_v59 }
 0x3e6   : > { %6842 = vmatmul.mubr.bf16.gmra.mrb[140].mxu0 %v10099_v24  ;;  %v4278_v38 = vshrl.u32 %v3574_v27, 16  ;;  %v4281_v35 = vshll.u32 %v3574_v27, 16  ;;  %v10105_v24 = vld [vmem:[#allocation36_spill] sm:$0xff] }
 0x3e7   : > { %v4678_v36 = vpop.f32.mrb[28].mxu1  ;;  %6845 = vmatprep.mubr.bf16.mxu0 %v10100_v16 }
 0x3e8   : > { %v9627_v6 = vadd.f32 %v9549_v47, %v4678_v36  ;;  %v4680_v23 = vpop.f32.mrb[29].mxu1  ;;  %v4280_v37 = vrot.slane %v4278_v38, 7  ;;  %v4286_v38 = vshrl.u32 %v3673_v51, 16 }
 0x3e9   : > { %v4681_v28 = vpop.f32.mrb[30].mxu1 }
 0x3ea   : > { %v9630_v42 = vadd.f32 %v9554_v43, %v4681_v28  ;;  %v4683_v2 = vpop.f32.mrb[31].mxu1 }
 0x3ec   : > { %5201 = vmatmul.mubr.bf16.gmra.mrb[136].mxu1 %v9436_v26 }
 0x3ed   : > { %5206 = vmatprep.mubr.bf16.mxu1 %v9439_v8  ;;  %v4274_v8 = vshrl.u32 %v3571_v31, 16  ;;  %v10106_v31 = vld [vmem:[#allocation37_spill] sm:$0xff] }
 0x3ee   : > { %6846 = vmatmul.mubr.bf16.gmra.mrb[144].mxu0 %v10101_v22 }
 0x3ef   : > { %v4686_v41 = vpop.f32.mrb[32].mxu1  ;;  %6849 = vmatprep.mubr.bf16.mxu0 %v10102_v21  ;;  %v4276_v57 = vrot.slane %v4274_v8, 7  ;;  %v4288_v8 = vrot.slane %v4286_v38, 7 }
 0x3f0   : > { %v9637_v47 = vadd.f32 %v9564_v20, %v4686_v41  ;;  %v4688_v29 = vpop.f32.mrb[33].mxu1  ;;  %v3434_v20 = vld [vmem:[#allocation2 + $0x1d8] sm:$0x1] }
 0x3f1   : > { %v9639_v3 = vpop.f32.mrb[48].mxu0  ;;  %v4689_v43 = vpop.f32.mrb[34].mxu1  ;;  %v3674_v14 = vrot.slane %v3434_v20, 1 }
 0x3f2   : > { %v9642_v13 = vadd.f32 %v9568_v7, %v4689_v43  ;;  %v9644_v49 = vpop.f32.mrb[49].mxu0  ;;  %v4691_v26 = vpop.f32.mrb[35].mxu1  ;;  %v4283_v7 = vor.u32 %v4281_v35, %v4280_v37 }
 0x3f3   : > { %v9646_v50 = vpop.f32.mrb[50].mxu0  ;;  %v3675_v39 = vsel %vm731_vm0, %v3673_v51, %v3674_v14  ;;  %v10108_v26 = vld [vmem:[#allocation40_spill] sm:$0xff] }
 0x3f4   : > { %v9648_v55 = vpop.f32.mrb[51].mxu0  ;;  %5207 = vmatmul.mubr.bf16.gmra.mrb[140].mxu1 %v9454_v40  ;;  %v4284_v56 = vsel %vm792_vm1, %v4276_v57, %v4283_v7  ;;  %v4290_v52 = vshrl.u32 %v3675_v39, 16  ;;  %v4293_v21 = vshll.u32 %v3675_v39, 16 }
 0x3f5   : > { %5707 = vmatprep.mubr.bf16.mxu1 %v9457_v10  ;;  %v4267_v10 = vshrl.u32 %v3393_v4, 16 }
 0x3f6   : > { %6850 = vmatmul.mubr.bf16.gmra.mrb[148].mxu0 %v10103_v60  ;;  %v4292_v41 = vrot.slane %v4290_v52, 7 }
 0x3f7   : > { %v4694_v44 = vpop.f32.mrb[36].mxu1  ;;  %6853 = vmatprep.mubr.bf16.mxu0 %v10104_v5  ;;  %v4269_v1 = vrot.slane %v4267_v10, 7 }
 0x3f8   : > { %v9655_v0 = vadd.f32 %v9562_v45, %v4694_v44  ;;  %v4696_v19 = vpop.f32.mrb[37].mxu1  ;;  %v4295_v37 = vor.u32 %v4293_v21, %v4292_v41 }
 0x3f9   : > { %v9658_v11 = vpop.f32.mrb[52].mxu0  ;;  %v4697_v40 = vpop.f32.mrb[38].mxu1 }
 0x3fa   : > { %v9661_v32 = vadd.f32 %v9566_v63, %v4697_v40  ;;  %v9663_v53 = vpop.f32.mrb[53].mxu0  ;;  %v4699_v58 = vpop.f32.mrb[39].mxu1  ;;  %v4296_v5 = vsel %vm792_vm1, %v4288_v8, %v4295_v37 }
 0x3fb   : > { %v9666_v62 = vpop.f32.mrb[54].mxu0 }
 0x3fc   : > { %v9668_v45 = vpop.f32.mrb[55].mxu0  ;;  %5708 = vmatmul.mubr.bf16.vlgmr.msra.gmra.mrb[144].mxu1 %v9472_v12  ;;  %v4272_v12 = vsel %vm792_vm1, %v4269_v1, %v4271_v9 }
 0x3fd   : > { %5713 = vmatprep.mubr.bf16.mxu1 %v4284_v56 }
 0x3fe   : > { %6854 = vmatmul.mubr.bf16.gmra.mrb[152].mxu0 %v10105_v24 }
 0x3ff   : > { %v4702_v63 = vpop.f32.mrb[40].mxu1  ;;  %6857 = vmatprep.mubr.bf16.mxu0 %v10106_v31 }
 0x400   : > { %v9675_v36 = vadd.f32 %v9576_v34, %v4702_v63  ;;  %v4704_v16 = vpop.f32.mrb[41].mxu1  ;;  %v10107_v34 = vld [vmem:[#allocation39_spill] sm:$0xff] }
 0x401   : > { %v9677_v23 = vpop.f32.mrb[56].mxu0  ;;  %v4705_v28 = vpop.f32.mrb[42].mxu1 }
 0x402   : > { %v9681_v2 = vadd.f32 %v9580_v61, %v4705_v28  ;;  %v9683_v27 = vpop.f32.mrb[57].mxu0  ;;  %v4707_v59 = vpop.f32.mrb[43].mxu1 }
 0x403   : > { %v9685_v22 = vpop.f32.mrb[58].mxu0 }
 0x404   : > { %v9687_v29 = vpop.f32.mrb[59].mxu0  ;;  %5714 = vmatmul.mubr.bf16.gmra.mrb[148].mxu1 %v4272_v12 }
 0x406   : > { %6858 = vmatmul.mubr.bf16.gmra.mrb[156].mxu0 %v10107_v34 }
 0x407   : > { %v4710_v43 = vpop.f32.mrb[44].mxu1  ;;  %6861 = vmatprep.mubr.bf16.mxu0 %v10108_v26 }
 0x408   : > { %v9692_v61 = vadd.f32 %v9574_v54, %v4710_v43  ;;  %v4712_v35 = vpop.f32.mrb[45].mxu1 }
 0x409   : > { %v6803_v20 = vpop.f32.mrb[60].mxu0  ;;  %v4713_v60 = vpop.f32.mrb[46].mxu1 }
 0x40a   : > { %v9695_v57 = vadd.f32 %v9578_v46, %v4713_v60  ;;  %v9697_v7 = vpop.f32.mrb[61].mxu0  ;;  %v4715_v4 = vpop.f32.mrb[47].mxu1 }
 0x40b   : > { %v6804_v44 = vpop.f32.mrb[62].mxu0 }
 0x40c   : > { %v9700_v19 = vpop.f32.mrb[63].mxu0 }
 0x40e   : > { %6862 = vmatmul.mubr.bf16.gmra.mrb[160].mxu0 %v4296_v5 }
 0x40f   : > { %v4718_v51 = vpop.f32.mrb[48].mxu1 }
 0x410   : > { %v9703_v14 = vadd.f32 %v9586_v15, %v4718_v51  ;;  %v4720_v54 = vpop.f32.mrb[49].mxu1 }
 0x411   : > { %v6807_v40 = vpop.f32.mrb[64].mxu0  ;;  %v4721_v10 = vpop.f32.mrb[50].mxu1 }
 0x412   : > { %v9706_v30 = vadd.f32 %v9588_v25, %v4721_v10  ;;  %v5347_v46 = vpop.f32.mrb[65].mxu0  ;;  %v4723_v58 = vpop.f32.mrb[51].mxu1 }
 0x413   : > { %v6808_v56 = vpop.f32.mrb[66].mxu0 }
 0x414   : > { %v5349_v39 = vpop.f32.mrb[67].mxu0 }
 0x417   : > { %v4726_v1 = vpop.f32.mrb[52].mxu1 }
 0x418   : > { %v4727_v9 = vpop.f32.mrb[53].mxu1 }
 0x419   : > { %v6811_v24 = vpop.f32.mrb[68].mxu0  ;;  %v4728_v63 = vpop.f32.mrb[54].mxu1 }
 0x41a   : > { %v5359_v31 = vpop.f32.mrb[69].mxu0  ;;  %v4729_v52 = vpop.f32.mrb[55].mxu1 }
 0x41b   : > { %v6812_v16 = vpop.f32.mrb[70].mxu0 }
 0x41c   : > { %v5361_v28 = vpop.f32.mrb[71].mxu0 }
 0x41f   : > { %v4732_v15 = vpop.f32.mrb[56].mxu1 }
 0x420   : > { %v4733_v12 = vpop.f32.mrb[57].mxu1 }
 0x421   : > { %v5597_v59 = vpop.f32.mrb[72].mxu0  ;;  %v4734_v38 = vpop.f32.mrb[58].mxu1 }
 0x422   : > { %v5598_v41 = vpop.f32.mrb[73].mxu0  ;;  %v4735_v21 = vpop.f32.mrb[59].mxu1 }
 0x423   : > { %v5599_v25 = vpop.f32.mrb[74].mxu0 }
 0x424   : > { %v5600_v34 = vpop.f32.mrb[75].mxu0 }
 0x427   : > { %v4738_v43 = vpop.f32.mrb[60].mxu1 }
 0x428   : > { %v4739_v26 = vpop.f32.mrb[61].mxu1 }
 0x429   : > { %v5603_v8 = vpop.f32.mrb[76].mxu0  ;;  %v4740_v37 = vpop.f32.mrb[62].mxu1 }
 0x42a   : > { %v5604_v35 = vpop.f32.mrb[77].mxu0  ;;  %v4741_v20 = vpop.f32.mrb[63].mxu1 }
 0x42b   : > { %v5605_v60 = vpop.f32.mrb[78].mxu0 }
 0x42c   : > { %v5606_v4 = vpop.f32.mrb[79].mxu0 }
 0x42f   : > { %v4744_v44 = vpop.f32.mrb[64].mxu1 }
 0x430   : > { %v4745_v5 = vpop.f32.mrb[65].mxu1 }
 0x431   : > { %v5609_v51 = vpop.f32.mrb[80].mxu0  ;;  %v4746_v54 = vpop.f32.mrb[66].mxu1 }
 0x432   : > { %v5610_v40 = vpop.f32.mrb[81].mxu0  ;;  %v4747_v10 = vpop.f32.mrb[67].mxu1 }
 0x433   : > { %v5611_v46 = vpop.f32.mrb[82].mxu0 }
 0x434   : > { %v5612_v58 = vpop.f32.mrb[83].mxu0 }
 0x437   : > { %v4750_v56 = vpop.f32.mrb[68].mxu1 }
 0x438   : > { %v4751_v39 = vpop.f32.mrb[69].mxu1 }
 0x439   : > { %v5615_v1 = vpop.f32.mrb[84].mxu0  ;;  %v4752_v9 = vpop.f32.mrb[70].mxu1 }
 0x43a   : > { %v5616_v24 = vpop.f32.mrb[85].mxu0  ;;  %v4753_v63 = vpop.f32.mrb[71].mxu1 }
 0x43b   : > { %v5617_v31 = vpop.f32.mrb[86].mxu0 }
 0x43c   : > { %v5618_v52 = vpop.f32.mrb[87].mxu0 }
 0x43f   : > { %v5090_v16 = vpop.f32.mrb[72].mxu1 }
 0x440   : > { %v5091_v28 = vpop.f32.mrb[73].mxu1 }
 0x441   : > { %v5621_v15 = vpop.f32.mrb[88].mxu0  ;;  %v5092_v12 = vpop.f32.mrb[74].mxu1 }
 0x442   : > { %v5622_v59 = vpop.f32.mrb[89].mxu0  ;;  %v5093_v38 = vpop.f32.mrb[75].mxu1 }
 0x443   : > { %v5623_v41 = vpop.f32.mrb[90].mxu0 }
 0x444   : > { %v5624_v21 = vpop.f32.mrb[91].mxu0 }
 0x447   : > { %v5096_v25 = vpop.f32.mrb[76].mxu1 }
 0x448   : > { %v5097_v34 = vpop.f32.mrb[77].mxu1 }
 0x449   : > { %v5098_v43 = vpop.f32.mrb[78].mxu1 }
 0x44a   : > { %v5099_v26 = vpop.f32.mrb[79].mxu1 }
 0x44f   : > { %v5102_v8 = vpop.f32.mrb[80].mxu1 }
 0x450   : > { %v5103_v37 = vpop.f32.mrb[81].mxu1 }
 0x451   : > { %v9708_v35 = vpop.f32.mrb[92].mxu0  ;;  %v5104_v20 = vpop.f32.mrb[82].mxu1 }
 0x452   : > { %v5637_v60 = vpop.f32.mrb[93].mxu0  ;;  %v5105_v4 = vpop.f32.mrb[83].mxu1 }
 0x453   : > { %v9710_v44 = vpop.f32.mrb[94].mxu0 }
 0x454   : > { %v5640_v5 = vpop.f32.mrb[95].mxu0 }
 0x457   : > { %v5108_v51 = vpop.f32.mrb[84].mxu1 }
 0x458   : > { %v5109_v54 = vpop.f32.mrb[85].mxu1 }
 0x459   : > { %v9712_v40 = vpop.f32.mrb[96].mxu0  ;;  %v5110_v10 = vpop.f32.mrb[86].mxu1 }
 0x45a   : > { %v5645_v46 = vpop.f32.mrb[97].mxu0  ;;  %v5111_v58 = vpop.f32.mrb[87].mxu1 }
 0x45b   : > { %v9714_v56 = vpop.f32.mrb[98].mxu0 }
 0x45c   : > { %v5648_v39 = vpop.f32.mrb[99].mxu0 }
 0x45f   : > { %v5114_v1 = vpop.f32.mrb[88].mxu1 }
 0x460   : > { %v5115_v9 = vpop.f32.mrb[89].mxu1 }
 0x461   : > { %v9716_v24 = vpop.f32.mrb[100].mxu0  ;;  %v5116_v63 = vpop.f32.mrb[90].mxu1 }
 0x462   : > { %v5653_v31 = vpop.f32.mrb[101].mxu0  ;;  %v5117_v52 = vpop.f32.mrb[91].mxu1 }
 0x463   : > { %v9718_v16 = vpop.f32.mrb[102].mxu0 }
 0x464   : > { %v5656_v28 = vpop.f32.mrb[103].mxu0 }
 0x467   : > { %v5120_v15 = vpop.f32.mrb[92].mxu1 }
 0x468   : > { %v9721_v12 = vadd.f32 %v5120_v15, %v9603_v33  ;;  %v5122_v59 = vpop.f32.mrb[93].mxu1 }
 0x469   : > { %v9723_v38 = vpop.f32.mrb[104].mxu0  ;;  %v5123_v41 = vpop.f32.mrb[94].mxu1 }
 0x46a   : > { %v9726_v21 = vadd.f32 %v5123_v41, %v9606_v18  ;;  %v5661_v25 = vpop.f32.mrb[105].mxu0  ;;  %v5125_v34 = vpop.f32.mrb[95].mxu1 }
 0x46b   : > { %v9728_v43 = vpop.f32.mrb[106].mxu0 }
 0x46c   : > { %v5664_v26 = vpop.f32.mrb[107].mxu0 }
 0x46f   : > { %v5128_v8 = vpop.f32.mrb[96].mxu1 }
 0x470   : > { %v5129_v37 = vadd.f32 %v5128_v8, %v9615_v17  ;;  %v5130_v20 = vpop.f32.mrb[97].mxu1 }
 0x471   : > { %v9731_v60 = vpop.f32.mrb[108].mxu0  ;;  %v5131_v33 = vpop.f32.mrb[98].mxu1 }
 0x472   : > { %v9734_v4 = vadd.f32 %v9644_v49, %v5129_v37  ;;  %v5132_v5 = vadd.f32 %v5131_v33, %v9618_v48  ;;  %v5669_v51 = vpop.f32.mrb[109].mxu0  ;;  %v5133_v18 = vpop.f32.mrb[99].mxu1 }
 0x473   : > { %v9737_v54 = vpop.f32.mrb[110].mxu0 }
 0x474   : > { %v9740_v10 = vadd.f32 %v9648_v55, %v5132_v5  ;;  %v5672_v46 = vpop.f32.mrb[111].mxu0 }
 0x477   : > { %v5136_v58 = vpop.f32.mrb[100].mxu1 }
 0x478   : > { %v5137_v17 = vadd.f32 %v5136_v58, %v9627_v6  ;;  %v5138_v39 = vpop.f32.mrb[101].mxu1 }
 0x479   : > { %v9743_v1 = vpop.f32.mrb[112].mxu0  ;;  %v5139_v9 = vpop.f32.mrb[102].mxu1 }
 0x47a   : > { %v9746_v49 = vadd.f32 %v9639_v3, %v5137_v17  ;;  %v5140_v48 = vadd.f32 %v5139_v9, %v9630_v42  ;;  %v5677_v63 = vpop.f32.mrb[113].mxu0  ;;  %v5141_v31 = vpop.f32.mrb[103].mxu1 }
 0x47b   : > { %v9749_v52 = vpop.f32.mrb[114].mxu0 }
 0x47c   : > { %v9752_v55 = vadd.f32 %v9646_v50, %v5140_v48  ;;  %v5680_v28 = vpop.f32.mrb[115].mxu0 }
 0x47f   : > { %v5144_v15 = vpop.f32.mrb[104].mxu1 }
 0x480   : > { %v5145_v6 = vadd.f32 %v5144_v15, %v9637_v47  ;;  %v5146_v59 = vpop.f32.mrb[105].mxu1 }
 0x481   : > { %v9755_v41 = vpop.f32.mrb[116].mxu0  ;;  %v5147_v25 = vpop.f32.mrb[106].mxu1 }
 0x482   : > { %v9758_v3 = vadd.f32 %v9663_v53, %v5145_v6  ;;  %v5148_v42 = vadd.f32 %v5147_v25, %v9642_v13  ;;  %v5685_v34 = vpop.f32.mrb[117].mxu0  ;;  %v5149_v26 = vpop.f32.mrb[107].mxu1 }
 0x483   : > { %v9761_v8 = vpop.f32.mrb[118].mxu0 }
 0x484   : > { %v9764_v50 = vadd.f32 %v9668_v45, %v5148_v42  ;;  %v5688_v37 = vpop.f32.mrb[119].mxu0 }
 0x487   : > { %v5152_v20 = vpop.f32.mrb[108].mxu1 }
 0x488   : > { %v5153_v47 = vadd.f32 %v5152_v20, %v9655_v0  ;;  %v5154_v33 = vpop.f32.mrb[109].mxu1 }
 0x489   : > { %v5691_v5 = vpop.f32.mrb[120].mxu0  ;;  %v5155_v51 = vpop.f32.mrb[110].mxu1 }
 0x48a   : > { %v9768_v18 = vadd.f32 %v9658_v11, %v5153_v47  ;;  %v5156_v53 = vadd.f32 %v5155_v51, %v9661_v32  ;;  %v5692_v13 = vpop.f32.mrb[121].mxu0  ;;  %v5157_v46 = vpop.f32.mrb[111].mxu1 }
 0x48b   : > { %v5693_v58 = vpop.f32.mrb[122].mxu0 }
 0x48c   : > { %v9772_v17 = vadd.f32 %v9666_v62, %v5156_v53  ;;  %v5694_v45 = vpop.f32.mrb[123].mxu0 }
 0x48f   : > { %v5160_v39 = vpop.f32.mrb[112].mxu1 }
 0x490   : > { %v5161_v9 = vadd.f32 %v5160_v39, %v9675_v36  ;;  %v5162_v48 = vpop.f32.mrb[113].mxu1 }
 0x491   : > { %v5697_v0 = vpop.f32.mrb[124].mxu0  ;;  %v5163_v63 = vpop.f32.mrb[114].mxu1 }
 0x492   : > { %v9776_v31 = vadd.f32 %v9683_v27, %v5161_v9  ;;  %v5164_v11 = vadd.f32 %v5163_v63, %v9681_v2  ;;  %v5698_v28 = vpop.f32.mrb[125].mxu0  ;;  %v5165_v32 = vpop.f32.mrb[115].mxu1 }
 0x493   : > { %v5699_v15 = vpop.f32.mrb[126].mxu0 }
 0x494   : > { %v9780_v6 = vadd.f32 %v9687_v29, %v5164_v11  ;;  %v5700_v62 = vpop.f32.mrb[127].mxu0 }
 0x497   : > { %v5168_v59 = vpop.f32.mrb[116].mxu1 }
 0x498   : > { %v5169_v25 = vadd.f32 %v5168_v59, %v9692_v61  ;;  %v5170_v42 = vpop.f32.mrb[117].mxu1 }
 0x499   : > { %v5703_v36 = vpop.f32.mrb[128].mxu0  ;;  %v5171_v34 = vpop.f32.mrb[118].mxu1 }
 0x49a   : > { %v9784_v26 = vadd.f32 %v9677_v23, %v5169_v25  ;;  %v5172_v27 = vadd.f32 %v5171_v34, %v9695_v57  ;;  %v5704_v37 = vpop.f32.mrb[129].mxu0  ;;  %v5173_v2 = vpop.f32.mrb[119].mxu1 }
 0x49b   : > { %v5705_v20 = vpop.f32.mrb[130].mxu0 }
 0x49c   : > { %v9788_v47 = vadd.f32 %v9685_v22, %v5172_v27  ;;  %v5706_v29 = vpop.f32.mrb[131].mxu0 }
 0x49f   : > { %v5176_v33 = vpop.f32.mrb[120].mxu1 }
 0x4a0   : > { %v5177_v5 = vadd.f32 %v5176_v33, %v9703_v14  ;;  %v5178_v51 = vpop.f32.mrb[121].mxu1 }
 0x4a1   : > { %v6831_v61 = vpop.f32.mrb[132].mxu0  ;;  %v5179_v53 = vpop.f32.mrb[122].mxu1 }
 0x4a2   : > { %v9792_v13 = vadd.f32 %v9697_v7, %v5177_v5  ;;  %v5180_v23 = vadd.f32 %v5179_v53, %v9706_v30  ;;  %v5754_v46 = vpop.f32.mrb[133].mxu0  ;;  %v5181_v57 = vpop.f32.mrb[123].mxu1 }
 0x4a3   : > { %v6832_v58 = vpop.f32.mrb[134].mxu0 }
 0x4a4   : > { %v9796_v45 = vadd.f32 %v9700_v19, %v5180_v23  ;;  %v5756_v22 = vpop.f32.mrb[135].mxu0 }
 0x4a7   : > { %v5184_v39 = vpop.f32.mrb[124].mxu1 }
 0x4a8   : > { %v5185_v9 = vpop.f32.mrb[125].mxu1 }
 0x4a9   : > { %v6835_v48 = vpop.f32.mrb[136].mxu0  ;;  %v5186_v14 = vpop.f32.mrb[126].mxu1 }
 0x4aa   : > { %v5766_v0 = vpop.f32.mrb[137].mxu0  ;;  %v5187_v63 = vpop.f32.mrb[127].mxu1 }
 0x4ab   : > { %v6836_v11 = vpop.f32.mrb[138].mxu0 }
 0x4ac   : > { %v5768_v7 = vpop.f32.mrb[139].mxu0 }
 0x4af   : > { %v5190_v28 = vpop.f32.mrb[128].mxu1 }
 0x4b0   : > { %v5191_v32 = vpop.f32.mrb[129].mxu1 }
 0x4b1   : > { %v6839_v30 = vpop.f32.mrb[44].mxu0  ;;  %v5192_v15 = vpop.f32.mrb[130].mxu1 }
 0x4b2   : > { %v6915_v62 = vadd.f32 %v6839_v30, %v9721_v12  ;;  %v5778_v59 = vpop.f32.mrb[45].mxu0  ;;  %v5193_v19 = vpop.f32.mrb[131].mxu1 }
 0x4b3   : > { %v6840_v25 = vpop.f32.mrb[46].mxu0 }
 0x4b4   : > { %5893 = vst [vmem:[%s7318_s13] sm:$0xff] %v6915_v62  ;;  %v6918_v42 = vadd.f32 %v6840_v25, %v9726_v21  ;;  %v5780_v36 = vpop.f32.mrb[47].mxu0 }
 0x4b6   : > { %5894 = vst [vmem:[%s7318_s13 + $0x8] sm:$0xff] %v6918_v42 }
 0x4b7   : > { %v5196_v34 = vpop.f32.mrb[132].mxu1 }
 0x4b8   : > { %v5197_v27 = vpop.f32.mrb[133].mxu1 }
 0x4b9   : > { %v6843_v37 = vpop.f32.mrb[140].mxu0  ;;  %v5198_v2 = vpop.f32.mrb[134].mxu1 }
 0x4ba   : > { %v5801_v20 = vadd.f32 %v6843_v37, %v9712_v40  ;;  %v5792_v29 = vpop.f32.mrb[141].mxu0  ;;  %v5199_v12 = vpop.f32.mrb[135].mxu1 }
 0x4bb   : > { %v5793_v33 = vadd.f32 %v5792_v29, %v9708_v35  ;;  %v6844_v5 = vpop.f32.mrb[142].mxu0 }
 0x4bc   : > { %v5881_v51 = vadd.f32 %v5801_v20, %v9746_v49  ;;  %v5804_v21 = vadd.f32 %v6844_v5, %v9714_v56  ;;  %v5795_v61 = vpop.f32.mrb[143].mxu0 }
 0x4bd   : > { %v5879_v53 = vadd.f32 %v5793_v33, %v9734_v4  ;;  %v5796_v23 = vadd.f32 %v5795_v61, %v9710_v44 }
 0x4be   : > { %5897 = vst [vmem:[%s7318_s13 + $0x20] sm:$0xff] %v5881_v51  ;;  %v5882_v46 = vadd.f32 %v5804_v21, %v9752_v55 }
 0x4bf   : > { %5895 = vst [vmem:[%s7318_s13 + $0x10] sm:$0xff] %v5879_v53  ;;  %v5880_v40 = vadd.f32 %v5796_v23, %v9740_v10  ;;  %v5202_v57 = vpop.f32.mrb[136].mxu1 }
 0x4c0   : > { %5898 = vst [vmem:[%s7318_s13 + $0x28] sm:$0xff] %v5882_v46  ;;  %v5203_v35 = vpop.f32.mrb[137].mxu1 }
 0x4c1   : > { %5896 = vst [vmem:[%s7318_s13 + $0x18] sm:$0xff] %v5880_v40  ;;  %v6847_v49 = vpop.f32.mrb[144].mxu0  ;;  %v5204_v58 = vpop.f32.mrb[138].mxu1 }
 0x4c2   : > { %v5817_v56 = vadd.f32 %v6847_v49, %v9723_v38  ;;  %v5808_v4 = vpop.f32.mrb[145].mxu0  ;;  %v5205_v44 = vpop.f32.mrb[139].mxu1 }
 0x4c3   : > { %v5809_v22 = vadd.f32 %v5808_v4, %v9716_v24  ;;  %v6848_v55 = vpop.f32.mrb[146].mxu0 }
 0x4c4   : > { %v5885_v39 = vadd.f32 %v5817_v56, %v9768_v18  ;;  %v5820_v10 = vadd.f32 %v6848_v55, %v9728_v43  ;;  %v5811_v9 = vpop.f32.mrb[147].mxu0 }
 0x4c5   : > { %v5883_v48 = vadd.f32 %v5809_v22, %v9758_v3  ;;  %v5812_v14 = vadd.f32 %v5811_v9, %v9718_v16 }
 0x4c6   : > { %5901 = vst [vmem:[%s7318_s13 + $0x40] sm:$0xff] %v5885_v39  ;;  %v5886_v0 = vadd.f32 %v5820_v10, %v9772_v17 }
 0x4c7   : > { %5899 = vst [vmem:[%s7318_s13 + $0x30] sm:$0xff] %v5883_v48  ;;  %v5884_v38 = vadd.f32 %v5812_v14, %v9764_v50  ;;  %v5208_v63 = vpop.f32.mrb[140].mxu1 }
 0x4c8   : > { %5902 = vst [vmem:[%s7318_s13 + $0x48] sm:$0xff] %v5886_v0  ;;  %v5209_v24 = vpop.f32.mrb[141].mxu1 }
 0x4c9   : > { %5900 = vst [vmem:[%s7318_s13 + $0x38] sm:$0xff] %v5884_v38  ;;  %v6851_v18 = vpop.f32.mrb[148].mxu0  ;;  %v5210_v11 = vpop.f32.mrb[142].mxu1 }
 0x4ca   : > { %v5833_v43 = vadd.f32 %v6851_v18, %v9743_v1  ;;  %v5824_v3 = vpop.f32.mrb[149].mxu0  ;;  %v5211_v16 = vpop.f32.mrb[143].mxu1 }
 0x4cb   : > { %v5825_v7 = vadd.f32 %v5824_v3, %v9731_v60  ;;  %v6852_v17 = vpop.f32.mrb[150].mxu0 }
 0x4cc   : > { %v5889_v28 = vadd.f32 %v5833_v43, %v9784_v26  ;;  %v5836_v50 = vadd.f32 %v6852_v17, %v9749_v52  ;;  %v5827_v32 = vpop.f32.mrb[151].mxu0 }
 0x4cd   : > { %v5887_v30 = vadd.f32 %v5825_v7, %v9776_v31  ;;  %v5828_v15 = vadd.f32 %v5827_v32, %v9737_v54 }
 0x4ce   : > { %5905 = vst [vmem:[%s7318_s13 + $0x60] sm:$0xff] %v5889_v28  ;;  %v5890_v62 = vadd.f32 %v5836_v50, %v9788_v47 }
 0x4cf   : > { %5903 = vst [vmem:[%s7318_s13 + $0x50] sm:$0xff] %v5887_v30  ;;  %v5888_v1 = vadd.f32 %v5828_v15, %v9780_v6  ;;  %v5709_v59 = vpop.f32.mrb[144].mxu1 }
 0x4d0   : > { %5906 = vst [vmem:[%s7318_s13 + $0x68] sm:$0xff] %v5890_v62  ;;  %v5710_v60 = vpop.f32.mrb[145].mxu1 }
 0x4d1   : > { %5904 = vst [vmem:[%s7318_s13 + $0x58] sm:$0xff] %v5888_v1  ;;  %v6855_v26 = vpop.f32.mrb[152].mxu0  ;;  %v5711_v19 = vpop.f32.mrb[146].mxu1 }
 0x4d2   : > { %v5840_v52 = vpop.f32.mrb[153].mxu0  ;;  %v5712_v25 = vpop.f32.mrb[147].mxu1 }
 0x4d3   : > { %v5841_v31 = vadd.f32 %v5840_v52, %v9755_v41  ;;  %v6856_v42 = vpop.f32.mrb[154].mxu0 }
 0x4d4   : > { %v5843_v54 = vpop.f32.mrb[155].mxu0 }
 0x4d5   : > { %v5891_v36 = vadd.f32 %v5841_v31, %v9792_v13  ;;  %v5844_v47 = vadd.f32 %v5843_v54, %v9761_v8 }
 0x4d7   : > { %5907 = vst [vmem:[%s7318_s13 + $0x70] sm:$0xff] %v5891_v36  ;;  %v5892_v6 = vadd.f32 %v5844_v47, %v9796_v45  ;;  %v5715_v34 = vpop.f32.mrb[148].mxu1 }
 0x4d8   : > { %v5716_v27 = vpop.f32.mrb[149].mxu1 }
 0x4d9   : > { %5908 = vst [vmem:[%s7318_s13 + $0x78] sm:$0xff] %v5892_v6  ;;  %v6859_v37 = vpop.f32.mrb[156].mxu0  ;;  %v5717_v2 = vpop.f32.mrb[150].mxu1 }
 0x4da   : > { %v5854_v20 = vpop.f32.mrb[157].mxu0  ;;  %v5718_v29 = vpop.f32.mrb[151].mxu1 }
 0x4db   : > { %v6860_v12 = vpop.f32.mrb[158].mxu0 }
 0x4dc   : > { %v5856_v33 = vpop.f32.mrb[159].mxu0 }
 0x4e1   : > { %v6863_v5 = vpop.f32.mrb[160].mxu0 }
 0x4e2   : > { %v5866_v41 = vpop.f32.mrb[161].mxu0 }
 0x4e3   : > { %v6864_v51 = vpop.f32.mrb[162].mxu0 }
 0x4e4   : > { %v5868_v21 = vpop.f32.mrb[163].mxu0 }
 0x4e5 PF: > { %s15_s22 = sadd.s32 1, %s7184_s22   ;;  %s10109_s18 = smov %s7176_s20 }
 0x4e6   : > { %p12_p10 = scmp.ge.s32.totalorder %s15_s22, 6   ;;  %s10110_s19 = smov %s7180_s21 }
 0x4e7   : > { %s10111_s20 = smov %s10114_s23  ;;  %s10112_s21 = smov %s10118_s24 }
 0x4e8   :  { %14 = sbr.rel (!%p12_p10) target bundleno = 3 (0x3), region = 107 }

</bundles_post_ra>
